<compile_context>
chip_gen: v7x
topology: tpu7x:2x2x1
jax: 0.10.0
libtpu: 0.0.40
codegen_flags: <defaults>
</compile_context>

<pallas_src>
import functools
import math

import jax
import jax.numpy as jnp
import numpy as np
from jax.experimental import pallas as pl
from jax.experimental.pallas import tpu as pltpu


# ---------------------------------------------------------------------------
# Fused whole-stack kernel
# ---------------------------------------------------------------------------
def _ln_f32(z, g, b, eps):
    m = jnp.mean(z, axis=-1, keepdims=True)
    zc = z - m
    v = jnp.mean(zc * zc, axis=-1, keepdims=True)
    return zc * jax.lax.rsqrt(v + eps) * g + b


def _gmsa_stack_kernel(fr_ref, ft_ref,
                       wq_ref, bq_ref, wkv_ref, bkv_ref, wo_ref, bo_ref,
                       g2_ref, bn2_ref,
                       w1_ref, b1_ref, w2_ref, b2_ref,
                       g3_ref, bn3_ref,
                       o_ref,
                       act_sc,
                       *, nhead, B, Lq, Lk, eps):
    l = pl.program_id(0)

    # Layer 0: initialize the resident activation from the input.
    @pl.when(l == 0)
    def _():
        act_sc[...] = fr_ref[...]

    act = act_sc[...]                               # (B*Lq, E) f32, running activation
    E = act.shape[-1]
    dh = E // nhead
    scale = 1.0 / math.sqrt(dh)

    # ---- Q / fused-KV projections (bf16 MXU operands, f32 accumulate) ----
    q = jnp.dot(act.astype(jnp.bfloat16), wq_ref[0],
                preferred_element_type=jnp.float32) + bq_ref[0]          # (B*Lq, E)
    kv = jnp.dot(ft_ref[...].astype(jnp.bfloat16), wkv_ref[0],
                 preferred_element_type=jnp.float32) + bkv_ref[0]        # (B*Lk, 2E)

    # ---- multi-head attention (tiny tiles; kept in f32, static loops) ----
    batch_outs = []
    for b in range(B):
        qb = q[b * Lq:(b + 1) * Lq, :]
        kb = kv[b * Lk:(b + 1) * Lk, :E]
        vb = kv[b * Lk:(b + 1) * Lk, E:]
        head_outs = []
        for h in range(nhead):
            qh = qb[:, h * dh:(h + 1) * dh]
            kh = kb[:, h * dh:(h + 1) * dh]
            vh = vb[:, h * dh:(h + 1) * dh]
            s = jax.lax.dot_general(qh, kh, (((1,), (1,)), ((), ())),
                                    preferred_element_type=jnp.float32) * scale
            s = s - jnp.max(s, axis=-1, keepdims=True)
            p = jnp.exp(s)
            p = p * pl.reciprocal(jnp.sum(p, axis=-1, keepdims=True), approx=True)
            head_outs.append(jnp.dot(p, vh, preferred_element_type=jnp.float32))
        batch_outs.append(jnp.concatenate(head_outs, axis=-1))           # (Lq, E)
    attn = jnp.concatenate(batch_outs, axis=0)                           # (B*Lq, E)

    # ---- output projection + residual + LayerNorm2 ----
    proj = jnp.dot(attn.astype(jnp.bfloat16), wo_ref[0],
                   preferred_element_type=jnp.float32) + bo_ref[0]
    x = _ln_f32(act + proj, g2_ref[0], bn2_ref[0], eps)

    # ---- fused FFN: linear2(relu(linear1(x))); intermediate stays in VMEM ----
    h1 = jnp.dot(x.astype(jnp.bfloat16), w1_ref[0],
                 preferred_element_type=jnp.float32) + b1_ref[0]
    h1 = jnp.maximum(h1, 0.0)
    y = jnp.dot(h1.astype(jnp.bfloat16), w2_ref[0],
                preferred_element_type=jnp.float32) + b2_ref[0]

    # ---- residual + LayerNorm3; carry to next layer + write output block ----
    new_act = _ln_f32(x + y, g3_ref[0], bn3_ref[0], eps)
    act_sc[...] = new_act
    o_ref[...] = new_act


def gmsa_ini_forward(fr, ft, stacked, nhead, eps=1e-5):
    """fr: (B, Lq, E), ft: (B, Lk, E); stacked: dict of (num_layers, ...) params."""
    B, Lq, E = fr.shape
    _, Lk, _ = ft.shape
    R, Rk = B * Lq, B * Lk
    L = stacked["wq_t"].shape[0]
    F = stacked["w1_t"].shape[-1]
    assert E % nhead == 0

    f32, bf16 = jnp.float32, jnp.bfloat16
    fr2d = fr.reshape(R, E).astype(f32)
    ft2d = ft.reshape(Rk, E).astype(f32)

    # matmul weights as bf16 (halves weight DMA, bf16-native MXU); biases/LN in f32
    wq = stacked["wq_t"].astype(bf16)                      # (L, E, E)
    wkv = stacked["wkv_t"].astype(bf16)                    # (L, E, 2E)
    wo = stacked["wo_t"].astype(bf16)                      # (L, E, E)
    w1 = stacked["w1_t"].astype(bf16)                      # (L, E, F)
    w2 = stacked["w2_t"].astype(bf16)                      # (L, F, E)
    bq = stacked["bq"].reshape(L, 1, E).astype(f32)
    bkv = stacked["bkv"].reshape(L, 1, 2 * E).astype(f32)
    bo = stacked["bo"].reshape(L, 1, E).astype(f32)
    b1 = stacked["b1"].reshape(L, 1, F).astype(f32)
    b2 = stacked["b2"].reshape(L, 1, E).astype(f32)
    g2 = stacked["g2"].reshape(L, 1, E).astype(f32)
    bn2 = stacked["bn2"].reshape(L, 1, E).astype(f32)
    g3 = stacked["g3"].reshape(L, 1, E).astype(f32)
    bn3 = stacked["bn3"].reshape(L, 1, E).astype(f32)

    def wspec(n2, n3):
        return pl.BlockSpec((1, n2, n3), lambda l: (l, 0, 0))

    kern = functools.partial(_gmsa_stack_kernel,
                             nhead=nhead, B=B, Lq=Lq, Lk=Lk, eps=eps)

    out = pl.pallas_call(
        kern,
        out_shape=jax.ShapeDtypeStruct((R, E), f32),
        grid=(L,),
        in_specs=[
            pl.BlockSpec((R, E), lambda l: (0, 0)),        # fr (loaded once)
            pl.BlockSpec((Rk, E), lambda l: (0, 0)),       # ft (loaded once)
            wspec(E, E), wspec(1, E),                      # wq, bq
            wspec(E, 2 * E), wspec(1, 2 * E),              # wkv, bkv
            wspec(E, E), wspec(1, E),                      # wo, bo
            wspec(1, E), wspec(1, E),                      # g2, bn2
            wspec(E, F), wspec(1, F),                      # w1, b1
            wspec(F, E), wspec(1, E),                      # w2, b2
            wspec(1, E), wspec(1, E),                      # g3, bn3
        ],
        out_specs=pl.BlockSpec((R, E), lambda l: (0, 0)),
        scratch_shapes=[pltpu.VMEM((R, E), f32)],          # resident activation
        compiler_params=pltpu.CompilerParams(
            # layers are sequentially dependent -> "arbitrary"
            dimension_semantics=("arbitrary",),
        ),
    )(fr2d, ft2d,
      wq, bq, wkv, bkv, wo, bo, g2, bn2, w1, b1, w2, b2, g3, bn3)
    return out.reshape(B, Lq, E)


# ---------------------------------------------------------------------------
# Pure-JAX reference (validates the Pallas path)
# ---------------------------------------------------------------------------
def _ln_ref(z, g, b, eps=1e-5):
    m = jnp.mean(z, axis=-1, keepdims=True)
    v = jnp.mean((z - m) ** 2, axis=-1, keepdims=True)
    return (z - m) * jax.lax.rsqrt(v + eps) * g + b


def gmsa_layer_ref(fr, ft, p, nhead):
    B, Lq, E = fr.shape
    Lk = ft.shape[1]
    dh = E // nhead
    q = fr @ p["wq_t"] + p["bq"]
    k = ft @ p["wkv_t"][:, :E] + p["bkv"][:E]
    v = ft @ p["wkv_t"][:, E:] + p["bkv"][E:]
    qh = q.reshape(B, Lq, nhead, dh).transpose(0, 2, 1, 3)
    kh = k.reshape(B, Lk, nhead, dh).transpose(0, 2, 1, 3)
    vh = v.reshape(B, Lk, nhead, dh).transpose(0, 2, 1, 3)
    s = jnp.einsum("bhqd,bhkd->bhqk", qh, kh) / np.sqrt(dh)
    a = jax.nn.softmax(s, axis=-1)
    o = jnp.einsum("bhqk,bhkd->bhqd", a, vh).transpose(0, 2, 1, 3).reshape(B, Lq, E)
    proj = o @ p["wo_t"] + p["bo"]
    x = _ln_ref(fr + proj, p["g2"], p["bn2"])
    h = jnp.maximum(x @ p["w1_t"] + p["b1"], 0.0) @ p["w2_t"] + p["b2"]
    return _ln_ref(x + h, p["g3"], p["bn3"])


def gmsa_ini_ref(fr, ft, layer_params, nhead):
    out = fr
    for p in layer_params:
        out = gmsa_layer_ref(out, ft, p, nhead)
    return out


# ---------------------------------------------------------------------------
def make_layer_params(key, d_model, dim_feedforward):
    ks = jax.random.split(key, 12)
    s = 0.05
    E, F = d_model, dim_feedforward
    wq = s * jax.random.normal(ks[0], (E, E), jnp.float32)
    wk = s * jax.random.normal(ks[1], (E, E), jnp.float32)
    wv = s * jax.random.normal(ks[2], (E, E), jnp.float32)
    wo = s * jax.random.normal(ks[3], (E, E), jnp.float32)
    w1 = s * jax.random.normal(ks[4], (F, E), jnp.float32)
    w2 = s * jax.random.normal(ks[5], (E, F), jnp.float32)
    return {
        # PyTorch Linear: y = x @ W^T + b  -> store transposed weights
        "wq_t": wq.T,
        "bq": s * jax.random.normal(ks[6], (E,), jnp.float32),
        "wkv_t": jnp.concatenate([wk.T, wv.T], axis=1),                 # (E, 2E)
        "bkv": s * jax.random.normal(ks[7], (2 * E,), jnp.float32),
        "wo_t": wo.T,
        "bo": s * jax.random.normal(ks[8], (E,), jnp.float32),
        "w1_t": w1.T,                                                   # (E, F)
        "b1": s * jax.random.normal(ks[9], (F,), jnp.float32),
        "w2_t": w2.T,                                                   # (F, E)
        "b2": s * jax.random.normal(ks[10], (E,), jnp.float32),
        "g2": 1.0 + s * jax.random.normal(ks[11], (E,), jnp.float32),
        "bn2": jnp.zeros((E,), jnp.float32),
        "g3": jnp.ones((E,), jnp.float32),
        "bn3": jnp.zeros((E,), jnp.float32),
    }


if __name__ == "__main__":
    # module defaults: d_model=256, nhead=8, dim_feedforward=2048, num_layers=2
    d_model, nhead, dim_ff, num_layers = 256, 8, 2048, 2
    B, Lq, Lk = 2, 8, 8

    key = jax.random.PRNGKey(0)
    k_fr, k_ft, k_p = jax.random.split(key, 3)
    fr = jax.random.normal(k_fr, (B, Lq, d_model), dtype=jnp.float32)
    ft = jax.random.normal(k_ft, (B, Lk, d_model), dtype=jnp.float32)

    layer_keys = jax.random.split(k_p, num_layers)
    layer_params = [make_layer_params(lk, d_model, dim_ff) for lk in layer_keys]
    stacked = {k: jnp.stack([p[k] for p in layer_params]) for k in layer_params[0]}

    fwd = jax.jit(functools.partial(gmsa_ini_forward, nhead=nhead))
    out = jax.block_until_ready(fwd(fr, ft, stacked))
    assert out.shape == (B, Lq, d_model), out.shape
    assert bool(jnp.isfinite(out).all())

    ref = jax.block_until_ready(gmsa_ini_ref(fr, ft, layer_params, nhead))
    # bf16 matmul operands + approx reciprocal -> slightly looser tolerance vs f32 ref
    np.testing.assert_allclose(np.asarray(out), np.asarray(ref),
                               rtol=3e-2, atol=3e-2)

    print("KERNEL_OK")
</pallas_src>

<mosaic_0001>
module attributes {stable_mosaic.version = 11 : i64} {
  func.func @_gmsa_stack_kernel(%arg0: i32, %arg1: memref<16x256xf32, #tpu.memory_space<vmem>>, %arg2: memref<16x256xf32, #tpu.memory_space<vmem>>, %arg3: memref<1x256x256xbf16, #tpu.memory_space<vmem>>, %arg4: memref<1x1x256xf32, #tpu.memory_space<vmem>>, %arg5: memref<1x256x512xbf16, #tpu.memory_space<vmem>>, %arg6: memref<1x1x512xf32, #tpu.memory_space<vmem>>, %arg7: memref<1x256x256xbf16, #tpu.memory_space<vmem>>, %arg8: memref<1x1x256xf32, #tpu.memory_space<vmem>>, %arg9: memref<1x1x256xf32, #tpu.memory_space<vmem>>, %arg10: memref<1x1x256xf32, #tpu.memory_space<vmem>>, %arg11: memref<1x256x2048xbf16, #tpu.memory_space<vmem>>, %arg12: memref<1x1x2048xf32, #tpu.memory_space<vmem>>, %arg13: memref<1x2048x256xbf16, #tpu.memory_space<vmem>>, %arg14: memref<1x1x256xf32, #tpu.memory_space<vmem>>, %arg15: memref<1x1x256xf32, #tpu.memory_space<vmem>>, %arg16: memref<1x1x256xf32, #tpu.memory_space<vmem>>, %arg17: memref<16x256xf32, #tpu.memory_space<vmem>>, %arg18: memref<16x256xf32, #tpu.memory_space<vmem>>) attributes {dimension_semantics = [#tpu.dimension_semantics<arbitrary>], iteration_bounds = array<i64: 2>, scalar_prefetch = 0 : i64, scratch_operands = 1 : i64, tpu.core_type = #tpu.core_type<tc>, window_params = [{pipeline_mode = #tpu.pipeline_mode<synchronous>, transform_indices = @transform_0, window_bounds = array<i64: 16, 256>}, {pipeline_mode = #tpu.pipeline_mode<synchronous>, transform_indices = @transform_1, window_bounds = array<i64: 16, 256>}, {transform_indices = @transform_2, window_bounds = array<i64: 1, 256, 256>}, {transform_indices = @transform_3, window_bounds = array<i64: 1, 1, 256>}, {transform_indices = @transform_4, window_bounds = array<i64: 1, 256, 512>}, {transform_indices = @transform_5, window_bounds = array<i64: 1, 1, 512>}, {transform_indices = @transform_6, window_bounds = array<i64: 1, 256, 256>}, {transform_indices = @transform_7, window_bounds = array<i64: 1, 1, 256>}, {transform_indices = @transform_8, window_bounds = array<i64: 1, 1, 256>}, {transform_indices = @transform_9, window_bounds = array<i64: 1, 1, 256>}, {transform_indices = @transform_10, window_bounds = array<i64: 1, 256, 2048>}, {transform_indices = @transform_11, window_bounds = array<i64: 1, 1, 2048>}, {transform_indices = @transform_12, window_bounds = array<i64: 1, 2048, 256>}, {transform_indices = @transform_13, window_bounds = array<i64: 1, 1, 256>}, {transform_indices = @transform_14, window_bounds = array<i64: 1, 1, 256>}, {transform_indices = @transform_15, window_bounds = array<i64: 1, 1, 256>}, {pipeline_mode = #tpu.pipeline_mode<synchronous>, transform_indices = @transform_16, window_bounds = array<i64: 16, 256>}]} {
    %c0_i32 = arith.constant 0 : i32
    %0 = arith.cmpi eq, %arg0, %c0_i32 : i32
    %1 = arith.extui %0 : i1 to i32
    %c0_i32_0 = arith.constant 0 : i32
    %2 = arith.cmpi ne, %1, %c0_i32_0 : i32
    scf.if %2 {
      %c0_145 = arith.constant 0 : index
      %c0_146 = arith.constant 0 : index
      %380 = vector.load %arg1[%c0_145, %c0_146] : memref<16x256xf32, #tpu.memory_space<vmem>>, vector<16x256xf32>
      %c0_147 = arith.constant 0 : index
      %c0_148 = arith.constant 0 : index
      %381 = vector.load %arg18[%c0_147, %c0_148] : memref<16x256xf32, #tpu.memory_space<vmem>>, vector<16x256xf32>
      tpu.vector_store %arg18[%c0_147, %c0_148], %380 {strides = array<i32>} : memref<16x256xf32, #tpu.memory_space<vmem>>, vector<16x256xf32>,
    } else {
    }
    %c0 = arith.constant 0 : index
    %c0_1 = arith.constant 0 : index
    %3 = vector.load %arg18[%c0, %c0_1] : memref<16x256xf32, #tpu.memory_space<vmem>>, vector<16x256xf32>
    %4 = arith.truncf %3 : vector<16x256xf32> to vector<16x256xbf16>
    %c0_2 = arith.constant 0 : index
    %c0_3 = arith.constant 0 : index
    %c0_4 = arith.constant 0 : index
    %5 = vector.load %arg3[%c0_2, %c0_3, %c0_4] : memref<1x256x256xbf16, #tpu.memory_space<vmem>>, vector<1x256x256xbf16>
    %6 = vector.shape_cast %5 : vector<1x256x256xbf16> to vector<256x256xbf16>
    %cst = arith.constant dense<0.000000e+00> : vector<16x256xf32>
    %7 = tpu.matmul %4, %6, %cst {dimension_numbers = #tpu.dot_dimension_numbers<[1], [0], [0], [1], [0, 0, 1, 1], [], []>} : vector<16x256xbf16>, vector<256x256xbf16>, vector<16x256xf32> -> vector<16x256xf32>
    %c0_5 = arith.constant 0 : index
    %c0_6 = arith.constant 0 : index
    %c0_7 = arith.constant 0 : index
    %8 = vector.load %arg4[%c0_5, %c0_6, %c0_7] : memref<1x1x256xf32, #tpu.memory_space<vmem>>, vector<1x1x256xf32>
    %9 = vector.shape_cast %8 : vector<1x1x256xf32> to vector<1x256xf32>
    %10 = vector.broadcast %9 : vector<1x256xf32> to vector<16x256xf32>
    %11 = arith.addf %7, %10 : vector<16x256xf32>
    %c0_8 = arith.constant 0 : index
    %c0_9 = arith.constant 0 : index
    %12 = vector.load %arg2[%c0_8, %c0_9] : memref<16x256xf32, #tpu.memory_space<vmem>>, vector<16x256xf32>
    %13 = arith.truncf %12 : vector<16x256xf32> to vector<16x256xbf16>
    %c0_10 = arith.constant 0 : index
    %c0_11 = arith.constant 0 : index
    %c0_12 = arith.constant 0 : index
    %14 = vector.load %arg5[%c0_10, %c0_11, %c0_12] : memref<1x256x512xbf16, #tpu.memory_space<vmem>>, vector<1x256x512xbf16>
    %15 = vector.shape_cast %14 : vector<1x256x512xbf16> to vector<256x512xbf16>
    %cst_13 = arith.constant dense<0.000000e+00> : vector<16x512xf32>
    %16 = tpu.matmul %13, %15, %cst_13 {dimension_numbers = #tpu.dot_dimension_numbers<[1], [0], [0], [1], [0, 0, 1, 1], [], []>} : vector<16x256xbf16>, vector<256x512xbf16>, vector<16x512xf32> -> vector<16x512xf32>
    %c0_14 = arith.constant 0 : index
    %c0_15 = arith.constant 0 : index
    %c0_16 = arith.constant 0 : index
    %17 = vector.load %arg6[%c0_14, %c0_15, %c0_16] : memref<1x1x512xf32, #tpu.memory_space<vmem>>, vector<1x1x512xf32>
    %18 = vector.shape_cast %17 : vector<1x1x512xf32> to vector<1x512xf32>
    %19 = vector.broadcast %18 : vector<1x512xf32> to vector<16x512xf32>
    %20 = arith.addf %16, %19 : vector<16x512xf32>
    %21 = vector.extract_strided_slice %11 {offsets = [0, 0], sizes = [8, 256], strides = [1, 1]} : vector<16x256xf32> to vector<8x256xf32>
    %22 = vector.extract_strided_slice %20 {offsets = [0, 0], sizes = [8, 256], strides = [1, 1]} : vector<16x512xf32> to vector<8x256xf32>
    %23 = vector.extract_strided_slice %20 {offsets = [0, 256], sizes = [8, 256], strides = [1, 1]} : vector<16x512xf32> to vector<8x256xf32>
    %24 = vector.extract_strided_slice %21 {offsets = [0, 0], sizes = [8, 32], strides = [1, 1]} : vector<8x256xf32> to vector<8x32xf32>
    %25 = vector.extract_strided_slice %22 {offsets = [0, 0], sizes = [8, 32], strides = [1, 1]} : vector<8x256xf32> to vector<8x32xf32>
    %26 = vector.extract_strided_slice %23 {offsets = [0, 0], sizes = [8, 32], strides = [1, 1]} : vector<8x256xf32> to vector<8x32xf32>
    %cst_17 = arith.constant dense<0.000000e+00> : vector<8x8xf32>
    %27 = tpu.matmul %24, %25, %cst_17 {dimension_numbers = #tpu.dot_dimension_numbers<[1], [1], [0], [0], [0, 0, 1, 0], [], []>} : vector<8x32xf32>, vector<8x32xf32>, vector<8x8xf32> -> vector<8x8xf32>
    %cst_18 = arith.constant 0.176776692 : f32
    %28 = vector.broadcast %cst_18 : f32 to vector<8x8xf32>
    %29 = arith.mulf %27, %28 : vector<8x8xf32>
    %cst_19 = arith.constant dense<0xFF800000> : vector<8xf32>
    %30 = vector.multi_reduction <maximumf>, %29, %cst_19 [1] : vector<8x8xf32> to vector<8xf32>
    %31 = vector.shape_cast %30 : vector<8xf32> to vector<8x1xf32>
    %32 = vector.broadcast %31 : vector<8x1xf32> to vector<8x8xf32>
    %33 = arith.subf %29, %32 : vector<8x8xf32>
    %34 = math.exp %33 : vector<8x8xf32>
    %cst_20 = arith.constant dense<0.000000e+00> : vector<8xf32>
    %35 = vector.multi_reduction <add>, %34, %cst_20 [1] : vector<8x8xf32> to vector<8xf32>
    %36 = vector.shape_cast %35 : vector<8xf32> to vector<8x1xf32>
    %37 = tpu.reciprocal %36 {approx = true} : vector<8x1xf32> -> vector<8x1xf32>
    %38 = vector.broadcast %37 : vector<8x1xf32> to vector<8x8xf32>
    %39 = arith.mulf %34, %38 : vector<8x8xf32>
    %cst_21 = arith.constant dense<0.000000e+00> : vector<8x32xf32>
    %40 = tpu.matmul %39, %26, %cst_21 {dimension_numbers = #tpu.dot_dimension_numbers<[1], [0], [0], [1], [0, 0, 1, 1], [], []>} : vector<8x8xf32>, vector<8x32xf32>, vector<8x32xf32> -> vector<8x32xf32>
    %41 = vector.extract_strided_slice %21 {offsets = [0, 32], sizes = [8, 32], strides = [1, 1]} : vector<8x256xf32> to vector<8x32xf32>
    %42 = vector.extract_strided_slice %22 {offsets = [0, 32], sizes = [8, 32], strides = [1, 1]} : vector<8x256xf32> to vector<8x32xf32>
    %43 = vector.extract_strided_slice %23 {offsets = [0, 32], sizes = [8, 32], strides = [1, 1]} : vector<8x256xf32> to vector<8x32xf32>
    %cst_22 = arith.constant dense<0.000000e+00> : vector<8x8xf32>
    %44 = tpu.matmul %41, %42, %cst_22 {dimension_numbers = #tpu.dot_dimension_numbers<[1], [1], [0], [0], [0, 0, 1, 0], [], []>} : vector<8x32xf32>, vector<8x32xf32>, vector<8x8xf32> -> vector<8x8xf32>
    %cst_23 = arith.constant 0.176776692 : f32
    %45 = vector.broadcast %cst_23 : f32 to vector<8x8xf32>
    %46 = arith.mulf %44, %45 : vector<8x8xf32>
    %cst_24 = arith.constant dense<0xFF800000> : vector<8xf32>
    %47 = vector.multi_reduction <maximumf>, %46, %cst_24 [1] : vector<8x8xf32> to vector<8xf32>
    %48 = vector.shape_cast %47 : vector<8xf32> to vector<8x1xf32>
    %49 = vector.broadcast %48 : vector<8x1xf32> to vector<8x8xf32>
    %50 = arith.subf %46, %49 : vector<8x8xf32>
    %51 = math.exp %50 : vector<8x8xf32>
    %cst_25 = arith.constant dense<0.000000e+00> : vector<8xf32>
    %52 = vector.multi_reduction <add>, %51, %cst_25 [1] : vector<8x8xf32> to vector<8xf32>
    %53 = vector.shape_cast %52 : vector<8xf32> to vector<8x1xf32>
    %54 = tpu.reciprocal %53 {approx = true} : vector<8x1xf32> -> vector<8x1xf32>
    %55 = vector.broadcast %54 : vector<8x1xf32> to vector<8x8xf32>
    %56 = arith.mulf %51, %55 : vector<8x8xf32>
    %cst_26 = arith.constant dense<0.000000e+00> : vector<8x32xf32>
    %57 = tpu.matmul %56, %43, %cst_26 {dimension_numbers = #tpu.dot_dimension_numbers<[1], [0], [0], [1], [0, 0, 1, 1], [], []>} : vector<8x8xf32>, vector<8x32xf32>, vector<8x32xf32> -> vector<8x32xf32>
    %58 = vector.extract_strided_slice %21 {offsets = [0, 64], sizes = [8, 32], strides = [1, 1]} : vector<8x256xf32> to vector<8x32xf32>
    %59 = vector.extract_strided_slice %22 {offsets = [0, 64], sizes = [8, 32], strides = [1, 1]} : vector<8x256xf32> to vector<8x32xf32>
    %60 = vector.extract_strided_slice %23 {offsets = [0, 64], sizes = [8, 32], strides = [1, 1]} : vector<8x256xf32> to vector<8x32xf32>
    %cst_27 = arith.constant dense<0.000000e+00> : vector<8x8xf32>
    %61 = tpu.matmul %58, %59, %cst_27 {dimension_numbers = #tpu.dot_dimension_numbers<[1], [1], [0], [0], [0, 0, 1, 0], [], []>} : vector<8x32xf32>, vector<8x32xf32>, vector<8x8xf32> -> vector<8x8xf32>
    %cst_28 = arith.constant 0.176776692 : f32
    %62 = vector.broadcast %cst_28 : f32 to vector<8x8xf32>
    %63 = arith.mulf %61, %62 : vector<8x8xf32>
    %cst_29 = arith.constant dense<0xFF800000> : vector<8xf32>
    %64 = vector.multi_reduction <maximumf>, %63, %cst_29 [1] : vector<8x8xf32> to vector<8xf32>
    %65 = vector.shape_cast %64 : vector<8xf32> to vector<8x1xf32>
    %66 = vector.broadcast %65 : vector<8x1xf32> to vector<8x8xf32>
    %67 = arith.subf %63, %66 : vector<8x8xf32>
    %68 = math.exp %67 : vector<8x8xf32>
    %cst_30 = arith.constant dense<0.000000e+00> : vector<8xf32>
    %69 = vector.multi_reduction <add>, %68, %cst_30 [1] : vector<8x8xf32> to vector<8xf32>
    %70 = vector.shape_cast %69 : vector<8xf32> to vector<8x1xf32>
    %71 = tpu.reciprocal %70 {approx = true} : vector<8x1xf32> -> vector<8x1xf32>
    %72 = vector.broadcast %71 : vector<8x1xf32> to vector<8x8xf32>
    %73 = arith.mulf %68, %72 : vector<8x8xf32>
    %cst_31 = arith.constant dense<0.000000e+00> : vector<8x32xf32>
    %74 = tpu.matmul %73, %60, %cst_31 {dimension_numbers = #tpu.dot_dimension_numbers<[1], [0], [0], [1], [0, 0, 1, 1], [], []>} : vector<8x8xf32>, vector<8x32xf32>, vector<8x32xf32> -> vector<8x32xf32>
    %75 = vector.extract_strided_slice %21 {offsets = [0, 96], sizes = [8, 32], strides = [1, 1]} : vector<8x256xf32> to vector<8x32xf32>
    %76 = vector.extract_strided_slice %22 {offsets = [0, 96], sizes = [8, 32], strides = [1, 1]} : vector<8x256xf32> to vector<8x32xf32>
    %77 = vector.extract_strided_slice %23 {offsets = [0, 96], sizes = [8, 32], strides = [1, 1]} : vector<8x256xf32> to vector<8x32xf32>
    %cst_32 = arith.constant dense<0.000000e+00> : vector<8x8xf32>
    %78 = tpu.matmul %75, %76, %cst_32 {dimension_numbers = #tpu.dot_dimension_numbers<[1], [1], [0], [0], [0, 0, 1, 0], [], []>} : vector<8x32xf32>, vector<8x32xf32>, vector<8x8xf32> -> vector<8x8xf32>
    %cst_33 = arith.constant 0.176776692 : f32
    %79 = vector.broadcast %cst_33 : f32 to vector<8x8xf32>
    %80 = arith.mulf %78, %79 : vector<8x8xf32>
    %cst_34 = arith.constant dense<0xFF800000> : vector<8xf32>
    %81 = vector.multi_reduction <maximumf>, %80, %cst_34 [1] : vector<8x8xf32> to vector<8xf32>
    %82 = vector.shape_cast %81 : vector<8xf32> to vector<8x1xf32>
    %83 = vector.broadcast %82 : vector<8x1xf32> to vector<8x8xf32>
    %84 = arith.subf %80, %83 : vector<8x8xf32>
    %85 = math.exp %84 : vector<8x8xf32>
    %cst_35 = arith.constant dense<0.000000e+00> : vector<8xf32>
    %86 = vector.multi_reduction <add>, %85, %cst_35 [1] : vector<8x8xf32> to vector<8xf32>
    %87 = vector.shape_cast %86 : vector<8xf32> to vector<8x1xf32>
    %88 = tpu.reciprocal %87 {approx = true} : vector<8x1xf32> -> vector<8x1xf32>
    %89 = vector.broadcast %88 : vector<8x1xf32> to vector<8x8xf32>
    %90 = arith.mulf %85, %89 : vector<8x8xf32>
    %cst_36 = arith.constant dense<0.000000e+00> : vector<8x32xf32>
    %91 = tpu.matmul %90, %77, %cst_36 {dimension_numbers = #tpu.dot_dimension_numbers<[1], [0], [0], [1], [0, 0, 1, 1], [], []>} : vector<8x8xf32>, vector<8x32xf32>, vector<8x32xf32> -> vector<8x32xf32>
    %92 = vector.extract_strided_slice %21 {offsets = [0, 128], sizes = [8, 32], strides = [1, 1]} : vector<8x256xf32> to vector<8x32xf32>
    %93 = vector.extract_strided_slice %22 {offsets = [0, 128], sizes = [8, 32], strides = [1, 1]} : vector<8x256xf32> to vector<8x32xf32>
    %94 = vector.extract_strided_slice %23 {offsets = [0, 128], sizes = [8, 32], strides = [1, 1]} : vector<8x256xf32> to vector<8x32xf32>
    %cst_37 = arith.constant dense<0.000000e+00> : vector<8x8xf32>
    %95 = tpu.matmul %92, %93, %cst_37 {dimension_numbers = #tpu.dot_dimension_numbers<[1], [1], [0], [0], [0, 0, 1, 0], [], []>} : vector<8x32xf32>, vector<8x32xf32>, vector<8x8xf32> -> vector<8x8xf32>
    %cst_38 = arith.constant 0.176776692 : f32
    %96 = vector.broadcast %cst_38 : f32 to vector<8x8xf32>
    %97 = arith.mulf %95, %96 : vector<8x8xf32>
    %cst_39 = arith.constant dense<0xFF800000> : vector<8xf32>
    %98 = vector.multi_reduction <maximumf>, %97, %cst_39 [1] : vector<8x8xf32> to vector<8xf32>
    %99 = vector.shape_cast %98 : vector<8xf32> to vector<8x1xf32>
    %100 = vector.broadcast %99 : vector<8x1xf32> to vector<8x8xf32>
    %101 = arith.subf %97, %100 : vector<8x8xf32>
    %102 = math.exp %101 : vector<8x8xf32>
    %cst_40 = arith.constant dense<0.000000e+00> : vector<8xf32>
    %103 = vector.multi_reduction <add>, %102, %cst_40 [1] : vector<8x8xf32> to vector<8xf32>
    %104 = vector.shape_cast %103 : vector<8xf32> to vector<8x1xf32>
    %105 = tpu.reciprocal %104 {approx = true} : vector<8x1xf32> -> vector<8x1xf32>
    %106 = vector.broadcast %105 : vector<8x1xf32> to vector<8x8xf32>
    %107 = arith.mulf %102, %106 : vector<8x8xf32>
    %cst_41 = arith.constant dense<0.000000e+00> : vector<8x32xf32>
    %108 = tpu.matmul %107, %94, %cst_41 {dimension_numbers = #tpu.dot_dimension_numbers<[1], [0], [0], [1], [0, 0, 1, 1], [], []>} : vector<8x8xf32>, vector<8x32xf32>, vector<8x32xf32> -> vector<8x32xf32>
    %109 = vector.extract_strided_slice %21 {offsets = [0, 160], sizes = [8, 32], strides = [1, 1]} : vector<8x256xf32> to vector<8x32xf32>
    %110 = vector.extract_strided_slice %22 {offsets = [0, 160], sizes = [8, 32], strides = [1, 1]} : vector<8x256xf32> to vector<8x32xf32>
    %111 = vector.extract_strided_slice %23 {offsets = [0, 160], sizes = [8, 32], strides = [1, 1]} : vector<8x256xf32> to vector<8x32xf32>
    %cst_42 = arith.constant dense<0.000000e+00> : vector<8x8xf32>
    %112 = tpu.matmul %109, %110, %cst_42 {dimension_numbers = #tpu.dot_dimension_numbers<[1], [1], [0], [0], [0, 0, 1, 0], [], []>} : vector<8x32xf32>, vector<8x32xf32>, vector<8x8xf32> -> vector<8x8xf32>
    %cst_43 = arith.constant 0.176776692 : f32
    %113 = vector.broadcast %cst_43 : f32 to vector<8x8xf32>
    %114 = arith.mulf %112, %113 : vector<8x8xf32>
    %cst_44 = arith.constant dense<0xFF800000> : vector<8xf32>
    %115 = vector.multi_reduction <maximumf>, %114, %cst_44 [1] : vector<8x8xf32> to vector<8xf32>
    %116 = vector.shape_cast %115 : vector<8xf32> to vector<8x1xf32>
    %117 = vector.broadcast %116 : vector<8x1xf32> to vector<8x8xf32>
    %118 = arith.subf %114, %117 : vector<8x8xf32>
    %119 = math.exp %118 : vector<8x8xf32>
    %cst_45 = arith.constant dense<0.000000e+00> : vector<8xf32>
    %120 = vector.multi_reduction <add>, %119, %cst_45 [1] : vector<8x8xf32> to vector<8xf32>
    %121 = vector.shape_cast %120 : vector<8xf32> to vector<8x1xf32>
    %122 = tpu.reciprocal %121 {approx = true} : vector<8x1xf32> -> vector<8x1xf32>
    %123 = vector.broadcast %122 : vector<8x1xf32> to vector<8x8xf32>
    %124 = arith.mulf %119, %123 : vector<8x8xf32>
    %cst_46 = arith.constant dense<0.000000e+00> : vector<8x32xf32>
    %125 = tpu.matmul %124, %111, %cst_46 {dimension_numbers = #tpu.dot_dimension_numbers<[1], [0], [0], [1], [0, 0, 1, 1], [], []>} : vector<8x8xf32>, vector<8x32xf32>, vector<8x32xf32> -> vector<8x32xf32>
    %126 = vector.extract_strided_slice %21 {offsets = [0, 192], sizes = [8, 32], strides = [1, 1]} : vector<8x256xf32> to vector<8x32xf32>
    %127 = vector.extract_strided_slice %22 {offsets = [0, 192], sizes = [8, 32], strides = [1, 1]} : vector<8x256xf32> to vector<8x32xf32>
    %128 = vector.extract_strided_slice %23 {offsets = [0, 192], sizes = [8, 32], strides = [1, 1]} : vector<8x256xf32> to vector<8x32xf32>
    %cst_47 = arith.constant dense<0.000000e+00> : vector<8x8xf32>
    %129 = tpu.matmul %126, %127, %cst_47 {dimension_numbers = #tpu.dot_dimension_numbers<[1], [1], [0], [0], [0, 0, 1, 0], [], []>} : vector<8x32xf32>, vector<8x32xf32>, vector<8x8xf32> -> vector<8x8xf32>
    %cst_48 = arith.constant 0.176776692 : f32
    %130 = vector.broadcast %cst_48 : f32 to vector<8x8xf32>
    %131 = arith.mulf %129, %130 : vector<8x8xf32>
    %cst_49 = arith.constant dense<0xFF800000> : vector<8xf32>
    %132 = vector.multi_reduction <maximumf>, %131, %cst_49 [1] : vector<8x8xf32> to vector<8xf32>
    %133 = vector.shape_cast %132 : vector<8xf32> to vector<8x1xf32>
    %134 = vector.broadcast %133 : vector<8x1xf32> to vector<8x8xf32>
    %135 = arith.subf %131, %134 : vector<8x8xf32>
    %136 = math.exp %135 : vector<8x8xf32>
    %cst_50 = arith.constant dense<0.000000e+00> : vector<8xf32>
    %137 = vector.multi_reduction <add>, %136, %cst_50 [1] : vector<8x8xf32> to vector<8xf32>
    %138 = vector.shape_cast %137 : vector<8xf32> to vector<8x1xf32>
    %139 = tpu.reciprocal %138 {approx = true} : vector<8x1xf32> -> vector<8x1xf32>
    %140 = vector.broadcast %139 : vector<8x1xf32> to vector<8x8xf32>
    %141 = arith.mulf %136, %140 : vector<8x8xf32>
    %cst_51 = arith.constant dense<0.000000e+00> : vector<8x32xf32>
    %142 = tpu.matmul %141, %128, %cst_51 {dimension_numbers = #tpu.dot_dimension_numbers<[1], [0], [0], [1], [0, 0, 1, 1], [], []>} : vector<8x8xf32>, vector<8x32xf32>, vector<8x32xf32> -> vector<8x32xf32>
    %143 = vector.extract_strided_slice %21 {offsets = [0, 224], sizes = [8, 32], strides = [1, 1]} : vector<8x256xf32> to vector<8x32xf32>
    %144 = vector.extract_strided_slice %22 {offsets = [0, 224], sizes = [8, 32], strides = [1, 1]} : vector<8x256xf32> to vector<8x32xf32>
    %145 = vector.extract_strided_slice %23 {offsets = [0, 224], sizes = [8, 32], strides = [1, 1]} : vector<8x256xf32> to vector<8x32xf32>
    %cst_52 = arith.constant dense<0.000000e+00> : vector<8x8xf32>
    %146 = tpu.matmul %143, %144, %cst_52 {dimension_numbers = #tpu.dot_dimension_numbers<[1], [1], [0], [0], [0, 0, 1, 0], [], []>} : vector<8x32xf32>, vector<8x32xf32>, vector<8x8xf32> -> vector<8x8xf32>
    %cst_53 = arith.constant 0.176776692 : f32
    %147 = vector.broadcast %cst_53 : f32 to vector<8x8xf32>
    %148 = arith.mulf %146, %147 : vector<8x8xf32>
    %cst_54 = arith.constant dense<0xFF800000> : vector<8xf32>
    %149 = vector.multi_reduction <maximumf>, %148, %cst_54 [1] : vector<8x8xf32> to vector<8xf32>
    %150 = vector.shape_cast %149 : vector<8xf32> to vector<8x1xf32>
    %151 = vector.broadcast %150 : vector<8x1xf32> to vector<8x8xf32>
    %152 = arith.subf %148, %151 : vector<8x8xf32>
    %153 = math.exp %152 : vector<8x8xf32>
    %cst_55 = arith.constant dense<0.000000e+00> : vector<8xf32>
    %154 = vector.multi_reduction <add>, %153, %cst_55 [1] : vector<8x8xf32> to vector<8xf32>
    %155 = vector.shape_cast %154 : vector<8xf32> to vector<8x1xf32>
    %156 = tpu.reciprocal %155 {approx = true} : vector<8x1xf32> -> vector<8x1xf32>
    %157 = vector.broadcast %156 : vector<8x1xf32> to vector<8x8xf32>
    %158 = arith.mulf %153, %157 : vector<8x8xf32>
    %cst_56 = arith.constant dense<0.000000e+00> : vector<8x32xf32>
    %159 = tpu.matmul %158, %145, %cst_56 {dimension_numbers = #tpu.dot_dimension_numbers<[1], [0], [0], [1], [0, 0, 1, 1], [], []>} : vector<8x8xf32>, vector<8x32xf32>, vector<8x32xf32> -> vector<8x32xf32>
    %160 = tpu.concatenate %40, %57, %74, %91, %108, %125, %142, %159 in 1 : vector<8x32xf32>, vector<8x32xf32>, vector<8x32xf32>, vector<8x32xf32>, vector<8x32xf32>, vector<8x32xf32>, vector<8x32xf32>, vector<8x32xf32> -> vector<8x256xf32>
    %161 = vector.extract_strided_slice %11 {offsets = [8, 0], sizes = [8, 256], strides = [1, 1]} : vector<16x256xf32> to vector<8x256xf32>
    %162 = vector.extract_strided_slice %20 {offsets = [8, 0], sizes = [8, 256], strides = [1, 1]} : vector<16x512xf32> to vector<8x256xf32>
    %163 = vector.extract_strided_slice %20 {offsets = [8, 256], sizes = [8, 256], strides = [1, 1]} : vector<16x512xf32> to vector<8x256xf32>
    %164 = vector.extract_strided_slice %161 {offsets = [0, 0], sizes = [8, 32], strides = [1, 1]} : vector<8x256xf32> to vector<8x32xf32>
    %165 = vector.extract_strided_slice %162 {offsets = [0, 0], sizes = [8, 32], strides = [1, 1]} : vector<8x256xf32> to vector<8x32xf32>
    %166 = vector.extract_strided_slice %163 {offsets = [0, 0], sizes = [8, 32], strides = [1, 1]} : vector<8x256xf32> to vector<8x32xf32>
    %cst_57 = arith.constant dense<0.000000e+00> : vector<8x8xf32>
    %167 = tpu.matmul %164, %165, %cst_57 {dimension_numbers = #tpu.dot_dimension_numbers<[1], [1], [0], [0], [0, 0, 1, 0], [], []>} : vector<8x32xf32>, vector<8x32xf32>, vector<8x8xf32> -> vector<8x8xf32>
    %cst_58 = arith.constant 0.176776692 : f32
    %168 = vector.broadcast %cst_58 : f32 to vector<8x8xf32>
    %169 = arith.mulf %167, %168 : vector<8x8xf32>
    %cst_59 = arith.constant dense<0xFF800000> : vector<8xf32>
    %170 = vector.multi_reduction <maximumf>, %169, %cst_59 [1] : vector<8x8xf32> to vector<8xf32>
    %171 = vector.shape_cast %170 : vector<8xf32> to vector<8x1xf32>
    %172 = vector.broadcast %171 : vector<8x1xf32> to vector<8x8xf32>
    %173 = arith.subf %169, %172 : vector<8x8xf32>
    %174 = math.exp %173 : vector<8x8xf32>
    %cst_60 = arith.constant dense<0.000000e+00> : vector<8xf32>
    %175 = vector.multi_reduction <add>, %174, %cst_60 [1] : vector<8x8xf32> to vector<8xf32>
    %176 = vector.shape_cast %175 : vector<8xf32> to vector<8x1xf32>
    %177 = tpu.reciprocal %176 {approx = true} : vector<8x1xf32> -> vector<8x1xf32>
    %178 = vector.broadcast %177 : vector<8x1xf32> to vector<8x8xf32>
    %179 = arith.mulf %174, %178 : vector<8x8xf32>
    %cst_61 = arith.constant dense<0.000000e+00> : vector<8x32xf32>
    %180 = tpu.matmul %179, %166, %cst_61 {dimension_numbers = #tpu.dot_dimension_numbers<[1], [0], [0], [1], [0, 0, 1, 1], [], []>} : vector<8x8xf32>, vector<8x32xf32>, vector<8x32xf32> -> vector<8x32xf32>
    %181 = vector.extract_strided_slice %161 {offsets = [0, 32], sizes = [8, 32], strides = [1, 1]} : vector<8x256xf32> to vector<8x32xf32>
    %182 = vector.extract_strided_slice %162 {offsets = [0, 32], sizes = [8, 32], strides = [1, 1]} : vector<8x256xf32> to vector<8x32xf32>
    %183 = vector.extract_strided_slice %163 {offsets = [0, 32], sizes = [8, 32], strides = [1, 1]} : vector<8x256xf32> to vector<8x32xf32>
    %cst_62 = arith.constant dense<0.000000e+00> : vector<8x8xf32>
    %184 = tpu.matmul %181, %182, %cst_62 {dimension_numbers = #tpu.dot_dimension_numbers<[1], [1], [0], [0], [0, 0, 1, 0], [], []>} : vector<8x32xf32>, vector<8x32xf32>, vector<8x8xf32> -> vector<8x8xf32>
    %cst_63 = arith.constant 0.176776692 : f32
    %185 = vector.broadcast %cst_63 : f32 to vector<8x8xf32>
    %186 = arith.mulf %184, %185 : vector<8x8xf32>
    %cst_64 = arith.constant dense<0xFF800000> : vector<8xf32>
    %187 = vector.multi_reduction <maximumf>, %186, %cst_64 [1] : vector<8x8xf32> to vector<8xf32>
    %188 = vector.shape_cast %187 : vector<8xf32> to vector<8x1xf32>
    %189 = vector.broadcast %188 : vector<8x1xf32> to vector<8x8xf32>
    %190 = arith.subf %186, %189 : vector<8x8xf32>
    %191 = math.exp %190 : vector<8x8xf32>
    %cst_65 = arith.constant dense<0.000000e+00> : vector<8xf32>
    %192 = vector.multi_reduction <add>, %191, %cst_65 [1] : vector<8x8xf32> to vector<8xf32>
    %193 = vector.shape_cast %192 : vector<8xf32> to vector<8x1xf32>
    %194 = tpu.reciprocal %193 {approx = true} : vector<8x1xf32> -> vector<8x1xf32>
    %195 = vector.broadcast %194 : vector<8x1xf32> to vector<8x8xf32>
    %196 = arith.mulf %191, %195 : vector<8x8xf32>
    %cst_66 = arith.constant dense<0.000000e+00> : vector<8x32xf32>
    %197 = tpu.matmul %196, %183, %cst_66 {dimension_numbers = #tpu.dot_dimension_numbers<[1], [0], [0], [1], [0, 0, 1, 1], [], []>} : vector<8x8xf32>, vector<8x32xf32>, vector<8x32xf32> -> vector<8x32xf32>
    %198 = vector.extract_strided_slice %161 {offsets = [0, 64], sizes = [8, 32], strides = [1, 1]} : vector<8x256xf32> to vector<8x32xf32>
    %199 = vector.extract_strided_slice %162 {offsets = [0, 64], sizes = [8, 32], strides = [1, 1]} : vector<8x256xf32> to vector<8x32xf32>
    %200 = vector.extract_strided_slice %163 {offsets = [0, 64], sizes = [8, 32], strides = [1, 1]} : vector<8x256xf32> to vector<8x32xf32>
    %cst_67 = arith.constant dense<0.000000e+00> : vector<8x8xf32>
    %201 = tpu.matmul %198, %199, %cst_67 {dimension_numbers = #tpu.dot_dimension_numbers<[1], [1], [0], [0], [0, 0, 1, 0], [], []>} : vector<8x32xf32>, vector<8x32xf32>, vector<8x8xf32> -> vector<8x8xf32>
    %cst_68 = arith.constant 0.176776692 : f32
    %202 = vector.broadcast %cst_68 : f32 to vector<8x8xf32>
    %203 = arith.mulf %201, %202 : vector<8x8xf32>
    %cst_69 = arith.constant dense<0xFF800000> : vector<8xf32>
    %204 = vector.multi_reduction <maximumf>, %203, %cst_69 [1] : vector<8x8xf32> to vector<8xf32>
    %205 = vector.shape_cast %204 : vector<8xf32> to vector<8x1xf32>
    %206 = vector.broadcast %205 : vector<8x1xf32> to vector<8x8xf32>
    %207 = arith.subf %203, %206 : vector<8x8xf32>
    %208 = math.exp %207 : vector<8x8xf32>
    %cst_70 = arith.constant dense<0.000000e+00> : vector<8xf32>
    %209 = vector.multi_reduction <add>, %208, %cst_70 [1] : vector<8x8xf32> to vector<8xf32>
    %210 = vector.shape_cast %209 : vector<8xf32> to vector<8x1xf32>
    %211 = tpu.reciprocal %210 {approx = true} : vector<8x1xf32> -> vector<8x1xf32>
    %212 = vector.broadcast %211 : vector<8x1xf32> to vector<8x8xf32>
    %213 = arith.mulf %208, %212 : vector<8x8xf32>
    %cst_71 = arith.constant dense<0.000000e+00> : vector<8x32xf32>
    %214 = tpu.matmul %213, %200, %cst_71 {dimension_numbers = #tpu.dot_dimension_numbers<[1], [0], [0], [1], [0, 0, 1, 1], [], []>} : vector<8x8xf32>, vector<8x32xf32>, vector<8x32xf32> -> vector<8x32xf32>
    %215 = vector.extract_strided_slice %161 {offsets = [0, 96], sizes = [8, 32], strides = [1, 1]} : vector<8x256xf32> to vector<8x32xf32>
    %216 = vector.extract_strided_slice %162 {offsets = [0, 96], sizes = [8, 32], strides = [1, 1]} : vector<8x256xf32> to vector<8x32xf32>
    %217 = vector.extract_strided_slice %163 {offsets = [0, 96], sizes = [8, 32], strides = [1, 1]} : vector<8x256xf32> to vector<8x32xf32>
    %cst_72 = arith.constant dense<0.000000e+00> : vector<8x8xf32>
    %218 = tpu.matmul %215, %216, %cst_72 {dimension_numbers = #tpu.dot_dimension_numbers<[1], [1], [0], [0], [0, 0, 1, 0], [], []>} : vector<8x32xf32>, vector<8x32xf32>, vector<8x8xf32> -> vector<8x8xf32>
    %cst_73 = arith.constant 0.176776692 : f32
    %219 = vector.broadcast %cst_73 : f32 to vector<8x8xf32>
    %220 = arith.mulf %218, %219 : vector<8x8xf32>
    %cst_74 = arith.constant dense<0xFF800000> : vector<8xf32>
    %221 = vector.multi_reduction <maximumf>, %220, %cst_74 [1] : vector<8x8xf32> to vector<8xf32>
    %222 = vector.shape_cast %221 : vector<8xf32> to vector<8x1xf32>
    %223 = vector.broadcast %222 : vector<8x1xf32> to vector<8x8xf32>
    %224 = arith.subf %220, %223 : vector<8x8xf32>
    %225 = math.exp %224 : vector<8x8xf32>
    %cst_75 = arith.constant dense<0.000000e+00> : vector<8xf32>
    %226 = vector.multi_reduction <add>, %225, %cst_75 [1] : vector<8x8xf32> to vector<8xf32>
    %227 = vector.shape_cast %226 : vector<8xf32> to vector<8x1xf32>
    %228 = tpu.reciprocal %227 {approx = true} : vector<8x1xf32> -> vector<8x1xf32>
    %229 = vector.broadcast %228 : vector<8x1xf32> to vector<8x8xf32>
    %230 = arith.mulf %225, %229 : vector<8x8xf32>
    %cst_76 = arith.constant dense<0.000000e+00> : vector<8x32xf32>
    %231 = tpu.matmul %230, %217, %cst_76 {dimension_numbers = #tpu.dot_dimension_numbers<[1], [0], [0], [1], [0, 0, 1, 1], [], []>} : vector<8x8xf32>, vector<8x32xf32>, vector<8x32xf32> -> vector<8x32xf32>
    %232 = vector.extract_strided_slice %161 {offsets = [0, 128], sizes = [8, 32], strides = [1, 1]} : vector<8x256xf32> to vector<8x32xf32>
    %233 = vector.extract_strided_slice %162 {offsets = [0, 128], sizes = [8, 32], strides = [1, 1]} : vector<8x256xf32> to vector<8x32xf32>
    %234 = vector.extract_strided_slice %163 {offsets = [0, 128], sizes = [8, 32], strides = [1, 1]} : vector<8x256xf32> to vector<8x32xf32>
    %cst_77 = arith.constant dense<0.000000e+00> : vector<8x8xf32>
    %235 = tpu.matmul %232, %233, %cst_77 {dimension_numbers = #tpu.dot_dimension_numbers<[1], [1], [0], [0], [0, 0, 1, 0], [], []>} : vector<8x32xf32>, vector<8x32xf32>, vector<8x8xf32> -> vector<8x8xf32>
    %cst_78 = arith.constant 0.176776692 : f32
    %236 = vector.broadcast %cst_78 : f32 to vector<8x8xf32>
    %237 = arith.mulf %235, %236 : vector<8x8xf32>
    %cst_79 = arith.constant dense<0xFF800000> : vector<8xf32>
    %238 = vector.multi_reduction <maximumf>, %237, %cst_79 [1] : vector<8x8xf32> to vector<8xf32>
    %239 = vector.shape_cast %238 : vector<8xf32> to vector<8x1xf32>
    %240 = vector.broadcast %239 : vector<8x1xf32> to vector<8x8xf32>
    %241 = arith.subf %237, %240 : vector<8x8xf32>
    %242 = math.exp %241 : vector<8x8xf32>
    %cst_80 = arith.constant dense<0.000000e+00> : vector<8xf32>
    %243 = vector.multi_reduction <add>, %242, %cst_80 [1] : vector<8x8xf32> to vector<8xf32>
    %244 = vector.shape_cast %243 : vector<8xf32> to vector<8x1xf32>
    %245 = tpu.reciprocal %244 {approx = true} : vector<8x1xf32> -> vector<8x1xf32>
    %246 = vector.broadcast %245 : vector<8x1xf32> to vector<8x8xf32>
    %247 = arith.mulf %242, %246 : vector<8x8xf32>
    %cst_81 = arith.constant dense<0.000000e+00> : vector<8x32xf32>
    %248 = tpu.matmul %247, %234, %cst_81 {dimension_numbers = #tpu.dot_dimension_numbers<[1], [0], [0], [1], [0, 0, 1, 1], [], []>} : vector<8x8xf32>, vector<8x32xf32>, vector<8x32xf32> -> vector<8x32xf32>
    %249 = vector.extract_strided_slice %161 {offsets = [0, 160], sizes = [8, 32], strides = [1, 1]} : vector<8x256xf32> to vector<8x32xf32>
    %250 = vector.extract_strided_slice %162 {offsets = [0, 160], sizes = [8, 32], strides = [1, 1]} : vector<8x256xf32> to vector<8x32xf32>
    %251 = vector.extract_strided_slice %163 {offsets = [0, 160], sizes = [8, 32], strides = [1, 1]} : vector<8x256xf32> to vector<8x32xf32>
    %cst_82 = arith.constant dense<0.000000e+00> : vector<8x8xf32>
    %252 = tpu.matmul %249, %250, %cst_82 {dimension_numbers = #tpu.dot_dimension_numbers<[1], [1], [0], [0], [0, 0, 1, 0], [], []>} : vector<8x32xf32>, vector<8x32xf32>, vector<8x8xf32> -> vector<8x8xf32>
    %cst_83 = arith.constant 0.176776692 : f32
    %253 = vector.broadcast %cst_83 : f32 to vector<8x8xf32>
    %254 = arith.mulf %252, %253 : vector<8x8xf32>
    %cst_84 = arith.constant dense<0xFF800000> : vector<8xf32>
    %255 = vector.multi_reduction <maximumf>, %254, %cst_84 [1] : vector<8x8xf32> to vector<8xf32>
    %256 = vector.shape_cast %255 : vector<8xf32> to vector<8x1xf32>
    %257 = vector.broadcast %256 : vector<8x1xf32> to vector<8x8xf32>
    %258 = arith.subf %254, %257 : vector<8x8xf32>
    %259 = math.exp %258 : vector<8x8xf32>
    %cst_85 = arith.constant dense<0.000000e+00> : vector<8xf32>
    %260 = vector.multi_reduction <add>, %259, %cst_85 [1] : vector<8x8xf32> to vector<8xf32>
    %261 = vector.shape_cast %260 : vector<8xf32> to vector<8x1xf32>
    %262 = tpu.reciprocal %261 {approx = true} : vector<8x1xf32> -> vector<8x1xf32>
    %263 = vector.broadcast %262 : vector<8x1xf32> to vector<8x8xf32>
    %264 = arith.mulf %259, %263 : vector<8x8xf32>
    %cst_86 = arith.constant dense<0.000000e+00> : vector<8x32xf32>
    %265 = tpu.matmul %264, %251, %cst_86 {dimension_numbers = #tpu.dot_dimension_numbers<[1], [0], [0], [1], [0, 0, 1, 1], [], []>} : vector<8x8xf32>, vector<8x32xf32>, vector<8x32xf32> -> vector<8x32xf32>
    %266 = vector.extract_strided_slice %161 {offsets = [0, 192], sizes = [8, 32], strides = [1, 1]} : vector<8x256xf32> to vector<8x32xf32>
    %267 = vector.extract_strided_slice %162 {offsets = [0, 192], sizes = [8, 32], strides = [1, 1]} : vector<8x256xf32> to vector<8x32xf32>
    %268 = vector.extract_strided_slice %163 {offsets = [0, 192], sizes = [8, 32], strides = [1, 1]} : vector<8x256xf32> to vector<8x32xf32>
    %cst_87 = arith.constant dense<0.000000e+00> : vector<8x8xf32>
    %269 = tpu.matmul %266, %267, %cst_87 {dimension_numbers = #tpu.dot_dimension_numbers<[1], [1], [0], [0], [0, 0, 1, 0], [], []>} : vector<8x32xf32>, vector<8x32xf32>, vector<8x8xf32> -> vector<8x8xf32>
    %cst_88 = arith.constant 0.176776692 : f32
    %270 = vector.broadcast %cst_88 : f32 to vector<8x8xf32>
    %271 = arith.mulf %269, %270 : vector<8x8xf32>
    %cst_89 = arith.constant dense<0xFF800000> : vector<8xf32>
    %272 = vector.multi_reduction <maximumf>, %271, %cst_89 [1] : vector<8x8xf32> to vector<8xf32>
    %273 = vector.shape_cast %272 : vector<8xf32> to vector<8x1xf32>
    %274 = vector.broadcast %273 : vector<8x1xf32> to vector<8x8xf32>
    %275 = arith.subf %271, %274 : vector<8x8xf32>
    %276 = math.exp %275 : vector<8x8xf32>
    %cst_90 = arith.constant dense<0.000000e+00> : vector<8xf32>
    %277 = vector.multi_reduction <add>, %276, %cst_90 [1] : vector<8x8xf32> to vector<8xf32>
    %278 = vector.shape_cast %277 : vector<8xf32> to vector<8x1xf32>
    %279 = tpu.reciprocal %278 {approx = true} : vector<8x1xf32> -> vector<8x1xf32>
    %280 = vector.broadcast %279 : vector<8x1xf32> to vector<8x8xf32>
    %281 = arith.mulf %276, %280 : vector<8x8xf32>
    %cst_91 = arith.constant dense<0.000000e+00> : vector<8x32xf32>
    %282 = tpu.matmul %281, %268, %cst_91 {dimension_numbers = #tpu.dot_dimension_numbers<[1], [0], [0], [1], [0, 0, 1, 1], [], []>} : vector<8x8xf32>, vector<8x32xf32>, vector<8x32xf32> -> vector<8x32xf32>
    %283 = vector.extract_strided_slice %161 {offsets = [0, 224], sizes = [8, 32], strides = [1, 1]} : vector<8x256xf32> to vector<8x32xf32>
    %284 = vector.extract_strided_slice %162 {offsets = [0, 224], sizes = [8, 32], strides = [1, 1]} : vector<8x256xf32> to vector<8x32xf32>
    %285 = vector.extract_strided_slice %163 {offsets = [0, 224], sizes = [8, 32], strides = [1, 1]} : vector<8x256xf32> to vector<8x32xf32>
    %cst_92 = arith.constant dense<0.000000e+00> : vector<8x8xf32>
    %286 = tpu.matmul %283, %284, %cst_92 {dimension_numbers = #tpu.dot_dimension_numbers<[1], [1], [0], [0], [0, 0, 1, 0], [], []>} : vector<8x32xf32>, vector<8x32xf32>, vector<8x8xf32> -> vector<8x8xf32>
    %cst_93 = arith.constant 0.176776692 : f32
    %287 = vector.broadcast %cst_93 : f32 to vector<8x8xf32>
    %288 = arith.mulf %286, %287 : vector<8x8xf32>
    %cst_94 = arith.constant dense<0xFF800000> : vector<8xf32>
    %289 = vector.multi_reduction <maximumf>, %288, %cst_94 [1] : vector<8x8xf32> to vector<8xf32>
    %290 = vector.shape_cast %289 : vector<8xf32> to vector<8x1xf32>
    %291 = vector.broadcast %290 : vector<8x1xf32> to vector<8x8xf32>
    %292 = arith.subf %288, %291 : vector<8x8xf32>
    %293 = math.exp %292 : vector<8x8xf32>
    %cst_95 = arith.constant dense<0.000000e+00> : vector<8xf32>
    %294 = vector.multi_reduction <add>, %293, %cst_95 [1] : vector<8x8xf32> to vector<8xf32>
    %295 = vector.shape_cast %294 : vector<8xf32> to vector<8x1xf32>
    %296 = tpu.reciprocal %295 {approx = true} : vector<8x1xf32> -> vector<8x1xf32>
    %297 = vector.broadcast %296 : vector<8x1xf32> to vector<8x8xf32>
    %298 = arith.mulf %293, %297 : vector<8x8xf32>
    %cst_96 = arith.constant dense<0.000000e+00> : vector<8x32xf32>
    %299 = tpu.matmul %298, %285, %cst_96 {dimension_numbers = #tpu.dot_dimension_numbers<[1], [0], [0], [1], [0, 0, 1, 1], [], []>} : vector<8x8xf32>, vector<8x32xf32>, vector<8x32xf32> -> vector<8x32xf32>
    %300 = tpu.concatenate %180, %197, %214, %231, %248, %265, %282, %299 in 1 : vector<8x32xf32>, vector<8x32xf32>, vector<8x32xf32>, vector<8x32xf32>, vector<8x32xf32>, vector<8x32xf32>, vector<8x32xf32>, vector<8x32xf32> -> vector<8x256xf32>
    %301 = tpu.concatenate %160, %300 in 0 : vector<8x256xf32>, vector<8x256xf32> -> vector<16x256xf32>
    %302 = arith.truncf %301 : vector<16x256xf32> to vector<16x256xbf16>
    %c0_97 = arith.constant 0 : index
    %c0_98 = arith.constant 0 : index
    %c0_99 = arith.constant 0 : index
    %303 = vector.load %arg7[%c0_97, %c0_98, %c0_99] : memref<1x256x256xbf16, #tpu.memory_space<vmem>>, vector<1x256x256xbf16>
    %304 = vector.shape_cast %303 : vector<1x256x256xbf16> to vector<256x256xbf16>
    %cst_100 = arith.constant dense<0.000000e+00> : vector<16x256xf32>
    %305 = tpu.matmul %302, %304, %cst_100 {dimension_numbers = #tpu.dot_dimension_numbers<[1], [0], [0], [1], [0, 0, 1, 1], [], []>} : vector<16x256xbf16>, vector<256x256xbf16>, vector<16x256xf32> -> vector<16x256xf32>
    %c0_101 = arith.constant 0 : index
    %c0_102 = arith.constant 0 : index
    %c0_103 = arith.constant 0 : index
    %306 = vector.load %arg8[%c0_101, %c0_102, %c0_103] : memref<1x1x256xf32, #tpu.memory_space<vmem>>, vector<1x1x256xf32>
    %307 = vector.shape_cast %306 : vector<1x1x256xf32> to vector<1x256xf32>
    %308 = vector.broadcast %307 : vector<1x256xf32> to vector<16x256xf32>
    %309 = arith.addf %305, %308 : vector<16x256xf32>
    %310 = arith.addf %3, %309 : vector<16x256xf32>
    %c0_104 = arith.constant 0 : index
    %c0_105 = arith.constant 0 : index
    %c0_106 = arith.constant 0 : index
    %311 = vector.load %arg9[%c0_104, %c0_105, %c0_106] : memref<1x1x256xf32, #tpu.memory_space<vmem>>, vector<1x1x256xf32>
    %312 = vector.shape_cast %311 : vector<1x1x256xf32> to vector<1x256xf32>
    %c0_107 = arith.constant 0 : index
    %c0_108 = arith.constant 0 : index
    %c0_109 = arith.constant 0 : index
    %313 = vector.load %arg10[%c0_107, %c0_108, %c0_109] : memref<1x1x256xf32, #tpu.memory_space<vmem>>, vector<1x1x256xf32>
    %314 = vector.shape_cast %313 : vector<1x1x256xf32> to vector<1x256xf32>
    %cst_110 = arith.constant dense<0.000000e+00> : vector<16xf32>
    %315 = vector.multi_reduction <add>, %310, %cst_110 [1] : vector<16x256xf32> to vector<16xf32>
    %316 = vector.shape_cast %315 : vector<16xf32> to vector<16x1xf32>
    %cst_111 = arith.constant 2.560000e+02 : f32
    %317 = vector.broadcast %cst_111 : f32 to vector<16x1xf32>
    %318 = arith.divf %316, %317 : vector<16x1xf32>
    %319 = vector.broadcast %318 : vector<16x1xf32> to vector<16x256xf32>
    %320 = arith.subf %310, %319 : vector<16x256xf32>
    %321 = arith.mulf %320, %320 : vector<16x256xf32>
    %cst_112 = arith.constant dense<0.000000e+00> : vector<16xf32>
    %322 = vector.multi_reduction <add>, %321, %cst_112 [1] : vector<16x256xf32> to vector<16xf32>
    %323 = vector.shape_cast %322 : vector<16xf32> to vector<16x1xf32>
    %cst_113 = arith.constant 2.560000e+02 : f32
    %324 = vector.broadcast %cst_113 : f32 to vector<16x1xf32>
    %325 = arith.divf %323, %324 : vector<16x1xf32>
    %cst_114 = arith.constant 9.99999974E-6 : f32
    %326 = vector.broadcast %cst_114 : f32 to vector<16x1xf32>
    %327 = arith.addf %325, %326 : vector<16x1xf32>
    %328 = math.rsqrt %327 : vector<16x1xf32>
    %329 = vector.broadcast %328 : vector<16x1xf32> to vector<16x256xf32>
    %330 = arith.mulf %320, %329 : vector<16x256xf32>
    %331 = vector.broadcast %312 : vector<1x256xf32> to vector<16x256xf32>
    %332 = arith.mulf %330, %331 : vector<16x256xf32>
    %333 = vector.broadcast %314 : vector<1x256xf32> to vector<16x256xf32>
    %334 = arith.addf %332, %333 : vector<16x256xf32>
    %335 = arith.truncf %334 : vector<16x256xf32> to vector<16x256xbf16>
    %c0_115 = arith.constant 0 : index
    %c0_116 = arith.constant 0 : index
    %c0_117 = arith.constant 0 : index
    %336 = vector.load %arg11[%c0_115, %c0_116, %c0_117] : memref<1x256x2048xbf16, #tpu.memory_space<vmem>>, vector<1x256x2048xbf16>
    %337 = vector.shape_cast %336 : vector<1x256x2048xbf16> to vector<256x2048xbf16>
    %cst_118 = arith.constant dense<0.000000e+00> : vector<16x2048xf32>
    %338 = tpu.matmul %335, %337, %cst_118 {dimension_numbers = #tpu.dot_dimension_numbers<[1], [0], [0], [1], [0, 0, 1, 1], [], []>} : vector<16x256xbf16>, vector<256x2048xbf16>, vector<16x2048xf32> -> vector<16x2048xf32>
    %c0_119 = arith.constant 0 : index
    %c0_120 = arith.constant 0 : index
    %c0_121 = arith.constant 0 : index
    %339 = vector.load %arg12[%c0_119, %c0_120, %c0_121] : memref<1x1x2048xf32, #tpu.memory_space<vmem>>, vector<1x1x2048xf32>
    %340 = vector.shape_cast %339 : vector<1x1x2048xf32> to vector<1x2048xf32>
    %341 = vector.broadcast %340 : vector<1x2048xf32> to vector<16x2048xf32>
    %342 = arith.addf %338, %341 : vector<16x2048xf32>
    %cst_122 = arith.constant 0.000000e+00 : f32
    %343 = vector.broadcast %cst_122 : f32 to vector<16x2048xf32>
    %344 = arith.maximumf %342, %343 : vector<16x2048xf32>
    %345 = arith.truncf %344 : vector<16x2048xf32> to vector<16x2048xbf16>
    %c0_123 = arith.constant 0 : index
    %c0_124 = arith.constant 0 : index
    %c0_125 = arith.constant 0 : index
    %346 = vector.load %arg13[%c0_123, %c0_124, %c0_125] : memref<1x2048x256xbf16, #tpu.memory_space<vmem>>, vector<1x2048x256xbf16>
    %347 = vector.shape_cast %346 : vector<1x2048x256xbf16> to vector<2048x256xbf16>
    %cst_126 = arith.constant dense<0.000000e+00> : vector<16x256xf32>
    %348 = tpu.matmul %345, %347, %cst_126 {dimension_numbers = #tpu.dot_dimension_numbers<[1], [0], [0], [1], [0, 0, 1, 1], [], []>} : vector<16x2048xbf16>, vector<2048x256xbf16>, vector<16x256xf32> -> vector<16x256xf32>
    %c0_127 = arith.constant 0 : index
    %c0_128 = arith.constant 0 : index
    %c0_129 = arith.constant 0 : index
    %349 = vector.load %arg14[%c0_127, %c0_128, %c0_129] : memref<1x1x256xf32, #tpu.memory_space<vmem>>, vector<1x1x256xf32>
    %350 = vector.shape_cast %349 : vector<1x1x256xf32> to vector<1x256xf32>
    %351 = vector.broadcast %350 : vector<1x256xf32> to vector<16x256xf32>
    %352 = arith.addf %348, %351 : vector<16x256xf32>
    %353 = arith.addf %334, %352 : vector<16x256xf32>
    %c0_130 = arith.constant 0 : index
    %c0_131 = arith.constant 0 : index
    %c0_132 = arith.constant 0 : index
    %354 = vector.load %arg15[%c0_130, %c0_131, %c0_132] : memref<1x1x256xf32, #tpu.memory_space<vmem>>, vector<1x1x256xf32>
    %355 = vector.shape_cast %354 : vector<1x1x256xf32> to vector<1x256xf32>
    %c0_133 = arith.constant 0 : index
    %c0_134 = arith.constant 0 : index
    %c0_135 = arith.constant 0 : index
    %356 = vector.load %arg16[%c0_133, %c0_134, %c0_135] : memref<1x1x256xf32, #tpu.memory_space<vmem>>, vector<1x1x256xf32>
    %357 = vector.shape_cast %356 : vector<1x1x256xf32> to vector<1x256xf32>
    %cst_136 = arith.constant dense<0.000000e+00> : vector<16xf32>
    %358 = vector.multi_reduction <add>, %353, %cst_136 [1] : vector<16x256xf32> to vector<16xf32>
    %359 = vector.shape_cast %358 : vector<16xf32> to vector<16x1xf32>
    %cst_137 = arith.constant 2.560000e+02 : f32
    %360 = vector.broadcast %cst_137 : f32 to vector<16x1xf32>
    %361 = arith.divf %359, %360 : vector<16x1xf32>
    %362 = vector.broadcast %361 : vector<16x1xf32> to vector<16x256xf32>
    %363 = arith.subf %353, %362 : vector<16x256xf32>
    %364 = arith.mulf %363, %363 : vector<16x256xf32>
    %cst_138 = arith.constant dense<0.000000e+00> : vector<16xf32>
    %365 = vector.multi_reduction <add>, %364, %cst_138 [1] : vector<16x256xf32> to vector<16xf32>
    %366 = vector.shape_cast %365 : vector<16xf32> to vector<16x1xf32>
    %cst_139 = arith.constant 2.560000e+02 : f32
    %367 = vector.broadcast %cst_139 : f32 to vector<16x1xf32>
    %368 = arith.divf %366, %367 : vector<16x1xf32>
    %cst_140 = arith.constant 9.99999974E-6 : f32
    %369 = vector.broadcast %cst_140 : f32 to vector<16x1xf32>
    %370 = arith.addf %368, %369 : vector<16x1xf32>
    %371 = math.rsqrt %370 : vector<16x1xf32>
    %372 = vector.broadcast %371 : vector<16x1xf32> to vector<16x256xf32>
    %373 = arith.mulf %363, %372 : vector<16x256xf32>
    %374 = vector.broadcast %355 : vector<1x256xf32> to vector<16x256xf32>
    %375 = arith.mulf %373, %374 : vector<16x256xf32>
    %376 = vector.broadcast %357 : vector<1x256xf32> to vector<16x256xf32>
    %377 = arith.addf %375, %376 : vector<16x256xf32>
    %c0_141 = arith.constant 0 : index
    %c0_142 = arith.constant 0 : index
    %378 = vector.load %arg18[%c0_141, %c0_142] : memref<16x256xf32, #tpu.memory_space<vmem>>, vector<16x256xf32>
    tpu.vector_store %arg18[%c0_141, %c0_142], %377 {strides = array<i32>} : memref<16x256xf32, #tpu.memory_space<vmem>>, vector<16x256xf32>,
    %c0_143 = arith.constant 0 : index
    %c0_144 = arith.constant 0 : index
    %379 = vector.load %arg17[%c0_143, %c0_144] : memref<16x256xf32, #tpu.memory_space<vmem>>, vector<16x256xf32>
    tpu.vector_store %arg17[%c0_143, %c0_144], %377 {strides = array<i32>} : memref<16x256xf32, #tpu.memory_space<vmem>>, vector<16x256xf32>,
    return
  }
  func.func @transform_0(%arg0: i32) -> (i32, i32) {
    %c0_i32 = arith.constant 0 : i32
    %c0_i32_0 = arith.constant 0 : i32
    %c0_i32_1 = arith.constant 0 : i32
    return %c0_i32, %c0_i32_0 : i32, i32
  }
  func.func @transform_1(%arg0: i32) -> (i32, i32) {
    %c0_i32 = arith.constant 0 : i32
    %c0_i32_0 = arith.constant 0 : i32
    %c0_i32_1 = arith.constant 0 : i32
    return %c0_i32, %c0_i32_0 : i32, i32
  }
  func.func @transform_2(%arg0: i32) -> (i32, i32, i32) {
    %c0_i32 = arith.constant 0 : i32
    %c0_i32_0 = arith.constant 0 : i32
    %c0_i32_1 = arith.constant 0 : i32
    return %arg0, %c0_i32, %c0_i32_0 : i32, i32, i32
  }
  func.func @transform_3(%arg0: i32) -> (i32, i32, i32) {
    %c0_i32 = arith.constant 0 : i32
    %c0_i32_0 = arith.constant 0 : i32
    %c0_i32_1 = arith.constant 0 : i32
    return %arg0, %c0_i32, %c0_i32_0 : i32, i32, i32
  }
  func.func @transform_4(%arg0: i32) -> (i32, i32, i32) {
    %c0_i32 = arith.constant 0 : i32
    %c0_i32_0 = arith.constant 0 : i32
    %c0_i32_1 = arith.constant 0 : i32
    return %arg0, %c0_i32, %c0_i32_0 : i32, i32, i32
  }
  func.func @transform_5(%arg0: i32) -> (i32, i32, i32) {
    %c0_i32 = arith.constant 0 : i32
    %c0_i32_0 = arith.constant 0 : i32
    %c0_i32_1 = arith.constant 0 : i32
    return %arg0, %c0_i32, %c0_i32_0 : i32, i32, i32
  }
  func.func @transform_6(%arg0: i32) -> (i32, i32, i32) {
    %c0_i32 = arith.constant 0 : i32
    %c0_i32_0 = arith.constant 0 : i32
    %c0_i32_1 = arith.constant 0 : i32
    return %arg0, %c0_i32, %c0_i32_0 : i32, i32, i32
  }
  func.func @transform_7(%arg0: i32) -> (i32, i32, i32) {
    %c0_i32 = arith.constant 0 : i32
    %c0_i32_0 = arith.constant 0 : i32
    %c0_i32_1 = arith.constant 0 : i32
    return %arg0, %c0_i32, %c0_i32_0 : i32, i32, i32
  }
  func.func @transform_8(%arg0: i32) -> (i32, i32, i32) {
    %c0_i32 = arith.constant 0 : i32
    %c0_i32_0 = arith.constant 0 : i32
    %c0_i32_1 = arith.constant 0 : i32
    return %arg0, %c0_i32, %c0_i32_0 : i32, i32, i32
  }
  func.func @transform_9(%arg0: i32) -> (i32, i32, i32) {
    %c0_i32 = arith.constant 0 : i32
    %c0_i32_0 = arith.constant 0 : i32
    %c0_i32_1 = arith.constant 0 : i32
    return %arg0, %c0_i32, %c0_i32_0 : i32, i32, i32
  }
  func.func @transform_10(%arg0: i32) -> (i32, i32, i32) {
    %c0_i32 = arith.constant 0 : i32
    %c0_i32_0 = arith.constant 0 : i32
    %c0_i32_1 = arith.constant 0 : i32
    return %arg0, %c0_i32, %c0_i32_0 : i32, i32, i32
  }
  func.func @transform_11(%arg0: i32) -> (i32, i32, i32) {
    %c0_i32 = arith.constant 0 : i32
    %c0_i32_0 = arith.constant 0 : i32
    %c0_i32_1 = arith.constant 0 : i32
    return %arg0, %c0_i32, %c0_i32_0 : i32, i32, i32
  }
  func.func @transform_12(%arg0: i32) -> (i32, i32, i32) {
    %c0_i32 = arith.constant 0 : i32
    %c0_i32_0 = arith.constant 0 : i32
    %c0_i32_1 = arith.constant 0 : i32
    return %arg0, %c0_i32, %c0_i32_0 : i32, i32, i32
  }
  func.func @transform_13(%arg0: i32) -> (i32, i32, i32) {
    %c0_i32 = arith.constant 0 : i32
    %c0_i32_0 = arith.constant 0 : i32
    %c0_i32_1 = arith.constant 0 : i32
    return %arg0, %c0_i32, %c0_i32_0 : i32, i32, i32
  }
  func.func @transform_14(%arg0: i32) -> (i32, i32, i32) {
    %c0_i32 = arith.constant 0 : i32
    %c0_i32_0 = arith.constant 0 : i32
    %c0_i32_1 = arith.constant 0 : i32
    return %arg0, %c0_i32, %c0_i32_0 : i32, i32, i32
  }
  func.func @transform_15(%arg0: i32) -> (i32, i32, i32) {
    %c0_i32 = arith.constant 0 : i32
    %c0_i32_0 = arith.constant 0 : i32
    %c0_i32_1 = arith.constant 0 : i32
    return %arg0, %c0_i32, %c0_i32_0 : i32, i32, i32
  }
  func.func @transform_16(%arg0: i32) -> (i32, i32) {
    %c0_i32 = arith.constant 0 : i32
    %c0_i32_0 = arith.constant 0 : i32
    %c0_i32_1 = arith.constant 0 : i32
    return %c0_i32, %c0_i32_0 : i32, i32
  }
}

</mosaic_0001>

<bundles_post_ra>
// kernel: gmsa_ini_forward.1
= control target key start
LH: loop header
LB: loop body
LE: loop exit
PB: predicated region body
PF: predicated region fallthrough
CT: control target
= control target key end

     0   :  { %s11905_s0 = inlined_call_operand.vmem [shape: f32[16,256], index: 0, kind: input, shape index: {}]   ;;  %s11906_s1 = inlined_call_operand.vmem [shape: f32[16,256], index: 1, kind: input, shape index: {}]   ;;  %s11907_s2 = inlined_call_operand.vmem [shape: bf16[2,256,256], index: 2, kind: input, shape index: {}]   ;;  %s11908_s3 = inlined_call_operand.vmem [shape: f32[2,1,256], index: 3, kind: input, shape index: {}]   ;;  %s11909_s4 = inlined_call_operand.vmem [shape: bf16[2,256,512], index: 4, kind: input, shape index: {}]   ;;  %s11910_s5 = inlined_call_operand.vmem [shape: f32[2,1,512], index: 5, kind: input, shape index: {}]   ;;  %s11911_s6 = inlined_call_operand.vmem [shape: bf16[2,256,256], index: 6, kind: input, shape index: {}]   ;;  %s11912_s7 = inlined_call_operand.vmem [shape: f32[2,1,256], index: 7, kind: input, shape index: {}]   ;;  %s11913_s8 = inlined_call_operand.vmem [shape: f32[2,1,256], index: 8, kind: input, shape index: {}]   ;;  %s11914_s9 = inlined_call_operand.vmem [shape: f32[2,1,256], index: 9, kind: input, shape index: {}]   ;;  %s11915_s10 = inlined_call_operand.vmem [shape: bf16[2,256,2048], index: 10, kind: input, shape index: {}]   ;;  %s11916_s11 = inlined_call_operand.vmem [shape: f32[2,1,2048], index: 11, kind: input, shape index: {}]   ;;  %s11917_s12 = inlined_call_operand.vmem [shape: bf16[2,2048,256], index: 12, kind: input, shape index: {}]   ;;  %s11918_s13 = inlined_call_operand.vmem [shape: f32[2,1,256], index: 13, kind: input, shape index: {}]   ;;  %s11919_s14 = inlined_call_operand.vmem [shape: f32[2,1,256], index: 14, kind: input, shape index: {}]   ;;  %s11920_s15 = inlined_call_operand.vmem [shape: f32[2,1,256], index: 15, kind: input, shape index: {}]   ;;  %s11921_s16 = inlined_call_operand.hbm [shape: f32[16,256], index: 16, kind: output, shape index: {}]  }
   0x1   :  { %11929 = sst [smem:[#allocation9_spill]] %s11905_s0 }
   0x2   :  { %11930 = sst [smem:[#allocation10_spill]] %s11906_s1 }
   0x3   :  { %11931 = sst [smem:[#allocation11_spill]] %s11907_s2 }
   0x4   :  { %11932 = sst [smem:[#allocation12_spill]] %s11908_s3 }
   0x5   :  { %11933 = sst [smem:[#allocation13_spill]] %s11909_s4 }
   0x6   :  { %11934 = sst [smem:[#allocation14_spill]] %s11910_s5 }
   0x7   :  { %11935 = sst [smem:[#allocation15_spill]] %s11911_s6 }
   0x8   :  { %11936 = sst [smem:[#allocation16_spill]] %s11921_s16 }
   0x9   :  { %21 = vsyncpa [#allocation4], 0  ;;  %s10525_s21 = smov 0  }
   0xa LB: > { %11937 = sst [smem:[#allocation6_spill]] %s10430_s21  ;;  %s10531_s22 = sadd.s32 4294967295, %s10430_s21   ;;  %s10430_s21 = sphi %s10525_s21, %s27_s21  }
   0xb   : > { %11938 = sst [smem:[#allocation7_spill]] %s10531_s22  ;;  %p8715_p0 = scmp.ge.s32.totalorder %s10430_s21, 1 }
   0xc   : > { %p579_p1 = scmp.lt.s32.totalorder %s10430_s21, 3 }
   0xe   : > { %p580_p2 = pnand %p8715_p0, %p579_p1 }
  0x10   : > { %583 = sbr.rel (%p580_p2) target bundleno = 6806 (0x1a96), region = 84 }
  0x17   : > { %p680_p3 = scmp.lt.s32.totalorder %s10531_s22, 1  ;;  %s11939_s2 = sld [smem:[#allocation11_spill]] }
  0x18   : > { %s11942_s4 = sld [smem:[#allocation13_spill]]  ;;  %s11943_s5 = sld [smem:[#allocation14_spill]] }
  0x19   : > { %s681_s23 = scalar_select %p680_p3, %s10531_s22, 1 }
  0x1a   : > { %s11944_s6 = sld [smem:[#allocation15_spill]] }
  0x1b   : > { %s9428_s24 = sshll.u32 %s681_s23, 8  ;;  %s10537_s25 = sshll.u32 %s681_s23, 1 }
  0x1c   : > { %s9429_s17 = sshll.u32 %s681_s23, 9  ;;  %s8721_s18 = sshll.u32 %s681_s23, 2 }
  0x1d   : > { %s10542_s28 = scalar_lea.vmem %s11939_s2, %s9428_s24  ;;  %s9431_s26 = sshll.u32 %s681_s23, 11 }
  0x1e   : > { %11940 = sst [smem:[#allocation8_spill]] %s10542_s28  ;;  %s10551_s21 = scalar_lea.vmem %s11942_s4, %s9429_s17 }
  0x1f   : > { %s10556_s16 = scalar_lea.vmem %s11943_s5, %s8721_s18  ;;  %s8729_s18 = sshll.u32 %s681_s23, 4 }
  0x20   : > { %s10561_s28 = scalar_lea.vmem %s11944_s6, %s9428_s24  ;;  %s10578_s1 = scalar_lea.vmem %s11915_s10, %s9431_s26 }
  0x21   : > { %s10583_s29 = scalar_lea.vmem %s11916_s11, %s8729_s18  ;;  %s10588_s3 = scalar_lea.vmem %s11917_s12, %s9431_s26 }
  0x22   : > { %s732_s20 = scalar_lea.vmem %s11918_s13, %s10537_s25  ;;  %s736_s5 = scalar_lea.vmem %s11919_s14, %s10537_s25 }
  0x23   : > { %s740_s6 = scalar_lea.vmem %s11920_s15, %s10537_s25  ;;  %s11945_s2 = sld [smem:[#allocation7_spill]] }
  0x29   : > { %p8735_p4 = scmp.ne.s32.totalorder %s11945_s2, 0 }
  0x2a   : > { %s11946_s0 = sld [smem:[#allocation9_spill]] (!%p8735_p4) }
  0x2b   : > { %744 = sbr.rel (%p8735_p4) target bundleno = 51 (0x33), region = 88 }
  0x30   : > { %v745_v0 = vld [vmem:[%s11946_s0] sm:$0xff] (!%p8735_p4)  ;;  %v746_v1 = vld [vmem:[%s11946_s0 + $0x8] sm:$0xff] (!%p8735_p4)  ;;  %v747_v2 = vld [vmem:[%s11946_s0 + $0x10] sm:$0xff] (!%p8735_p4) }
  0x31   : > { %749 = vst [vmem:[#allocation2] sm:$0xff] (!%p8735_p4), %v745_v0  ;;  %750 = vst [vmem:[#allocation2 + $0x8] sm:$0xff] (!%p8735_p4), %v746_v1  ;;  %v748_v3 = vld [vmem:[%s11946_s0 + $0x18] sm:$0xff] (!%p8735_p4) }
  0x32   : > { %751 = vst [vmem:[#allocation2 + $0x10] sm:$0xff] %v747_v2  ;;  %752 = vst [vmem:[#allocation2 + $0x18] sm:$0xff] %v748_v3 }
  0x33 PF: > { %s11947_s23 = sld [smem:[#allocation8_spill]]  ;;  %v9791_v41 = vld [vmem:[%s10551_s21 + $0x4] ss:$16 sps:$4 sm:$0xff]   ;;  %s11948_s18 = sld [smem:[#allocation10_spill]]  ;;  %v9789_v44 = vld [vmem:[%s10551_s21] ss:$16 sps:$4 sm:$0xff]  }
  0x34   : > { %v9794_v46 = vld [vmem:[%s10551_s21 + $0x24] ss:$16 sps:$4 sm:$0xff]   ;;  %v9792_v48 = vld [vmem:[%s10551_s21 + $0x20] ss:$16 sps:$4 sm:$0xff]   ;;  %vm10433_vm0 = vmmov 0   ;;  %vm1504_vm1 = vcmask 261120   ;;  %s11951_s30 = scalar_lea.vmem %s11912_s7, %s10537_s25  ;;  %s11952_s4 = scalar_lea.vmem %s11913_s8, %s10537_s25 }
  0x35   : > { %v9797_v49 = vld [vmem:[%s10551_s21 + $0x44] ss:$16 sps:$4 sm:$0xff]   ;;  %v9795_v50 = vld [vmem:[%s10551_s21 + $0x40] ss:$16 sps:$4 sm:$0xff]   ;;  %s10434_s2 = smov 96   ;;  %vm1582_vm2 = vcmask 64512  }
  0x36   : > { %v9800_v51 = vld [vmem:[%s10551_s21 + $0x64] ss:$16 sps:$4 sm:$0xff]   ;;  %v9798_v52 = vld [vmem:[%s10551_s21 + $0x60] ss:$16 sps:$4 sm:$0xff]   ;;  %s10436_s24 = smov 32   ;;  %vm2851_vm3 = vcmask 523264  }
  0x37   : > { %v9803_v53 = vld [vmem:[%s10551_s21 + $0x84] ss:$16 sps:$4 sm:$0xff]   ;;  %v9801_v54 = vld [vmem:[%s10551_s21 + $0x80] ss:$16 sps:$4 sm:$0xff]   ;;  %vm2853_vm4 = vcmask 785408  }
  0x38   : > { %v9806_v55 = vld [vmem:[%s10551_s21 + $0xa4] ss:$16 sps:$4 sm:$0xff]   ;;  %v9804_v56 = vld [vmem:[%s10551_s21 + $0xa0] ss:$16 sps:$4 sm:$0xff]  }
  0x39   : > { %v9741_v4 = vld [vmem:[%s11947_s23 + $0x4] ss:$8 sps:$4 sm:$0xff]   ;;  %v9743_v5 = vld [vmem:[%s11947_s23] ss:$8 sps:$4 sm:$0xff]   ;;  %v9744_v6 = vld [vmem:[%s11947_s23 + $0x14] ss:$8 sps:$4 sm:$0xff]  }
  0x3a   : > { %963 = vmatprep.subr.bf16.mxu0 %v9741_v4  ;;  %v9746_v7 = vld [vmem:[%s11947_s23 + $0x10] ss:$8 sps:$4 sm:$0xff]   ;;  %v9747_v8 = vld [vmem:[%s11947_s23 + $0x24] ss:$8 sps:$4 sm:$0xff]   ;;  %v9749_v9 = vld [vmem:[%s11947_s23 + $0x20] ss:$8 sps:$4 sm:$0xff]  }
  0x3b   : > { %964 = vmatpush1.bf16.msra.mxu0 %v9743_v5  ;;  %v9750_v10 = vld [vmem:[%s11947_s23 + $0x34] ss:$8 sps:$4 sm:$0xff]   ;;  %v9752_v11 = vld [vmem:[%s11947_s23 + $0x30] ss:$8 sps:$4 sm:$0xff]   ;;  %v9753_v12 = vld [vmem:[%s11947_s23 + $0x44] ss:$8 sps:$4 sm:$0xff]  }
  0x3c   : > { %965 = vmatprep.subr.bf16.mxu0 %v9744_v6  ;;  %v9755_v13 = vld [vmem:[%s11947_s23 + $0x40] ss:$8 sps:$4 sm:$0xff]   ;;  %v9756_v14 = vld [vmem:[%s11947_s23 + $0x54] ss:$8 sps:$4 sm:$0xff]   ;;  %v9758_v15 = vld [vmem:[%s11947_s23 + $0x50] ss:$8 sps:$4 sm:$0xff]  }
  0x3d   : > { %v9759_v16 = vld [vmem:[%s11947_s23 + $0x64] ss:$8 sps:$4 sm:$0xff]   ;;  %v756_v18 = vld [vmem:[#allocation2 + $0x18] sm:$0xff]  ;;  %v9761_v20 = vld [vmem:[%s11947_s23 + $0x60] ss:$8 sps:$4 sm:$0xff]  }
  0x3e   : > { %v754_v17 = vld [vmem:[#allocation2 + $0x8] sm:$0xff]  ;;  %v9762_v21 = vld [vmem:[%s11947_s23 + $0x74] ss:$8 sps:$4 sm:$0xff]   ;;  %v9764_v22 = vld [vmem:[%s11947_s23 + $0x70] ss:$8 sps:$4 sm:$0xff]  }
  0x3f   : > { %966 = vmatpush1.bf16.msra.mxu0 %v9746_v7  ;;  %v758_v19 = vpack.c.bf16 %v756_v18, %v754_v17  ;;  %v9765_v23 = vld [vmem:[%s11947_s23 + $0x84] ss:$8 sps:$4 sm:$0xff]   ;;  %v9767_v24 = vld [vmem:[%s11947_s23 + $0x80] ss:$8 sps:$4 sm:$0xff]   ;;  %v9768_v25 = vld [vmem:[%s11947_s23 + $0x94] ss:$8 sps:$4 sm:$0xff]  }
  0x40   : > { %967 = vmatprep.subr.bf16.mxu0 %v9747_v8  ;;  %v9770_v26 = vld [vmem:[%s11947_s23 + $0x90] ss:$8 sps:$4 sm:$0xff]   ;;  %v9771_v27 = vld [vmem:[%s11947_s23 + $0xa4] ss:$8 sps:$4 sm:$0xff]   ;;  %v9773_v28 = vld [vmem:[%s11947_s23 + $0xa0] ss:$8 sps:$4 sm:$0xff]  }
  0x41   : > { %995 = vmatprep.mubr.bf16.mxu0 %v758_v19  ;;  %v9774_v29 = vld [vmem:[%s11947_s23 + $0xb4] ss:$8 sps:$4 sm:$0xff]   ;;  %v9776_v30 = vld [vmem:[%s11947_s23 + $0xb0] ss:$8 sps:$4 sm:$0xff]   ;;  %v9777_v31 = vld [vmem:[%s11947_s23 + $0xc4] ss:$8 sps:$4 sm:$0xff]  }
  0x42   : > { %v9779_v32 = vld [vmem:[%s11947_s23 + $0xc0] ss:$8 sps:$4 sm:$0xff]   ;;  %v9780_v33 = vld [vmem:[%s11947_s23 + $0xd4] ss:$8 sps:$4 sm:$0xff]   ;;  %v9782_v34 = vld [vmem:[%s11947_s23 + $0xd0] ss:$8 sps:$4 sm:$0xff]  }
  0x43   : > { %968 = vmatpush1.bf16.msra.mxu0 %v9749_v9  ;;  %v9783_v35 = vld [vmem:[%s11947_s23 + $0xe4] ss:$8 sps:$4 sm:$0xff]   ;;  %v9785_v36 = vld [vmem:[%s11947_s23 + $0xe0] ss:$8 sps:$4 sm:$0xff]   ;;  %v9786_v37 = vld [vmem:[%s11947_s23 + $0xf4] ss:$8 sps:$4 sm:$0xff]  }
  0x44   : > { %969 = vmatprep.subr.bf16.mxu0 %v9750_v10  ;;  %v9788_v38 = vld [vmem:[%s11947_s23 + $0xf0] ss:$8 sps:$4 sm:$0xff]   ;;  %v753_v39 = vld [vmem:[#allocation2] sm:$0xff]  ;;  %v1007_v42 = vld [vmem:[%s11948_s18 + $0x8] sm:$0xff]  ;;  %s11949_s23 = sld [smem:[#allocation12_spill]] }
  0x45   : > { %v755_v40 = vld [vmem:[#allocation2 + $0x10] sm:$0xff]  ;;  %v1009_v43 = vld [vmem:[%s11948_s18 + $0x18] sm:$0xff] }
  0x46   : > { %v757_v45 = vpack.c.bf16 %v755_v40, %v753_v39  ;;  %v10656_v47 = vpack.c.bf16 %v1009_v43, %v1007_v42  ;;  %v9809_v57 = vld [vmem:[%s10551_s21 + $0xc4] ss:$16 sps:$4 sm:$0xff]   ;;  %v9807_v58 = vld [vmem:[%s10551_s21 + $0xc0] ss:$16 sps:$4 sm:$0xff]   ;;  %v9842_v18 = vld [vmem:[%s10551_s21 + $0x2c] ss:$16 sps:$4 sm:$0xff]  }
  0x47   : > { %970 = vmatpush1.bf16.msra.mxu0 %v9752_v11  ;;  %v9812_v59 = vld [vmem:[%s10551_s21 + $0xe4] ss:$16 sps:$4 sm:$0xff]   ;;  %v9810_v60 = vld [vmem:[%s10551_s21 + $0xe0] ss:$16 sps:$4 sm:$0xff]   ;;  %v9840_v19 = vld [vmem:[%s10551_s21 + $0x28] ss:$16 sps:$4 sm:$0xff]  }
  0x48   : > { %971 = vmatprep.subr.bf16.mxu0 %v9753_v12  ;;  %v9815_v61 = vld [vmem:[%s10551_s21 + $0x104] ss:$16 sps:$4 sm:$0xff]   ;;  %v9813_v62 = vld [vmem:[%s10551_s21 + $0x100] ss:$16 sps:$4 sm:$0xff]   ;;  %v9870_v39 = vld [vmem:[%s10551_s21 + $0x168] ss:$16 sps:$4 sm:$0xff]  }
  0x49   : > { %v9818_v63 = vld [vmem:[%s10551_s21 + $0x124] ss:$16 sps:$4 sm:$0xff]   ;;  %v9816_v0 = vld [vmem:[%s10551_s21 + $0x120] ss:$16 sps:$4 sm:$0xff]   ;;  %v9875_v40 = vld [vmem:[%s10551_s21 + $0x18c] ss:$16 sps:$4 sm:$0xff]  }
  0x4a   : > { %v9821_v1 = vld [vmem:[%s10551_s21 + $0x144] ss:$16 sps:$4 sm:$0xff]   ;;  %v9819_v2 = vld [vmem:[%s10551_s21 + $0x140] ss:$16 sps:$4 sm:$0xff]   ;;  %v9878_v42 = vld [vmem:[%s10551_s21 + $0x1ac] ss:$16 sps:$4 sm:$0xff]   ;;  %s11950_s27 = scalar_lea.vmem %s11949_s23, %s10537_s25  ;;  %s11953_s23 = scalar_lea.vmem %s11914_s9, %s10537_s25 }
  0x4b   : > { %972 = vmatpush1.bf16.msra.mxu0 %v9755_v13  ;;  %v9824_v3 = vld [vmem:[%s10551_s21 + $0x164] ss:$16 sps:$4 sm:$0xff]   ;;  %v9822_v4 = vld [vmem:[%s10551_s21 + $0x160] ss:$16 sps:$4 sm:$0xff]   ;;  %v9876_v43 = vld [vmem:[%s10551_s21 + $0x1a8] ss:$16 sps:$4 sm:$0xff]  }
  0x4c   : > { %973 = vmatprep.subr.bf16.mxu0 %v9756_v14  ;;  %v9827_v5 = vld [vmem:[%s10551_s21 + $0x184] ss:$16 sps:$4 sm:$0xff]   ;;  %v9825_v6 = vld [vmem:[%s10551_s21 + $0x180] ss:$16 sps:$4 sm:$0xff]  }
  0x4d   : > { %v9830_v7 = vld [vmem:[%s10551_s21 + $0x1a4] ss:$16 sps:$4 sm:$0xff]   ;;  %v9828_v8 = vld [vmem:[%s10551_s21 + $0x1a0] ss:$16 sps:$4 sm:$0xff]  }
  0x4e   : > { %v9833_v9 = vld [vmem:[%s10551_s21 + $0x1c4] ss:$16 sps:$4 sm:$0xff]   ;;  %v9831_v10 = vld [vmem:[%s10551_s21 + $0x1c0] ss:$16 sps:$4 sm:$0xff]  }
  0x4f   : > { %974 = vmatpush1.bf16.msra.mxu0 %v9758_v15  ;;  %v9836_v11 = vld [vmem:[%s10551_s21 + $0x1e4] ss:$16 sps:$4 sm:$0xff]   ;;  %v9834_v12 = vld [vmem:[%s10551_s21 + $0x1e0] ss:$16 sps:$4 sm:$0xff]   ;;  %v9839_v15 = vld [vmem:[%s10551_s21 + $0xc] ss:$16 sps:$4 sm:$0xff]  }
  0x50   : > { %975 = vmatprep.subr.bf16.mxu0 %v9759_v16  ;;  %v1006_v13 = vld [vmem:[%s11948_s18] sm:$0xff]  ;;  %v1008_v14 = vld [vmem:[%s11948_s18 + $0x10] sm:$0xff]  ;;  %v9837_v16 = vld [vmem:[%s10551_s21 + $0x8] ss:$16 sps:$4 sm:$0xff]  }
  0x51   : > { %v10696_v17 = vpack.c.bf16 %v1008_v14, %v1006_v13 }
  0x53   : > { %976 = vmatpush1.bf16.msra.mxu0 %v9761_v20  ;;  %v9845_v20 = vld [vmem:[%s10551_s21 + $0x4c] ss:$16 sps:$4 sm:$0xff]  }
  0x54   : > { %977 = vmatprep.subr.bf16.mxu0 %v9762_v21  ;;  %v9843_v21 = vld [vmem:[%s10551_s21 + $0x48] ss:$16 sps:$4 sm:$0xff]  }
  0x57   : > { %978 = vmatpush1.bf16.msra.mxu0 %v9764_v22  ;;  %v9846_v22 = vld [vmem:[%s10551_s21 + $0x68] ss:$16 sps:$4 sm:$0xff]  }
  0x58   : > { %979 = vmatprep.subr.bf16.mxu0 %v9765_v23  ;;  %v9848_v23 = vld [vmem:[%s10551_s21 + $0x6c] ss:$16 sps:$4 sm:$0xff]  }
  0x5b   : > { %980 = vmatpush1.bf16.msra.mxu0 %v9767_v24  ;;  %v9851_v24 = vld [vmem:[%s10551_s21 + $0x8c] ss:$16 sps:$4 sm:$0xff]  }
  0x5c   : > { %981 = vmatprep.subr.bf16.mxu0 %v9768_v25  ;;  %v9849_v25 = vld [vmem:[%s10551_s21 + $0x88] ss:$16 sps:$4 sm:$0xff]  }
  0x5f   : > { %982 = vmatpush1.bf16.msra.mxu0 %v9770_v26  ;;  %v9854_v26 = vld [vmem:[%s10551_s21 + $0xac] ss:$16 sps:$4 sm:$0xff]  }
  0x60   : > { %983 = vmatprep.subr.bf16.mxu0 %v9771_v27  ;;  %v9852_v27 = vld [vmem:[%s10551_s21 + $0xa8] ss:$16 sps:$4 sm:$0xff]  }
  0x63   : > { %984 = vmatpush1.bf16.msra.mxu0 %v9773_v28  ;;  %v9857_v28 = vld [vmem:[%s10551_s21 + $0xcc] ss:$16 sps:$4 sm:$0xff]  }
  0x64   : > { %985 = vmatprep.subr.bf16.mxu0 %v9774_v29  ;;  %v9855_v29 = vld [vmem:[%s10551_s21 + $0xc8] ss:$16 sps:$4 sm:$0xff]  }
  0x67   : > { %986 = vmatpush1.bf16.msra.mxu0 %v9776_v30  ;;  %v9860_v30 = vld [vmem:[%s10551_s21 + $0xec] ss:$16 sps:$4 sm:$0xff]  }
  0x68   : > { %987 = vmatprep.subr.bf16.mxu0 %v9777_v31  ;;  %v9858_v31 = vld [vmem:[%s10551_s21 + $0xe8] ss:$16 sps:$4 sm:$0xff]  }
  0x6b   : > { %988 = vmatpush1.bf16.msra.mxu0 %v9779_v32  ;;  %v9863_v32 = vld [vmem:[%s10551_s21 + $0x10c] ss:$16 sps:$4 sm:$0xff]  }
  0x6c   : > { %989 = vmatprep.subr.bf16.mxu0 %v9780_v33  ;;  %v9861_v33 = vld [vmem:[%s10551_s21 + $0x108] ss:$16 sps:$4 sm:$0xff]  }
  0x6f   : > { %990 = vmatpush1.bf16.msra.mxu0 %v9782_v34  ;;  %v9866_v34 = vld [vmem:[%s10551_s21 + $0x12c] ss:$16 sps:$4 sm:$0xff]  }
  0x70   : > { %991 = vmatprep.subr.bf16.mxu0 %v9783_v35  ;;  %v9864_v35 = vld [vmem:[%s10551_s21 + $0x128] ss:$16 sps:$4 sm:$0xff]  }
  0x73   : > { %992 = vmatpush1.bf16.msra.mxu0 %v9785_v36  ;;  %v9869_v36 = vld [vmem:[%s10551_s21 + $0x14c] ss:$16 sps:$4 sm:$0xff]  }
  0x74   : > { %993 = vmatprep.subr.bf16.mxu0 %v9786_v37  ;;  %v9867_v37 = vld [vmem:[%s10551_s21 + $0x148] ss:$16 sps:$4 sm:$0xff]  }
  0x77   : > { %994 = vmatpush1.bf16.msra.mxu0 %v9788_v38  ;;  %v9872_v38 = vld [vmem:[%s10551_s21 + $0x16c] ss:$16 sps:$4 sm:$0xff]  }
  0x78   : > { %1418 = vmatprep.subr.bf16.mxu0 %v9791_v41  ;;  %v9873_v41 = vld [vmem:[%s10551_s21 + $0x188] ss:$16 sps:$4 sm:$0xff]  }
  0x7a   : > { %996 = vmatmul.mubr.bf16.vlgmr.msra.gmra.mrb[0].mxu0 %v757_v45  ;;  %v9879_v45 = vld [vmem:[%s10551_s21 + $0x1c8] ss:$16 sps:$4 sm:$0xff]  }
  0x7b   : > { %1419 = vmatpush1.bf16.msra.mxu0 %v9789_v44  ;;  %1450 = vmatprep.mubr.bf16.mxu0 %v10656_v47  ;;  %v9881_v44 = vld [vmem:[%s10551_s21 + $0x1cc] ss:$16 sps:$4 sm:$0xff]  }
  0x7c   : > { %1420 = vmatprep.subr.bf16.mxu0 %v9794_v46  ;;  %v9884_v46 = vld [vmem:[%s10551_s21 + $0x1ec] ss:$16 sps:$4 sm:$0xff]  }
  0x7f   : > { %1421 = vmatpush1.bf16.msra.mxu0 %v9792_v48  ;;  %v10432_v48 = vmov 0.0  }
  0x80   : > { %1422 = vmatprep.subr.bf16.mxu0 %v9797_v49  ;;  %9532 = vmatprep.subr.mxu1 %v10432_v48  ;;  %v793_v49 = vlaneseq }
  0x81   : > { %9534 = vmatprep.mubr.msk.f32.mxu1 %vm10433_vm0, %v10432_v48 }
  0x83   : > { %1423 = vmatpush1.bf16.msra.mxu0 %v9795_v50  ;;  %v10737_v50 = vshrl.u32 %v793_v49, 7 }
  0x84   : > { %1424 = vmatprep.subr.bf16.mxu0 %v9800_v51 }
  0x85   : > { %v10740_v51 = vsub.s32 0, %v10737_v50 }
  0x87   : > { %1425 = vmatpush1.bf16.msra.mxu0 %v9798_v52  ;;  %v791_v52 = vld [vmem:[%s11950_s27] sm:$0x3] }
  0x88   : > { %1426 = vmatprep.subr.bf16.mxu0 %v9803_v53  ;;  %v10748_v53 = vsub.s32 1, %v10737_v50 }
  0x8b   : > { %1427 = vmatpush1.bf16.msra.mxu0 %v9801_v54  ;;  %v796_v54 = vrot.slane %v791_v52, %v10740_v51 }
  0x8c   : > { %1428 = vmatprep.subr.bf16.mxu0 %v9806_v55 }
  0x8f   : > { %1429 = vmatpush1.bf16.msra.mxu0 %v9804_v56 }
  0x90   : > { %1430 = vmatprep.subr.bf16.mxu0 %v9809_v57  ;;  %v10754_v57 = vrot.slane %v791_v52, %v10748_v53 }
  0x93   : > { %1431 = vmatpush1.bf16.msra.mxu0 %v9807_v58 }
  0x94   : > { %1432 = vmatprep.subr.bf16.mxu0 %v9812_v59 }
  0x97   : > { %1433 = vmatpush1.bf16.msra.mxu0 %v9810_v60 }
  0x98   : > { %1434 = vmatprep.subr.bf16.mxu0 %v9815_v61 }
  0x9b   : > { %1435 = vmatpush1.bf16.msra.mxu0 %v9813_v62  ;;  %v1076_v62 = vld [vmem:[%s10556_s16] sm:$0xf]  ;;  %s10435_s16 = smov 64  }
  0x9c   : > { %1436 = vmatprep.subr.bf16.mxu0 %v9818_v63  ;;  %v1081_v63 = vrot.slane %v1076_v62, %v10740_v51 }
  0x9f   : > { %1437 = vmatpush1.bf16.msra.mxu0 %v9816_v0 }
  0xa0   : > { %1438 = vmatprep.subr.bf16.mxu0 %v9821_v1 }
  0xa3   : > { %1439 = vmatpush1.bf16.msra.mxu0 %v9819_v2 }
  0xa4   : > { %1440 = vmatprep.subr.bf16.mxu0 %v9824_v3  ;;  %v10768_v3 = vrot.slane %v1076_v62, %v10748_v53 }
  0xa7   : > { %1441 = vmatpush1.bf16.msra.mxu0 %v9822_v4 }
  0xa8   : > { %1442 = vmatprep.subr.bf16.mxu0 %v9827_v5 }
  0xab   : > { %1443 = vmatpush1.bf16.msra.mxu0 %v9825_v6 }
  0xac   : > { %1444 = vmatprep.subr.bf16.mxu0 %v9830_v7 }
  0xaf   : > { %1445 = vmatpush1.bf16.msra.mxu0 %v9828_v8 }
  0xb0   : > { %1446 = vmatprep.subr.bf16.mxu0 %v9833_v9  ;;  %v10789_v9 = vsub.s32 2, %v10737_v50 }
  0xb3   : > { %1447 = vmatpush1.bf16.msra.mxu0 %v9831_v10  ;;  %v10792_v10 = vsub.s32 3, %v10737_v50 }
  0xb4   : > { %1448 = vmatprep.subr.bf16.mxu0 %v9836_v11  ;;  %v1089_v11 = vrot.slane %v1076_v62, %v10789_v9 }
  0xb5   : > { %v10796_v13 = vrot.slane %v1076_v62, %v10792_v10 }
  0xb7   : > { %1449 = vmatpush1.bf16.msra.mxu0 %v9834_v12 }
  0xb8   : > { %1461 = vmatprep.subr.bf16.mxu0 %v9839_v15 }
  0xba   : > { %1451 = vmatmul.mubr.bf16.vlgmr.msra.gmra.mrb[4].mxu0 %v10696_v17 }
  0xbb   : > { %1462 = vmatpush1.bf16.msra.mxu0 %v9837_v16  ;;  %1493 = vmatprep.mubr.bf16.mxu0 %v10656_v47  ;;  %v9882_v47 = vld [vmem:[%s10551_s21 + $0x1e8] ss:$16 sps:$4 sm:$0xff]  }
  0xbc   : > { %1463 = vmatprep.subr.bf16.mxu0 %v9842_v18 }
  0xbf   : > { %1464 = vmatpush1.bf16.msra.mxu0 %v9840_v19 }
  0xc0   : > { %1465 = vmatprep.subr.bf16.mxu0 %v9845_v20 }
  0xc3   : > { %1466 = vmatpush1.bf16.msra.mxu0 %v9843_v21 }
  0xc4   : > { %1467 = vmatprep.subr.bf16.mxu0 %v9848_v23 }
  0xc7   : > { %1468 = vmatpush1.bf16.msra.mxu0 %v9846_v22 }
  0xc8   : > { %1469 = vmatprep.subr.bf16.mxu0 %v9851_v24 }
  0xcb   : > { %1470 = vmatpush1.bf16.msra.mxu0 %v9849_v25 }
  0xcc   : > { %1471 = vmatprep.subr.bf16.mxu0 %v9854_v26 }
  0xcf   : > { %1472 = vmatpush1.bf16.msra.mxu0 %v9852_v27 }
  0xd0   : > { %1473 = vmatprep.subr.bf16.mxu0 %v9857_v28 }
  0xd3   : > { %1474 = vmatpush1.bf16.msra.mxu0 %v9855_v29 }
  0xd4   : > { %1475 = vmatprep.subr.bf16.mxu0 %v9860_v30 }
  0xd7   : > { %1476 = vmatpush1.bf16.msra.mxu0 %v9858_v31 }
  0xd8   : > { %1477 = vmatprep.subr.bf16.mxu0 %v9863_v32 }
  0xdb   : > { %1478 = vmatpush1.bf16.msra.mxu0 %v9861_v33 }
  0xdc   : > { %1479 = vmatprep.subr.bf16.mxu0 %v9866_v34 }
  0xdf   : > { %1480 = vmatpush1.bf16.msra.mxu0 %v9864_v35 }
  0xe0   : > { %1481 = vmatprep.subr.bf16.mxu0 %v9869_v36 }
  0xe3   : > { %1482 = vmatpush1.bf16.msra.mxu0 %v9867_v37 }
  0xe4   : > { %1483 = vmatprep.subr.bf16.mxu0 %v9872_v38 }
  0xe7   : > { %1484 = vmatpush1.bf16.msra.mxu0 %v9870_v39 }
  0xe8   : > { %1485 = vmatprep.subr.bf16.mxu0 %v9875_v40 }
  0xeb   : > { %1486 = vmatpush1.bf16.msra.mxu0 %v9873_v41 }
  0xec   : > { %1487 = vmatprep.subr.bf16.mxu0 %v9878_v42 }
  0xef   : > { %1488 = vmatpush1.bf16.msra.mxu0 %v9876_v43 }
  0xf0   : > { %1489 = vmatprep.subr.bf16.mxu0 %v9881_v44 }
  0xf3   : > { %1490 = vmatpush1.bf16.msra.mxu0 %v9879_v45 }
  0xf4   : > { %1491 = vmatprep.subr.bf16.mxu0 %v9884_v46 }
  0xf7   : > { %1492 = vmatpush1.bf16.msra.mxu0 %v9882_v47 }
  0xf8   : > { %9497 = vmatprep.subr.mxu0 %v10432_v48 }
  0xfa   : > { %1494 = vmatmul.mubr.bf16.vlgmr.msra.gmra.mrb[8].mxu0 %v10696_v17 }
  0xfb   : > { %9499 = vmatprep.mubr.msk.f32.mxu0 %vm10433_vm0, %v10432_v48 }
 0x14d   : > { %v997_v55 = vpop.f32.mrb[0].mxu0 }
 0x14e   : > { %v10751_v56 = vpop.f32.mrb[1].mxu0  ;;  %v10776_v7 = vadd.f32 %v997_v55, %v796_v54 }
 0x14f   : > { %v1001_v58 = vpop.f32.mrb[2].mxu0 }
 0x150   : > { %v10756_v59 = vadd.f32 %v1001_v58, %v796_v54  ;;  %v1003_v60 = vpop.f32.mrb[3].mxu0 }
 0x151   : > { %v10759_v61 = vadd.f32 %v1003_v60, %v10754_v57 }
 0x18d   : > { %v1452_v0 = vpop.f32.mrb[4].mxu0 }
 0x18e   : > { %v10763_v1 = vadd.f32 %v1452_v0, %v1081_v63  ;;  %v10765_v2 = vpop.f32.mrb[5].mxu0 }
 0x18f   : > { %v1456_v4 = vpop.f32.mrb[6].mxu0 }
 0x190   : > { %v10770_v5 = vadd.f32 %v1456_v4, %v1081_v63  ;;  %v1458_v6 = vpop.f32.mrb[7].mxu0  ;;  %1669 = vrot.lane.b32.xlu1 %v10763_v1, %s10434_s2  ;;  %9498 = vmatpush3.xpose.msk.msra.mxu0 %vm1504_vm1, %v10763_v1 }
 0x191   : > { %v10779_v8 = vadd.f32 %v1458_v6, %v10768_v3  ;;  %9502 = vmatprep.subr.mxu0 %v10432_v48 }
 0x193   : > { %9500 = vmatmul.mubr.msk.f32.vlgmr.msra.gmra.mrb[12].mxu0 %vm1504_vm1, %v10776_v7 }
 0x194   : > { %1667 = vrot.lane.b32.xlu1 %v10776_v7, %s10434_s2  ;;  %9504 = vmatprep.mubr.msk.f32.mxu0 %vm10433_vm0, %v10432_v48 }
 0x1cd   : > { %v1495_v12 = vpop.f32.mrb[8].mxu0 }
 0x1ce   : > { %v10798_v14 = vadd.f32 %v1495_v12, %v1089_v11  ;;  %v10800_v15 = vpop.f32.mrb[9].mxu0 }
 0x1cf   : > { %v1499_v16 = vpop.f32.mrb[10].mxu0 }
 0x1d0   : > { %v10802_v17 = vadd.f32 %v1499_v16, %v1089_v11  ;;  %v1501_v18 = vpop.f32.mrb[11].mxu0  ;;  %9503 = vmatpush3.msra.mxu0 %v10798_v14 }
 0x1d1   : > { %v10806_v19 = vadd.f32 %v1501_v18, %v10796_v13  ;;  %9507 = vmatprep.subr.mxu0 %v10432_v48 }
 0x202   : > { %v1670_v31 = vpop.permute.xlu1 %1669 }
 0x206   : > { %v1668_v33 = vpop.permute.xlu1 %1667 }
 0x266   : > { %v1577_v20 = vpop.f32.mrb[12].mxu0 }
 0x267   : > { %v1581_v21 = vmul.f32 0.17677669, %v1577_v20  ;;  %v9501_v22 = vpop.f32.mrb[13].mxu0 }
 0x269   : > { %v1583_v23 = vsel %vm1582_vm2, %v1581_v21, -inf }
 0x26a   : > { %1584 = vmax.xlane.f32.xlu0 %v1583_v23 }
 0x2f7   : > { %v1585_v24 = vpop.xlane.xlu0 %1584 }
 0x2f8   : > { %v1586_v25 = vsub.f32 %v1581_v21, %v1585_v24 }
 0x2fa   : > { %v1587_v26 = vmul.f32 1.442695, %v1586_v25 }
 0x2fc   : > { %10317 = vpow2.f32 %v1587_v26 }
 0x306   : > { %v10318_v27 = vpop.eup %10317 }
 0x307   : > { %v1589_v28 = vsel %vm1582_vm2, %v10318_v27, 0.0 }
 0x308   : > { %1590 = vadd.xlane.f32.xlu0 %v1589_v28 }
 0x395   : > { %v1591_v29 = vpop.xlane.xlu0 %1590 }
 0x396   : > { %10319 = vrcp.f32 %v1591_v29 }
 0x3a0   : > { %v10320_v30 = vpop.eup %10319 }
 0x3a1   : > { %v1593_v32 = vmul.f32 %v10320_v30, %v10318_v27 }
 0x3a3   : > { %9505 = vmatmul.mubr.msk.f32.vlgmr.msra.gmra.mrb[14].mxu0 %vm1582_vm2, %v1593_v32 }
 0x3a4   : > { %9508 = vmatpush3.xpose.msk.msra.mxu0 %vm1504_vm1, %v1670_v31  ;;  %9509 = vmatprep.mubr.msk.f32.mxu0 %vm10433_vm0, %v10432_v48 }
 0x3a5   : > { %9512 = vmatprep.subr.mxu0 %v10432_v48 }
 0x3a7   : > { %9510 = vmatmul.mubr.msk.f32.vlgmr.msra.gmra.mrb[16].mxu0 %vm1504_vm1, %v1668_v33 }
 0x3a8   : > { %9514 = vmatprep.mubr.msk.f32.mxu0 %vm10433_vm0, %v10432_v48 }
 0x476   : > { %v10819_v34 = vpop.f32.mrb[14].mxu0 }
 0x477   : > { %v9506_v35 = vpop.f32.mrb[15].mxu0 }
 0x47a   : > { %v1741_v36 = vpop.f32.mrb[16].mxu0 }
 0x47b   : > { %v1745_v37 = vmul.f32 0.17677669, %v1741_v36  ;;  %v9511_v38 = vpop.f32.mrb[17].mxu0 }
 0x47d   : > { %v1746_v39 = vsel %vm1582_vm2, %v1745_v37, -inf }
 0x47e   : > { %1747 = vmax.xlane.f32.xlu0 %v1746_v39 }
 0x494   : > { %1758 = vrot.lane.b32.xlu0 %v10798_v14, %s10434_s2 }
 0x498   : > { %1836 = vrot.lane.b32.xlu0 %v10763_v1, %s10435_s16 }
 0x49c   : > { %1834 = vrot.lane.b32.xlu0 %v10776_v7, %s10435_s16 }
 0x50b   : > { %v1748_v40 = vpop.xlane.xlu0 %1747 }
 0x50c   : > { %v1749_v41 = vsub.f32 %v1745_v37, %v1748_v40 }
 0x50e   : > { %v1750_v42 = vmul.f32 1.442695, %v1749_v41  ;;  %v10875_v41 = vadd.f32 %v10765_v2, %v10768_v3 }
 0x50f   : > { %v1759_v43 = vpop.permute.xlu0 %1758 }
 0x510   : > { %10321 = vpow2.f32 %v1750_v42  ;;  %9513 = vmatpush3.msra.mxu0 %v1759_v43  ;;  %v10889_v42 = vadd.f32 %v10800_v15, %v10796_v13 }
 0x511   : > { %9517 = vmatprep.subr.mxu0 %v10432_v48 }
 0x513   : > { %v1837_v49 = vpop.permute.xlu0 %1836 }
 0x517   : > { %v1835_v54 = vpop.permute.xlu0 %1834 }
 0x51a   : > { %v10322_v44 = vpop.eup %10321 }
 0x51b   : > { %v1752_v45 = vsel %vm1582_vm2, %v10322_v44, 0.0 }
 0x51c   : > { %1753 = vadd.xlane.f32.xlu1 %v1752_v45 }
 0x52d   : > { %1924 = vrot.lane.b32.xlu1 %v10798_v14, %s10435_s16 }
 0x531   : > { %2002 = vrot.lane.b32.xlu1 %v10763_v1, %s10436_s24 }
 0x5a9   : > { %v1754_v46 = vpop.xlane.xlu1 %1753 }
 0x5aa   : > { %10323 = vrcp.f32 %v1754_v46 }
 0x5ad   : > { %v1925_v55 = vpop.permute.xlu1 %1924 }
 0x5b1   : > { %v2003_v18 = vpop.permute.xlu1 %2002 }
 0x5b4   : > { %v10324_v47 = vpop.eup %10323 }
 0x5b5   : > { %v1756_v52 = vmul.f32 %v10324_v47, %v10322_v44 }
 0x5b7   : > { %9515 = vmatmul.mubr.msk.f32.vlgmr.msra.gmra.mrb[18].mxu0 %vm1582_vm2, %v1756_v52 }
 0x5b8   : > { %9518 = vmatpush3.xpose.msk.msra.mxu0 %vm1504_vm1, %v1837_v49  ;;  %9519 = vmatprep.mubr.msk.f32.mxu0 %vm10433_vm0, %v10432_v48 }
 0x5b9   : > { %9522 = vmatprep.subr.mxu0 %v10432_v48 }
 0x5bb   : > { %9520 = vmatmul.mubr.msk.f32.vlgmr.msra.gmra.mrb[20].mxu0 %vm1504_vm1, %v1835_v54 }
 0x5bc   : > { %9523 = vmatpush3.msra.mxu0 %v1925_v55  ;;  %9524 = vmatprep.mubr.msk.f32.mxu0 %vm10433_vm0, %v10432_v48 }
 0x5bd   : > { %9527 = vmatprep.subr.mxu0 %v10432_v48 }
 0x68a   : > { %v10843_v58 = vpop.f32.mrb[18].mxu0 }
 0x68b   : > { %v9516_v60 = vpop.f32.mrb[19].mxu0 }
 0x68e   : > { %v1908_v62 = vpop.f32.mrb[20].mxu0 }
 0x68f   : > { %v1912_v63 = vmul.f32 0.17677669, %v1908_v62  ;;  %v9521_v0 = vpop.f32.mrb[21].mxu0 }
 0x691   : > { %v1913_v1 = vsel %vm1582_vm2, %v1912_v63, -inf }
 0x692   : > { %1914 = vmax.xlane.f32.xlu0 %v1913_v1 }
 0x71f   : > { %v1915_v4 = vpop.xlane.xlu0 %1914 }
 0x720   : > { %v1916_v6 = vsub.f32 %v1912_v63, %v1915_v4 }
 0x722   : > { %v1917_v11 = vmul.f32 1.442695, %v1916_v6 }
 0x724   : > { %10325 = vpow2.f32 %v1917_v11 }
 0x72e   : > { %v10326_v12 = vpop.eup %10325 }
 0x72f   : > { %v1919_v16 = vsel %vm1582_vm2, %v10326_v12, 0.0 }
 0x730   : > { %1920 = vadd.xlane.f32.xlu1 %v1919_v16 }
 0x741   : > { %2000 = vrot.lane.b32.xlu1 %v10776_v7, %s10436_s24 }
 0x7bd   : > { %v1921_v20 = vpop.xlane.xlu1 %1920 }
 0x7be   : > { %10327 = vrcp.f32 %v1921_v20 }
 0x7c1   : > { %v2001_v23 = vpop.permute.xlu1 %2000 }
 0x7c8   : > { %v10328_v21 = vpop.eup %10327 }
 0x7c9   : > { %v1923_v22 = vmul.f32 %v10328_v21, %v10326_v12 }
 0x7cb   : > { %9525 = vmatmul.mubr.msk.f32.vlgmr.msra.gmra.mrb[22].mxu0 %vm1582_vm2, %v1923_v22 }
 0x7cc   : > { %9528 = vmatpush3.xpose.msk.msra.mxu0 %vm1504_vm1, %v2003_v18  ;;  %9529 = vmatprep.mubr.msk.f32.mxu0 %vm10433_vm0, %v10432_v48 }
 0x7cd   : > { %9577 = vmatprep.subr.mxu0 %v10432_v48 }
 0x7cf   : > { %9530 = vmatmul.mubr.msk.f32.vlgmr.msra.gmra.mrb[24].mxu0 %vm1504_vm1, %v2001_v23 }
 0x7d0   : > { %9578 = vmatpush3.xpose.msk.msra.mxu0 %vm1504_vm1, %v10770_v5  ;;  %9579 = vmatprep.mubr.msk.f32.mxu0 %vm10433_vm0, %v10432_v48 }
 0x7d1   : > { %9587 = vmatprep.subr.mxu0 %v10432_v48 }
 0x7d3   : > { %9580 = vmatmul.mubr.msk.f32.vlgmr.msra.gmra.mrb[26].mxu0 %vm1504_vm1, %v10756_v59 }
 0x7d4   : > { %9589 = vmatprep.mubr.msk.f32.mxu0 %vm10433_vm0, %v10432_v48 }
 0x89e   : > { %v10864_v7 = vpop.f32.mrb[22].mxu0 }
 0x89f   : > { %v9526_v24 = vpop.f32.mrb[23].mxu0 }
 0x8a2   : > { %v2074_v25 = vpop.f32.mrb[24].mxu0 }
 0x8a3   : > { %v2078_v26 = vmul.f32 0.17677669, %v2074_v25  ;;  %v9531_v27 = vpop.f32.mrb[25].mxu0 }
 0x8a5   : > { %v2079_v28 = vsel %vm1582_vm2, %v2078_v26, -inf }
 0x8a6   : > { %2080 = vmax.xlane.f32.xlu0 %v2079_v28  ;;  %v10867_v29 = vpop.f32.mrb[26].mxu0 }
 0x8a7   : > { %v9581_v30 = vpop.f32.mrb[27].mxu0 }
 0x8bc   : > { %2090 = vrot.lane.b32.xlu0 %v10798_v14, %s10436_s24  ;;  %v10884_v14 = vadd.f32 %v10751_v56, %v10754_v57 }
 0x933   : > { %v2081_v31 = vpop.xlane.xlu0 %2080 }
 0x934   : > { %v2082_v32 = vsub.f32 %v2078_v26, %v2081_v31 }
 0x936   : > { %v2083_v33 = vmul.f32 1.442695, %v2082_v32 }
 0x937   : > { %v2091_v35 = vpop.permute.xlu0 %2090 }
 0x938   : > { %10329 = vpow2.f32 %v2083_v33  ;;  %9533 = vmatpush3.msra.mxu1 %v2091_v35  ;;  %v10956_v35 = vmul.f32 0.17677669, %v10867_v29 }
 0x939   : > { %9537 = vmatprep.subr.mxu1 %v10432_v48 }
 0x942   : > { %v10330_v36 = vpop.eup %10329 }
 0x943   : > { %v2085_v37 = vsel %vm1582_vm2, %v10330_v36, 0.0 }
 0x944   : > { %2086 = vadd.xlane.f32.xlu1 %v2085_v37 }
 0x9d1   : > { %v2087_v38 = vpop.xlane.xlu1 %2086 }
 0x9d2   : > { %10331 = vrcp.f32 %v2087_v38 }
 0x9dc   : > { %v10332_v39 = vpop.eup %10331 }
 0x9dd   : > { %v2089_v40 = vmul.f32 %v10332_v39, %v10330_v36  ;;  %v2935_v36 = vsel %vm1582_vm2, %v10956_v35, -inf }
 0x9df   : > { %9535 = vmatmul.mubr.msk.f32.vlgmr.msra.gmra.mrb[0].mxu1 %vm1582_vm2, %v2089_v40 }
 0x9e0   : > { %9538 = vmatpush3.xpose.msk.msra.mxu1 %vm1504_vm1, %v10875_v41  ;;  %9539 = vmatprep.mubr.msk.f32.mxu1 %vm10433_vm0, %v10432_v48 }
 0x9e1   : > { %9542 = vmatprep.subr.mxu1 %v10432_v48 }
 0x9e3   : > { %9540 = vmatmul.mubr.msk.f32.vlgmr.msra.gmra.mrb[2].mxu1 %vm1504_vm1, %v10884_v14 }
 0x9e4   : > { %9543 = vmatpush3.msra.mxu1 %v10889_v42  ;;  %9544 = vmatprep.mubr.msk.f32.mxu1 %vm10433_vm0, %v10432_v48 }
 0x9e5   : > { %9547 = vmatprep.subr.mxu1 %v10432_v48 }
 0xab2   : > { %v10897_v2 = vpop.f32.mrb[0].mxu1 }
 0xab3   : > { %v9536_v56 = vpop.f32.mrb[1].mxu1 }
 0xab6   : > { %v2238_v57 = vpop.f32.mrb[2].mxu1 }
 0xab7   : > { %v2242_v3 = vmul.f32 0.17677669, %v2238_v57  ;;  %v9541_v43 = vpop.f32.mrb[3].mxu1 }
 0xab9   : > { %v2243_v44 = vsel %vm1582_vm2, %v2242_v3, -inf }
 0xaba   : > { %2244 = vmax.xlane.f32.xlu0 %v2243_v44 }
 0xad0   : > { %2327 = vrot.lane.b32.xlu0 %v10884_v14, %s10434_s2 }
 0xb47   : > { %v2245_v13 = vpop.xlane.xlu0 %2244 }
 0xb48   : > { %v2246_v15 = vsub.f32 %v2242_v3, %v2245_v13 }
 0xb4a   : > { %v2247_v45 = vmul.f32 1.442695, %v2246_v15 }
 0xb4b   : > { %v2328_v60 = vpop.permute.xlu0 %2327 }
 0xb4c   : > { %10333 = vpow2.f32 %v2247_v45 }
 0xb56   : > { %v10334_v46 = vpop.eup %10333 }
 0xb57   : > { %v2249_v47 = vsel %vm1582_vm2, %v10334_v46, 0.0 }
 0xb58   : > { %2250 = vadd.xlane.f32.xlu1 %v2249_v47 }
 0xb69   : > { %2329 = vrot.lane.b32.xlu1 %v10875_v41, %s10434_s2 }
 0xbe5   : > { %v2251_v49 = vpop.xlane.xlu1 %2250 }
 0xbe6   : > { %10335 = vrcp.f32 %v2251_v49 }
 0xbe9   : > { %v2330_v55 = vpop.permute.xlu1 %2329 }
 0xbf0   : > { %v10336_v52 = vpop.eup %10335 }
 0xbf1   : > { %v2253_v54 = vmul.f32 %v10336_v52, %v10334_v46 }
 0xbf3   : > { %9545 = vmatmul.mubr.msk.f32.vlgmr.msra.gmra.mrb[4].mxu1 %vm1582_vm2, %v2253_v54 }
 0xbf4   : > { %9548 = vmatpush3.xpose.msk.msra.mxu1 %vm1504_vm1, %v2330_v55  ;;  %9549 = vmatprep.mubr.msk.f32.mxu1 %vm10433_vm0, %v10432_v48 }
 0xbf5   : > { %9552 = vmatprep.subr.mxu1 %v10432_v48 }
 0xbf7   : > { %9550 = vmatmul.mubr.msk.f32.vlgmr.msra.gmra.mrb[6].mxu1 %vm1504_vm1, %v2328_v60 }
 0xbf8   : > { %9554 = vmatprep.mubr.msk.f32.mxu1 %vm10433_vm0, %v10432_v48 }
 0xcc6   : > { %v10913_v62 = vpop.f32.mrb[4].mxu1 }
 0xcc7   : > { %v9546_v63 = vpop.f32.mrb[5].mxu1 }
 0xcca   : > { %v2401_v0 = vpop.f32.mrb[6].mxu1 }
 0xccb   : > { %v2405_v1 = vmul.f32 0.17677669, %v2401_v0  ;;  %v9551_v4 = vpop.f32.mrb[7].mxu1 }
 0xccd   : > { %v2406_v6 = vsel %vm1582_vm2, %v2405_v1, -inf }
 0xcce   : > { %2407 = vmax.xlane.f32.xlu1 %v2406_v6 }
 0xcdf   : > { %2418 = vrot.lane.b32.xlu1 %v10889_v42, %s10434_s2 }
 0xce3   : > { %2494 = vrot.lane.b32.xlu1 %v10884_v14, %s10435_s16 }
 0xd5b   : > { %v2408_v11 = vpop.xlane.xlu1 %2407 }
 0xd5c   : > { %v2409_v12 = vsub.f32 %v2405_v1, %v2408_v11 }
 0xd5e   : > { %v2410_v16 = vmul.f32 1.442695, %v2409_v12 }
 0xd5f   : > { %v2419_v18 = vpop.permute.xlu1 %2418 }
 0xd60   : > { %10337 = vpow2.f32 %v2410_v16  ;;  %9553 = vmatpush3.msra.mxu1 %v2419_v18 }
 0xd61   : > { %9557 = vmatprep.subr.mxu1 %v10432_v48 }
 0xd63   : > { %v2495_v26 = vpop.permute.xlu1 %2494 }
 0xd6a   : > { %v10338_v20 = vpop.eup %10337 }
 0xd6b   : > { %v2412_v21 = vsel %vm1582_vm2, %v10338_v20, 0.0 }
 0xd6c   : > { %2413 = vadd.xlane.f32.xlu0 %v2412_v21 }
 0xd82   : > { %2496 = vrot.lane.b32.xlu0 %v10875_v41, %s10435_s16 }
 0xdf9   : > { %v2414_v22 = vpop.xlane.xlu0 %2413 }
 0xdfa   : > { %10339 = vrcp.f32 %v2414_v22 }
 0xdfd   : > { %v2497_v25 = vpop.permute.xlu0 %2496 }
 0xe04   : > { %v10340_v23 = vpop.eup %10339 }
 0xe05   : > { %v2416_v24 = vmul.f32 %v10340_v23, %v10338_v20 }
 0xe07   : > { %9555 = vmatmul.mubr.msk.f32.vlgmr.msra.gmra.mrb[8].mxu1 %vm1582_vm2, %v2416_v24 }
 0xe08   : > { %9558 = vmatpush3.xpose.msk.msra.mxu1 %vm1504_vm1, %v2497_v25  ;;  %9559 = vmatprep.mubr.msk.f32.mxu1 %vm10433_vm0, %v10432_v48 }
 0xe09   : > { %9562 = vmatprep.subr.mxu1 %v10432_v48 }
 0xe0b   : > { %9560 = vmatmul.mubr.msk.f32.vlgmr.msra.gmra.mrb[10].mxu1 %vm1504_vm1, %v2495_v26 }
 0xe0c   : > { %9564 = vmatprep.mubr.msk.f32.mxu1 %vm10433_vm0, %v10432_v48 }
 0xeda   : > { %v10932_v27 = vpop.f32.mrb[8].mxu1 }
 0xedb   : > { %v9556_v28 = vpop.f32.mrb[9].mxu1 }
 0xede   : > { %v2568_v30 = vpop.f32.mrb[10].mxu1 }
 0xedf   : > { %v2572_v31 = vmul.f32 0.17677669, %v2568_v30  ;;  %v9561_v32 = vpop.f32.mrb[11].mxu1 }
 0xee1   : > { %v2573_v33 = vsel %vm1582_vm2, %v2572_v31, -inf }
 0xee2   : > { %2574 = vmax.xlane.f32.xlu1 %v2573_v33 }
 0xef3   : > { %2584 = vrot.lane.b32.xlu1 %v10889_v42, %s10435_s16 }
 0xef7   : > { %2660 = vrot.lane.b32.xlu1 %v10884_v14, %s10436_s24 }
 0xefb   : > { %3021 = vrot.lane.b32.xlu1 %v10770_v5, %s10434_s2 }
 0xeff   : > { %3019 = vrot.lane.b32.xlu1 %v10756_v59, %s10434_s2 }
 0xf03   : > { %3188 = vrot.lane.b32.xlu1 %v10770_v5, %s10435_s16 }
 0xf07   : > { %3186 = vrot.lane.b32.xlu1 %v10756_v59, %s10435_s16 }
 0xf0b   : > { %3352 = vrot.lane.b32.xlu1 %v10756_v59, %s10436_s24 }
 0xf0f   : > { %3679 = vrot.lane.b32.xlu1 %v10759_v61, %s10434_s2 }
 0xf13   : > { %3846 = vrot.lane.b32.xlu1 %v10759_v61, %s10435_s16 }
 0xf17   : > { %4012 = vrot.lane.b32.xlu1 %v10759_v61, %s10436_s24 }
 0xf3b   : > { %2936 = vmax.xlane.f32.xlu1 %v2935_v36 }
 0xf6f   : > { %v2575_v37 = vpop.xlane.xlu1 %2574 }
 0xf70   : > { %v2576_v38 = vsub.f32 %v2572_v31, %v2575_v37 }
 0xf72   : > { %v2577_v39 = vmul.f32 1.442695, %v2576_v38 }
 0xf73   : > { %v2585_v59 = vpop.permute.xlu1 %2584 }
 0xf74   : > { %10341 = vpow2.f32 %v2577_v39  ;;  %9563 = vmatpush3.msra.mxu1 %v2585_v59 }
 0xf75   : > { %9567 = vmatprep.subr.mxu1 %v10432_v48 }
 0xf77   : > { %v2661_v40 = vpop.permute.xlu1 %2660 }
 0xf7b   : > { %v3022_v14 = vpop.permute.xlu1 %3021 }
 0xf7c   : > { %9588 = vmatpush3.xpose.msk.msra.mxu0 %vm1504_vm1, %v3022_v14 }
 0xf7d   : > { %9597 = vmatprep.subr.mxu0 %v10432_v48 }
 0xf7e   : > { %v10342_v29 = vpop.eup %10341 }
 0xf7f   : > { %v3020_v56 = vpop.permute.xlu1 %3019  ;;  %v2579_v57 = vsel %vm1582_vm2, %v10342_v29, 0.0 }
 0xf80   : > { %2580 = vadd.xlane.f32.xlu0 %v2579_v57  ;;  %9590 = vmatmul.mubr.msk.f32.vlgmr.msra.gmra.mrb[28].mxu0 %vm1504_vm1, %v3020_v56 }
 0xf81   : > { %9599 = vmatprep.mubr.msk.f32.mxu0 %vm10433_vm0, %v10432_v48 }
 0xf83   : > { %v3189_v3 = vpop.permute.xlu1 %3188 }
 0xf84   : > { %9598 = vmatpush3.xpose.msk.msra.mxu0 %vm1504_vm1, %v3189_v3 }
 0xf85   : > { %9607 = vmatprep.subr.mxu0 %v10432_v48 }
 0xf87   : > { %v3187_v43 = vpop.permute.xlu1 %3186 }
 0xf88   : > { %9600 = vmatmul.mubr.msk.f32.vlgmr.msra.gmra.mrb[30].mxu0 %vm1504_vm1, %v3187_v43 }
 0xf89   : > { %9609 = vmatprep.mubr.msk.f32.mxu0 %vm10433_vm0, %v10432_v48 }
 0xf8b   : > { %v3353_v45 = vpop.permute.xlu1 %3352 }
 0xf8f   : > { %v3680_v47 = vpop.permute.xlu1 %3679 }
 0xf93   : > { %v3847_v49 = vpop.permute.xlu1 %3846 }
 0xf96   : > { %2662 = vrot.lane.b32.xlu0 %v10875_v41, %s10436_s24 }
 0xf97   : > { %v4013_v52 = vpop.permute.xlu1 %4012 }
 0xf9a   : > { %3354 = vrot.lane.b32.xlu0 %v10770_v5, %s10436_s24 }
 0xf9e   : > { %3681 = vrot.lane.b32.xlu0 %v10779_v8, %s10434_s2 }
 0xfa2   : > { %3848 = vrot.lane.b32.xlu0 %v10779_v8, %s10435_s16 }
 0xfa6   : > { %4014 = vrot.lane.b32.xlu0 %v10779_v8, %s10436_s24 }
 0xfc8   : > { %v2937_v0 = vpop.xlane.xlu1 %2936 }
 0xfc9   : > { %v2938_v11 = vsub.f32 %v10956_v35, %v2937_v0 }
 0xfcb   : > { %v2939_v22 = vmul.f32 1.442695, %v2938_v11 }
0x100d   : > { %v2581_v44 = vpop.xlane.xlu0 %2580 }
0x100e   : > { %10343 = vrcp.f32 %v2581_v44 }
0x100f   : > { %10345 = vpow2.f32 %v2939_v22 }
0x1011   : > { %v2663_v13 = vpop.permute.xlu0 %2662 }
0x1015   : > { %v3355_v15 = vpop.permute.xlu0 %3354 }
0x1016   : > { %9608 = vmatpush3.xpose.msk.msra.mxu0 %vm1504_vm1, %v3355_v15 }
0x1017   : > { %9617 = vmatprep.subr.mxu0 %v10432_v48 }
0x1018   : > { %v10344_v41 = vpop.eup %10343 }
0x1019   : > { %v2583_v5 = vmul.f32 %v10344_v41, %v10342_v29  ;;  %v3682_v46 = vpop.permute.xlu0 %3681  ;;  %9610 = vmatmul.mubr.msk.f32.vlgmr.msra.gmra.mrb[32].mxu0 %vm1504_vm1, %v3353_v45  ;;  %v11023_v57 = vpop.eup %10345 }
0x101a   : > { %9618 = vmatpush3.xpose.msk.msra.mxu0 %vm1504_vm1, %v10779_v8  ;;  %9619 = vmatprep.mubr.msk.f32.mxu0 %vm10433_vm0, %v10432_v48  ;;  %v2941_v44 = vsel %vm1582_vm2, %v11023_v57, 0.0 }
0x101b   : > { %9565 = vmatmul.mubr.msk.f32.vlgmr.msra.gmra.mrb[12].mxu1 %vm1582_vm2, %v2583_v5  ;;  %9627 = vmatprep.subr.mxu0 %v10432_v48 }
0x101c   : > { %9568 = vmatpush3.xpose.msk.msra.mxu1 %vm1504_vm1, %v2663_v13  ;;  %9569 = vmatprep.mubr.msk.f32.mxu1 %vm10433_vm0, %v10432_v48 }
0x101d   : > { %9620 = vmatmul.mubr.msk.f32.vlgmr.msra.gmra.mrb[34].mxu0 %vm1504_vm1, %v10759_v61  ;;  %9572 = vmatprep.subr.mxu1 %v10432_v48  ;;  %v3849_v8 = vpop.permute.xlu0 %3848 }
0x101e   : > { %9628 = vmatpush3.xpose.msk.msra.mxu0 %vm1504_vm1, %v3682_v46  ;;  %9629 = vmatprep.mubr.msk.f32.mxu0 %vm10433_vm0, %v10432_v48 }
0x101f   : > { %9570 = vmatmul.mubr.msk.f32.vlgmr.msra.gmra.mrb[14].mxu1 %vm1504_vm1, %v2661_v40  ;;  %9637 = vmatprep.subr.mxu0 %v10432_v48 }
0x1020   : > { %9574 = vmatprep.mubr.msk.f32.mxu1 %vm10433_vm0, %v10432_v48 }
0x1021   : > { %9630 = vmatmul.mubr.msk.f32.vlgmr.msra.gmra.mrb[36].mxu0 %vm1504_vm1, %v3680_v47  ;;  %v4015_v61 = vpop.permute.xlu0 %4014 }
0x1022   : > { %9638 = vmatpush3.xpose.msk.msra.mxu0 %vm1504_vm1, %v3849_v8  ;;  %9639 = vmatprep.mubr.msk.f32.mxu0 %vm10433_vm0, %v10432_v48 }
0x1023   : > { %9647 = vmatprep.subr.mxu0 %v10432_v48 }
0x1025   : > { %9640 = vmatmul.mubr.msk.f32.vlgmr.msra.gmra.mrb[38].mxu0 %vm1504_vm1, %v3847_v49 }
0x1026   : > { %9648 = vmatpush3.xpose.msk.msra.mxu0 %vm1504_vm1, %v4015_v61  ;;  %9649 = vmatprep.mubr.msk.f32.mxu0 %vm10433_vm0, %v10432_v48 }
0x1029   : > { %9650 = vmatmul.mubr.msk.f32.vlgmr.msra.gmra.mrb[40].mxu0 %vm1504_vm1, %v4013_v52 }
0x1053   : > { %v3093_v54 = vpop.f32.mrb[28].mxu0 }
0x1054   : > { %v9591_v55 = vpop.f32.mrb[29].mxu0  ;;  %v3097_v28 = vmul.f32 0.17677669, %v3093_v54 }
0x1056   : > { %v3098_v38 = vsel %vm1582_vm2, %v3097_v28, -inf }
0x105b   : > { %v3260_v60 = vpop.f32.mrb[30].mxu0 }
0x105c   : > { %v9601_v63 = vpop.f32.mrb[31].mxu0  ;;  %v3264_v36 = vmul.f32 0.17677669, %v3260_v60 }
0x105e   : > { %v3265_v29 = vsel %vm1582_vm2, %v3264_v36, -inf }
0x10ec   : > { %v3426_v1 = vpop.f32.mrb[32].mxu0 }
0x10ed   : > { %v3430_v4 = vmul.f32 0.17677669, %v3426_v1  ;;  %v9611_v6 = vpop.f32.mrb[33].mxu0 }
0x10ee   : > { %v11015_v12 = vpop.f32.mrb[12].mxu1 }
0x10ef   : > { %v9566_v16 = vpop.f32.mrb[13].mxu1  ;;  %v3431_v18 = vsel %vm1582_vm2, %v3430_v4, -inf }
0x10f0   : > { %3432 = vmax.xlane.f32.xlu1 %v3431_v18  ;;  %v3590_v20 = vpop.f32.mrb[34].mxu0 }
0x10f1   : > { %v9621_v21 = vpop.f32.mrb[35].mxu0  ;;  %v3594_v59 = vmul.f32 0.17677669, %v3590_v20 }
0x10f2   : > { %v2734_v23 = vpop.f32.mrb[14].mxu1 }
0x10f3   : > { %v2738_v24 = vmul.f32 0.17677669, %v2734_v23  ;;  %v9571_v25 = vpop.f32.mrb[15].mxu1  ;;  %v3595_v43 = vsel %vm1582_vm2, %v3594_v59, -inf }
0x10f4   : > { %v3753_v26 = vpop.f32.mrb[36].mxu0 }
0x10f5   : > { %v3757_v30 = vmul.f32 0.17677669, %v3753_v26  ;;  %v9631_v31 = vpop.f32.mrb[37].mxu0  ;;  %v2739_v32 = vsel %vm1582_vm2, %v2738_v24, -inf }
0x10f6   : > { %2740 = vmax.xlane.f32.xlu0 %v2739_v32 }
0x10f7   : > { %v3758_v33 = vsel %vm1582_vm2, %v3757_v30, -inf }
0x10f8   : > { %3759 = vmax.xlane.f32.xlu1 %v3758_v33  ;;  %v3920_v35 = vpop.f32.mrb[38].mxu0 }
0x10f9   : > { %v9641_v37 = vpop.f32.mrb[39].mxu0  ;;  %v3924_v3 = vmul.f32 0.17677669, %v3920_v35 }
0x10fa   : > { %3099 = vmax.xlane.f32.xlu0 %v3098_v38 }
0x10fb   : > { %v3925_v13 = vsel %vm1582_vm2, %v3924_v3, -inf }
0x10fc   : > { %v4086_v39 = vpop.f32.mrb[40].mxu0 }
0x10fd   : > { %v4090_v40 = vmul.f32 0.17677669, %v4086_v39  ;;  %v9651_v14 = vpop.f32.mrb[41].mxu0 }
0x10fe   : > { %3266 = vmax.xlane.f32.xlu0 %v3265_v29 }
0x10ff   : > { %v4091_v56 = vsel %vm1582_vm2, %v4090_v40, -inf }
0x1100   : > { %4092 = vmax.xlane.f32.xlu1 %v4091_v56 }
0x1102   : > { %3596 = vmax.xlane.f32.xlu0 %v3595_v43 }
0x1104   : > { %2942 = vadd.xlane.f32.xlu1 %v2941_v44 }
0x1106   : > { %3926 = vmax.xlane.f32.xlu0 %v3925_v13 }
0x117d   : > { %v3433_v15 = vpop.xlane.xlu1 %3432 }
0x117e   : > { %v3434_v41 = vsub.f32 %v3430_v4, %v3433_v15 }
0x1180   : > { %v3435_v8 = vmul.f32 1.442695, %v3434_v41 }
0x1183   : > { %v2741_v45 = vpop.xlane.xlu0 %2740 }
0x1184   : > { %v2742_v1 = vsub.f32 %v2738_v24, %v2741_v45 }
0x1185   : > { %v3760_v5 = vpop.xlane.xlu1 %3759 }
0x1186   : > { %v3761_v49 = vsub.f32 %v3757_v30, %v3760_v5  ;;  %v2743_v20 = vmul.f32 1.442695, %v2742_v1 }
0x1187   : > { %v3100_v46 = vpop.xlane.xlu0 %3099 }
0x1188   : > { %v3101_v47 = vsub.f32 %v3097_v28, %v3100_v46  ;;  %v3762_v55 = vmul.f32 1.442695, %v3761_v49 }
0x118a   : > { %v3102_v61 = vmul.f32 1.442695, %v3101_v47 }
0x118b   : > { %v3267_v52 = vpop.xlane.xlu0 %3266 }
0x118c   : > { %10347 = vpow2.f32 %v3102_v61  ;;  %v3268_v54 = vsub.f32 %v3264_v36, %v3267_v52 }
0x118d   : > { %10349 = vpow2.f32 %v3435_v8  ;;  %v4093_v11 = vpop.xlane.xlu1 %4092 }
0x118e   : > { %v3269_v60 = vmul.f32 1.442695, %v3268_v54  ;;  %v4094_v21 = vsub.f32 %v4090_v40, %v4093_v11 }
0x118f   : > { %v3597_v63 = vpop.xlane.xlu0 %3596 }
0x1190   : > { %10351 = vpow2.f32 %v3269_v60  ;;  %v3598_v0 = vsub.f32 %v3594_v59, %v3597_v63  ;;  %v4095_v24 = vmul.f32 1.442695, %v4094_v21 }
0x1191   : > { %10353 = vpow2.f32 %v3762_v55  ;;  %v2943_v14 = vpop.xlane.xlu1 %2942 }
0x1192   : > { %v3599_v6 = vmul.f32 1.442695, %v3598_v0 }
0x1193   : > { %v3927_v4 = vpop.xlane.xlu0 %3926 }
0x1194   : > { %10355 = vpow2.f32 %v3599_v6  ;;  %v3928_v16 = vsub.f32 %v3924_v3, %v3927_v4 }
0x1196   : > { %v11029_v18 = vpop.eup %10347  ;;  %v3929_v22 = vmul.f32 1.442695, %v3928_v16 }
0x1197   : > { %v3104_v23 = vsel %vm1582_vm2, %v11029_v18, 0.0  ;;  %v11033_v25 = vpop.eup %10349 }
0x1198   : > { %10357 = vpow2.f32 %v3929_v22  ;;  %3105 = vadd.xlane.f32.xlu0 %v3104_v23  ;;  %v3437_v28 = vsel %vm1582_vm2, %v11033_v25, 0.0  ;;  %v9885_v22 = vld [vmem:[%s10561_s28] ss:$8 sps:$4 sm:$0xff]   ;;  %v9887_v23 = vld [vmem:[%s10561_s28 + $0x4] ss:$8 sps:$4 sm:$0xff]  }
0x1199   : > { %10359 = vpow2.f32 %v2743_v20  ;;  %4414 = vmatprep.subr.bf16.mxu0 %v9887_v23 }
0x119a   : > { %v11035_v26 = vpop.eup %10351  ;;  %10361 = vpow2.f32 %v4095_v24  ;;  %4415 = vmatpush1.bf16.msra.mxu0 %v9885_v22  ;;  %v9893_v24 = vld [vmem:[%s10561_s28 + $0x24] ss:$8 sps:$4 sm:$0xff]  }
0x119b   : > { %v3271_v30 = vsel %vm1582_vm2, %v11035_v26, 0.0  ;;  %v11041_v31 = vpop.eup %10353 }
0x119c   : > { %3438 = vadd.xlane.f32.xlu0 %v3437_v28  ;;  %3272 = vadd.xlane.f32.xlu1 %v3271_v30  ;;  %v3764_v33 = vsel %vm1582_vm2, %v11041_v31, 0.0  ;;  %v9896_v28 = vld [vmem:[%s10561_s28 + $0x34] ss:$8 sps:$4 sm:$0xff]   ;;  %v9894_v30 = vld [vmem:[%s10561_s28 + $0x30] ss:$8 sps:$4 sm:$0xff]  }
0x119e   : > { %v11043_v32 = vpop.eup %10355 }
0x119f   : > { %v3601_v35 = vsel %vm1582_vm2, %v11043_v32, 0.0 }
0x11a0   : > { %3765 = vadd.xlane.f32.xlu0 %v3764_v33  ;;  %3602 = vadd.xlane.f32.xlu1 %v3601_v35  ;;  %v9902_v33 = vld [vmem:[%s10561_s28 + $0x54] ss:$8 sps:$4 sm:$0xff]   ;;  %v9900_v35 = vld [vmem:[%s10561_s28 + $0x50] ss:$8 sps:$4 sm:$0xff]  }
0x11a2   : > { %v11049_v36 = vpop.eup %10357 }
0x11a3   : > { %v3931_v37 = vsel %vm1582_vm2, %v11049_v36, 0.0  ;;  %v10360_v38 = vpop.eup %10359 }
0x11a4   : > { %3932 = vadd.xlane.f32.xlu0 %v3931_v37  ;;  %v2745_v39 = vsel %vm1582_vm2, %v10360_v38, 0.0  ;;  %v11054_v59 = vpop.eup %10361  ;;  %v9903_v37 = vld [vmem:[%s10561_s28 + $0x60] ss:$8 sps:$4 sm:$0xff]  }
0x11a5   : > { %v4097_v40 = vsel %vm1582_vm2, %v11054_v59, 0.0 }
0x11a8   : > { %2746 = vadd.xlane.f32.xlu0 %v2745_v39  ;;  %v9906_v39 = vld [vmem:[%s10561_s28 + $0x70] ss:$8 sps:$4 sm:$0xff]  }
0x11ac   : > { %4098 = vadd.xlane.f32.xlu0 %v4097_v40  ;;  %v9909_v40 = vld [vmem:[%s10561_s28 + $0x80] ss:$8 sps:$4 sm:$0xff]  }
0x11b1   : > { %2750 = vrot.lane.b32.xlu1 %v10889_v42, %s10436_s24 }
0x11b5   : > { %3276 = vrot.lane.b32.xlu1 %v10802_v17, %s10435_s16 }
0x11b9   : > { %3442 = vrot.lane.b32.xlu1 %v10802_v17, %s10436_s24 }
0x11bd   : > { %3770 = vrot.lane.b32.xlu1 %v10806_v19, %s10434_s2 }
0x11c1   : > { %3936 = vrot.lane.b32.xlu1 %v10806_v19, %s10435_s16 }
0x11c2   : > { %3110 = vrot.lane.b32.xlu0 %v10802_v17, %s10434_s2 }
0x11c6   : > { %4102 = vrot.lane.b32.xlu0 %v10806_v19, %s10436_s24 }
0x1225   : > { %v3106_v42 = vpop.xlane.xlu0 %3105 }
0x1229   : > { %v3439_v29 = vpop.xlane.xlu0 %3438  ;;  %v3273_v56 = vpop.xlane.xlu1 %3272 }
0x122d   : > { %v3766_v3 = vpop.xlane.xlu0 %3765  ;;  %v3603_v43 = vpop.xlane.xlu1 %3602 }
0x1231   : > { %v3933_v44 = vpop.xlane.xlu0 %3932  ;;  %v2751_v13 = vpop.permute.xlu1 %2750 }
0x1232   : > { %9573 = vmatpush3.msra.mxu1 %v2751_v13 }
0x1233   : > { %9582 = vmatprep.subr.mxu1 %v10432_v48 }
0x1235   : > { %v2747_v15 = vpop.xlane.xlu0 %2746  ;;  %v3277_v52 = vpop.permute.xlu1 %3276 }
0x1236   : > { %10363 = vrcp.f32 %v2747_v15  ;;  %v9920_v15 = vld [vmem:[%s10561_s28 + $0xb4] ss:$8 sps:$4 sm:$0xff]  }
0x1237   : > { %10365 = vrcp.f32 %v2943_v14  ;;  %v9914_v14 = vld [vmem:[%s10561_s28 + $0x94] ss:$8 sps:$4 sm:$0xff]  }
0x1238   : > { %10367 = vrcp.f32 %v3106_v42 }
0x1239   : > { %10369 = vrcp.f32 %v3273_v56  ;;  %v4099_v5 = vpop.xlane.xlu0 %4098  ;;  %v3443_v55 = vpop.permute.xlu1 %3442 }
0x123a   : > { %10371 = vrcp.f32 %v3439_v29  ;;  %v9912_v29 = vld [vmem:[%s10561_s28 + $0x90] ss:$8 sps:$4 sm:$0xff]  }
0x123b   : > { %10373 = vrcp.f32 %v3603_v43 }
0x123c   : > { %10375 = vrcp.f32 %v3766_v3  ;;  %v9917_v3 = vld [vmem:[%s10561_s28 + $0xa4] ss:$8 sps:$4 sm:$0xff]  }
0x123d   : > { %v3111_v49 = vpop.permute.xlu0 %3110  ;;  %10377 = vrcp.f32 %v3933_v44  ;;  %v3771_v1 = vpop.permute.xlu1 %3770  ;;  %v9915_v44 = vld [vmem:[%s10561_s28 + $0xa0] ss:$8 sps:$4 sm:$0xff]  }
0x123e   : > { %10379 = vrcp.f32 %v4099_v5 }
0x1240   : > { %v10364_v45 = vpop.eup %10363 }
0x1241   : > { %v2749_v41 = vmul.f32 %v10364_v45, %v10360_v38  ;;  %v10366_v46 = vpop.eup %10365  ;;  %v3937_v4 = vpop.permute.xlu1 %3936  ;;  %v9908_v38 = vld [vmem:[%s10561_s28 + $0x74] ss:$8 sps:$4 sm:$0xff]  }
0x1242   : > { %v2945_v47 = vmul.f32 %v10366_v46, %v11023_v57  ;;  %v10368_v8 = vpop.eup %10367  ;;  %v4103_v20 = vpop.permute.xlu0 %4102 }
0x1243   : > { %9575 = vmatmul.mubr.msk.f32.vlgmr.msra.gmra.mrb[16].mxu1 %vm1582_vm2, %v2749_v41  ;;  %v3108_v61 = vmul.f32 %v10368_v8, %v11029_v18  ;;  %v9918_v41 = vld [vmem:[%s10561_s28 + $0xb0] ss:$8 sps:$4 sm:$0xff]   ;;  %v9921_v8 = vld [vmem:[%s10561_s28 + $0xc0] ss:$8 sps:$4 sm:$0xff]  }
0x1244   : > { %9583 = vmatpush3.msra.mxu1 %v10802_v17  ;;  %9584 = vmatprep.mubr.msk.f32.mxu1 %vm10433_vm0, %v10432_v48  ;;  %v10370_v17 = vpop.eup %10369 }
0x1245   : > { %9592 = vmatprep.subr.mxu1 %v10432_v48  ;;  %v3275_v57 = vmul.f32 %v10370_v17, %v11035_v26  ;;  %v10372_v54 = vpop.eup %10371  ;;  %v9888_v26 = vld [vmem:[%s10561_s28 + $0x10] ss:$8 sps:$4 sm:$0xff]  }
0x1246   : > { %v3441_v60 = vmul.f32 %v10372_v54, %v11033_v25  ;;  %v10374_v63 = vpop.eup %10373  ;;  %v9890_v25 = vld [vmem:[%s10561_s28 + $0x14] ss:$8 sps:$4 sm:$0xff]  }
0x1247   : > { %9585 = vmatmul.mubr.msk.f32.vlgmr.msra.gmra.mrb[18].mxu1 %vm1582_vm2, %v2945_v47  ;;  %v3605_v0 = vmul.f32 %v10374_v63, %v11043_v32  ;;  %v10376_v6 = vpop.eup %10375  ;;  %4416 = vmatprep.subr.bf16.mxu0 %v9890_v25  ;;  %v9897_v32 = vld [vmem:[%s10561_s28 + $0x40] ss:$8 sps:$4 sm:$0xff]   ;;  %v9923_v47 = vld [vmem:[%s10561_s28 + $0xc4] ss:$8 sps:$4 sm:$0xff]  }
0x1248   : > { %9593 = vmatpush3.msra.mxu1 %v3111_v49  ;;  %9594 = vmatprep.mubr.msk.f32.mxu1 %vm10433_vm0, %v10432_v48  ;;  %v3768_v11 = vmul.f32 %v10376_v6, %v11041_v31  ;;  %v9899_v31 = vld [vmem:[%s10561_s28 + $0x44] ss:$8 sps:$4 sm:$0xff]   ;;  %v9932_v6 = vld [vmem:[%s10561_s28 + $0xf4] ss:$8 sps:$4 sm:$0xff]  }
0x1249   : > { %9602 = vmatprep.subr.mxu1 %v10432_v48  ;;  %4417 = vmatpush1.bf16.msra.mxu0 %v9888_v26 }
0x124a   : > { %4418 = vmatprep.subr.bf16.mxu0 %v9893_v24 }
0x124b   : > { %9595 = vmatmul.mubr.msk.f32.vlgmr.msra.gmra.mrb[20].mxu1 %vm1582_vm2, %v3108_v61 }
0x124c   : > { %9603 = vmatpush3.msra.mxu1 %v3277_v52  ;;  %9604 = vmatprep.mubr.msk.f32.mxu1 %vm10433_vm0, %v10432_v48 }
0x124d   : > { %9612 = vmatprep.subr.mxu1 %v10432_v48 }
0x124f   : > { %9605 = vmatmul.mubr.msk.f32.vlgmr.msra.gmra.mrb[22].mxu1 %vm1582_vm2, %v3275_v57  ;;  %v9924_v57 = vld [vmem:[%s10561_s28 + $0xd0] ss:$8 sps:$4 sm:$0xff]  }
0x1250   : > { %9613 = vmatpush3.msra.mxu1 %v3443_v55  ;;  %9614 = vmatprep.mubr.msk.f32.mxu1 %vm10433_vm0, %v10432_v48 }
0x1251   : > { %9622 = vmatprep.subr.mxu1 %v10432_v48 }
0x1253   : > { %9615 = vmatmul.mubr.msk.f32.vlgmr.msra.gmra.mrb[24].mxu1 %vm1582_vm2, %v3441_v60  ;;  %v9929_v60 = vld [vmem:[%s10561_s28 + $0xe4] ss:$8 sps:$4 sm:$0xff]  }
0x1254   : > { %9623 = vmatpush3.msra.mxu1 %v10806_v19  ;;  %9624 = vmatprep.mubr.msk.f32.mxu1 %vm10433_vm0, %v10432_v48  ;;  %v10378_v19 = vpop.eup %10377 }
0x1255   : > { %9632 = vmatprep.subr.mxu1 %v10432_v48  ;;  %v3935_v16 = vmul.f32 %v10378_v19, %v11049_v36  ;;  %v10380_v18 = vpop.eup %10379  ;;  %v9905_v36 = vld [vmem:[%s10561_s28 + $0x64] ss:$8 sps:$4 sm:$0xff]  }
0x1256   : > { %v4101_v21 = vmul.f32 %v10380_v18, %v11054_v59  ;;  %v9911_v59 = vld [vmem:[%s10561_s28 + $0x84] ss:$8 sps:$4 sm:$0xff]  }
0x1257   : > { %9625 = vmatmul.mubr.msk.f32.vlgmr.msra.gmra.mrb[26].mxu1 %vm1582_vm2, %v3605_v0  ;;  %v9927_v0 = vld [vmem:[%s10561_s28 + $0xe0] ss:$8 sps:$4 sm:$0xff]  }
0x1258   : > { %9633 = vmatpush3.msra.mxu1 %v3771_v1  ;;  %9634 = vmatprep.mubr.msk.f32.mxu1 %vm10433_vm0, %v10432_v48  ;;  %v9930_v1 = vld [vmem:[%s10561_s28 + $0xf0] ss:$8 sps:$4 sm:$0xff]  }
0x1259   : > { %9642 = vmatprep.subr.mxu1 %v10432_v48 }
0x125b   : > { %9635 = vmatmul.mubr.msk.f32.vlgmr.msra.gmra.mrb[28].mxu1 %vm1582_vm2, %v3768_v11 }
0x125c   : > { %9643 = vmatpush3.msra.mxu1 %v3937_v4  ;;  %9644 = vmatprep.mubr.msk.f32.mxu1 %vm10433_vm0, %v10432_v48 }
0x125d   : > { %9652 = vmatprep.subr.mxu1 %v10432_v48 }
0x125f   : > { %9645 = vmatmul.mubr.msk.f32.vlgmr.msra.gmra.mrb[30].mxu1 %vm1582_vm2, %v3935_v16 }
0x1260   : > { %9653 = vmatpush3.msra.mxu1 %v4103_v20  ;;  %9654 = vmatprep.mubr.msk.f32.mxu1 %vm10433_vm0, %v10432_v48  ;;  %v9891_v48 = vld [vmem:[%s10561_s28 + $0x20] ss:$8 sps:$4 sm:$0xff]  }
0x1261   : > { %4419 = vmatpush1.bf16.msra.mxu0 %v9891_v48 }
0x1262   : > { %4420 = vmatprep.subr.bf16.mxu0 %v9896_v28 }
0x1263   : > { %9655 = vmatmul.mubr.msk.f32.vlgmr.msra.gmra.mrb[32].mxu1 %vm1582_vm2, %v4101_v21 }
0x1265   : > { %4421 = vmatpush1.bf16.msra.mxu0 %v9894_v30 }
0x1266   : > { %4422 = vmatprep.subr.bf16.mxu0 %v9899_v31 }
0x1269   : > { %4423 = vmatpush1.bf16.msra.mxu0 %v9897_v32 }
0x126a   : > { %4424 = vmatprep.subr.bf16.mxu0 %v9902_v33 }
0x126d   : > { %4425 = vmatpush1.bf16.msra.mxu0 %v9900_v35 }
0x126e   : > { %4426 = vmatprep.subr.bf16.mxu0 %v9905_v36 }
0x1271   : > { %4427 = vmatpush1.bf16.msra.mxu0 %v9903_v37 }
0x1272   : > { %4428 = vmatprep.subr.bf16.mxu0 %v9908_v38 }
0x1275   : > { %4429 = vmatpush1.bf16.msra.mxu0 %v9906_v39 }
0x1276   : > { %4430 = vmatprep.subr.bf16.mxu0 %v9911_v59 }
0x1279   : > { %4431 = vmatpush1.bf16.msra.mxu0 %v9909_v40 }
0x127a   : > { %4432 = vmatprep.subr.bf16.mxu0 %v9914_v14 }
0x127d   : > { %4433 = vmatpush1.bf16.msra.mxu0 %v9912_v29 }
0x127e   : > { %4434 = vmatprep.subr.bf16.mxu0 %v9917_v3 }
0x1281   : > { %4435 = vmatpush1.bf16.msra.mxu0 %v9915_v44 }
0x1282   : > { %4436 = vmatprep.subr.bf16.mxu0 %v9920_v15 }
0x1285   : > { %4437 = vmatpush1.bf16.msra.mxu0 %v9918_v41 }
0x1286   : > { %4438 = vmatprep.subr.bf16.mxu0 %v9923_v47 }
0x1289   : > { %4439 = vmatpush1.bf16.msra.mxu0 %v9921_v8 }
0x1316   : > { %v2822_v42 = vpop.f32.mrb[16].mxu1 }
0x1317   : > { %v9576_v56 = vpop.f32.mrb[17].mxu1 }
0x131a   : > { %v3015_v43 = vpop.f32.mrb[18].mxu1 }
0x131b   : > { %v9586_v13 = vpop.f32.mrb[19].mxu1 }
0x131e   : > { %v3182_v45 = vpop.f32.mrb[20].mxu1 }
0x131f   : > { %v9711_v5 = vpack.i.bf16 %v3182_v45, %v10843_v58  ;;  %v9596_v46 = vpop.f32.mrb[21].mxu1  ;;  %v9926_v58 = vld [vmem:[%s10561_s28 + $0xd4] ss:$8 sps:$4 sm:$0xff]  }
0x1320   : > { %4440 = vmatprep.subr.bf16.mxu0 %v9926_v58  ;;  %v4242_v46 = vld [vmem:[%s11951_s30] sm:$0x3] }
0x1321   : > { %9712 = vrot.lane.b32.xlu0 %v9711_v5, %s10436_s24  ;;  %4441 = vmatpush1.bf16.msra.mxu0 %v9924_v57  ;;  %v4251_v47 = vrot.slane %v4242_v46, %v10748_v53 }
0x1322   : > { %v3348_v49 = vpop.f32.mrb[22].mxu1  ;;  %4442 = vmatprep.subr.bf16.mxu0 %v9929_v60  ;;  %v10390_v60 = vld [vmem:[#allocation2 + $0x8] sm:$0xff] }
0x1323   : > { %v9716_v61 = vpack.i.bf16 %v3348_v49, %v10864_v7  ;;  %v9606_v52 = vpop.f32.mrb[23].mxu1 }
0x1325   : > { %9717 = vrot.lane.b32.xlu0 %v9716_v61, %s10435_s16  ;;  %4443 = vmatpush1.bf16.msra.mxu0 %v9927_v0 }
0x1326   : > { %v3514_v17 = vpop.f32.mrb[24].mxu1  ;;  %4444 = vmatprep.subr.bf16.mxu0 %v9932_v6  ;;  %v10392_v6 = vld [vmem:[#allocation2 + $0x18] sm:$0xff] }
0x1327   : > { %v9736_v54 = vpack.i.bf16 %v3514_v17, %v10897_v2  ;;  %v9616_v55 = vpop.f32.mrb[25].mxu1  ;;  %v10389_v17 = vld [vmem:[#allocation2] sm:$0xff] }
0x1329   : > { %9737 = vrot.lane.b32.xlu0 %v9736_v54, %s10434_s2  ;;  %4445 = vmatpush1.bf16.msra.mxu0 %v9930_v1 }
0x132a   : > { %v3675_v63 = vpop.f32.mrb[26].mxu1 }
0x132b   : > { %v9626_v7 = vpop.f32.mrb[27].mxu1 }
0x132c   : > { %v10391_v7 = vld [vmem:[#allocation2 + $0x10] sm:$0xff] }
0x132e   : > { %v3842_v11 = vpop.f32.mrb[28].mxu1 }
0x132f   : > { %v9721_v19 = vpack.i.bf16 %v3842_v11, %v10932_v27  ;;  %v9636_v4 = vpop.f32.mrb[29].mxu1 }
0x1331   : > { %9722 = vrot.lane.b32.xlu1 %v9721_v19, %s10436_s24 }
0x1332   : > { %v4008_v2 = vpop.f32.mrb[30].mxu1 }
0x1333   : > { %v9726_v16 = vpack.i.bf16 %v4008_v2, %v11015_v12  ;;  %v9646_v18 = vpop.f32.mrb[31].mxu1  ;;  %v4528_v2 = vld [vmem:[%s10578_s1] sm:$0xff] }
0x1334   : > { %v4532_v18 = vld [vmem:[%s10578_s1 + $0x20] sm:$0xff] }
0x1335   : > { %9727 = vrot.lane.b32.xlu1 %v9726_v16, %s10435_s16  ;;  %v4536_v16 = vld [vmem:[%s10578_s1 + $0x40] sm:$0xff]  ;;  %s11954_s16 = sld [smem:[#allocation7_spill]] }
0x1336   : > { %v4174_v20 = vpop.f32.mrb[32].mxu1 }
0x1337   : > { %v9731_v21 = vpack.i.bf16 %v4174_v20, %v2822_v42  ;;  %v9656_v22 = vpop.f32.mrb[33].mxu1  ;;  %v8912_v20 = vcombine.low %v4528_v2, %v4536_v16 }
0x1338   : > { %v4540_v22 = vld [vmem:[%s10578_s1 + $0x60] sm:$0xff] }
0x1339   : > { %9732 = vrot.lane.b32.xlu1 %v9731_v21, %s10434_s2  ;;  %v8913_v21 = vcombine.high %v4528_v2, %v4536_v16  ;;  %v4648_v2 = vld [vmem:[%s10578_s1 + $0x3c0] sm:$0xff] }
0x133a   : > { %v4644_v16 = vld [vmem:[%s10578_s1 + $0x3a0] sm:$0xff] }
0x133b   : > { %6148 = vmatprep.subr.bf16.mxu0 %v8913_v21  ;;  %p9693_p5 = scmp.eq.s32.totalorder %s11954_s16, 1 }
0x1393   : > { %v9713_v23 = vpop.permute.xlu0 %9712 }
0x1394   : > { %v9715_v26 = vunpack.i.h.bf16 %v9713_v23  ;;  %v9714_v24 = vunpack.i.l.bf16 %v9713_v23  ;;  %v4544_v23 = vld [vmem:[%s10578_s1 + $0x80] sm:$0xff] }
0x1396   : > { %v4202_v30 = vsel %vm1504_vm1, %v3015_v43, %v9715_v26  ;;  %v2850_v12 = vsel %vm1504_vm1, %v10819_v34, %v9714_v24  ;;  %v8920_v26 = vcombine.low %v4532_v18, %v4540_v22  ;;  %v8921_v24 = vcombine.high %v4532_v18, %v4540_v22  ;;  %v4652_v18 = vld [vmem:[%s10578_s1 + $0x3e0] sm:$0xff] }
0x1397   : > { %v9718_v25 = vpop.permute.xlu0 %9717 }
0x1398   : > { %v9720_v27 = vunpack.i.h.bf16 %v9718_v25  ;;  %v9719_v48 = vunpack.i.l.bf16 %v9718_v25  ;;  %v4552_v25 = vld [vmem:[%s10578_s1 + $0xc0] sm:$0xff]  ;;  %6320 = vmatprep.subr.bf16.mxu1 %v8921_v24 }
0x1399   : > { %6321 = vmatpush1.bf16.msra.mxu1 %v8920_v26  ;;  %v4664_v26 = vld [vmem:[%s10578_s1 + $0x440] sm:$0xff] }
0x139a   : > { %v4203_v33 = vsel %vm2851_vm3, %v4202_v30, %v9720_v27  ;;  %v2852_v35 = vsel %vm2851_vm3, %v2850_v12, %v9719_v48  ;;  %v8929_v27 = vcombine.high %v4544_v23, %v4552_v25  ;;  %v4548_v48 = vld [vmem:[%s10578_s1 + $0xa0] sm:$0xff] }
0x139b   : > { %v9738_v28 = vpop.permute.xlu0 %9737  ;;  %v4560_v30 = vld [vmem:[%s10578_s1 + $0x100] sm:$0xff] }
0x139c   : > { %v9740_v31 = vunpack.i.h.bf16 %v9738_v28  ;;  %v9739_v32 = vunpack.i.l.bf16 %v9738_v28  ;;  %v4556_v28 = vld [vmem:[%s10578_s1 + $0xe0] sm:$0xff] }
0x139d   : > { %v8937_v12 = vcombine.high %v4548_v48, %v4556_v28  ;;  %v4660_v24 = vld [vmem:[%s10578_s1 + $0x420] sm:$0xff] }
0x139e   : > { %v4204_v36 = vsel %vm2853_vm4, %v4203_v33, %v9740_v31  ;;  %v2854_v37 = vsel %vm2853_vm4, %v2852_v35, %v9739_v32  ;;  %v4568_v31 = vld [vmem:[%s10578_s1 + $0x140] sm:$0xff]  ;;  %v8928_v35 = vcombine.low %v4544_v23, %v4552_v25  ;;  %v9033_v23 = vcombine.high %v4644_v16, %v4652_v18 }
0x139f   : > { %v4208_v38 = vpack.c.bf16 %v4204_v36, %v2854_v37  ;;  %v4564_v32 = vld [vmem:[%s10578_s1 + $0x120] sm:$0xff]  ;;  %v8936_v36 = vcombine.low %v4548_v48, %v4556_v28  ;;  %v8945_v37 = vcombine.high %v4560_v30, %v4568_v31  ;;  %6322 = vmatprep.subr.bf16.mxu1 %v8937_v12  ;;  %v9032_v28 = vcombine.low %v4644_v16, %v4652_v18 }
0x13a0   : > { %v4572_v33 = vld [vmem:[%s10578_s1 + $0x160] sm:$0xff] }
0x13a1   : > { %6323 = vmatpush1.bf16.msra.mxu1 %v8936_v36  ;;  %v4656_v25 = vld [vmem:[%s10578_s1 + $0x400] sm:$0xff] }
0x13a2   : > { %v9040_v36 = vcombine.low %v4656_v25, %v4664_v26 }
0x13a3   : > { %v9723_v39 = vpop.permute.xlu1 %9722 }
0x13a4   : > { %v9725_v40 = vunpack.i.h.bf16 %v9723_v39  ;;  %v9724_v14 = vunpack.i.l.bf16 %v9723_v39  ;;  %v4576_v39 = vld [vmem:[%s10578_s1 + $0x180] sm:$0xff] }
0x13a6   : > { %v4205_v34 = vsel %vm1504_vm1, %v3675_v63, %v9725_v40  ;;  %v2855_v3 = vsel %vm1504_vm1, %v10913_v62, %v9724_v14  ;;  %v4247_v62 = vrot.slane %v4242_v46, %v10740_v51  ;;  %v4580_v40 = vld [vmem:[%s10578_s1 + $0x1a0] sm:$0xff] }
0x13a7   : > { %v9728_v59 = vpop.permute.xlu1 %9727  ;;  %v4588_v14 = vld [vmem:[%s10578_s1 + $0x1e0] sm:$0xff] }
0x13a8   : > { %v9730_v42 = vunpack.i.h.bf16 %v9728_v59  ;;  %v9729_v29 = vunpack.i.l.bf16 %v9728_v59  ;;  %v4584_v59 = vld [vmem:[%s10578_s1 + $0x1c0] sm:$0xff] }
0x13a9   : > { %v4608_v46 = vld [vmem:[%s10578_s1 + $0x280] sm:$0xff] }
0x13aa   : > { %v2856_v13 = vsel %vm2851_vm3, %v2855_v3, %v9729_v29  ;;  %v4206_v15 = vsel %vm2851_vm3, %v4205_v34, %v9730_v42  ;;  %v8944_v42 = vcombine.low %v4560_v30, %v4568_v31  ;;  %v8952_v29 = vcombine.low %v4564_v32, %v4572_v33  ;;  %v4592_v3 = vld [vmem:[%s10578_s1 + $0x200] sm:$0xff] }
0x13ab   : > { %v9733_v56 = vpop.permute.xlu1 %9732  ;;  %v8969_v34 = vcombine.high %v4580_v40, %v4588_v14  ;;  %v9041_v30 = vcombine.high %v4656_v25, %v4664_v26  ;;  %v4672_v31 = vld [vmem:[%s10578_s1 + $0x480] sm:$0xff] }
0x13ac   : > { %v9735_v43 = vunpack.i.h.bf16 %v9733_v56  ;;  %v9734_v44 = vunpack.i.l.bf16 %v9733_v56  ;;  %v8961_v56 = vcombine.high %v4576_v39, %v4584_v59  ;;  %v4748_v26 = vld [vmem:[%s10578_s1 + $0x6e0] sm:$0xff] }
0x13ae   : > { %v2857_v45 = vsel %vm2853_vm4, %v2856_v13, %v9734_v44  ;;  %v4207_v41 = vsel %vm2853_vm4, %v4206_v15, %v9735_v43  ;;  %v4600_v43 = vld [vmem:[%s10578_s1 + $0x240] sm:$0xff]  ;;  %v8960_v15 = vcombine.low %v4576_v39, %v4584_v59 }
0x13af   : > { %v4209_v5 = vpack.c.bf16 %v4207_v41, %v2857_v45  ;;  %v4596_v44 = vld [vmem:[%s10578_s1 + $0x220] sm:$0xff]  ;;  %v8968_v45 = vcombine.low %v4580_v40, %v4588_v14  ;;  %v8977_v41 = vcombine.high %v4592_v3, %v4600_v43 }
0x13b0   : > { %v4604_v13 = vld [vmem:[%s10578_s1 + $0x260] sm:$0xff] }
0x13b1   : > { %4446 = vmatprep.mubr.bf16.mxu0 %v4209_v5  ;;  %v8985_v5 = vcombine.high %v4596_v44, %v4604_v13 }
0x13b2   : > { %4447 = vmatmul.mubr.bf16.vlgmr.msra.gmra.mrb[44].mxu0 %v4208_v38  ;;  %v8953_v38 = vcombine.high %v4564_v32, %v4572_v33  ;;  %v4680_v32 = vld [vmem:[%s10578_s1 + $0x4c0] sm:$0xff] }
0x13b3   : > { %6149 = vmatpush1.bf16.msra.mxu0 %v8912_v20  ;;  %v4676_v33 = vld [vmem:[%s10578_s1 + $0x4a0] sm:$0xff]  ;;  %v9056_v59 = vcombine.low %v4672_v31, %v4680_v32 }
0x13b4   : > { %6150 = vmatprep.subr.bf16.mxu0 %v8929_v27  ;;  %6324 = vmatprep.subr.bf16.mxu1 %v8953_v38  ;;  %v4668_v27 = vld [vmem:[%s10578_s1 + $0x460] sm:$0xff]  ;;  %v9057_v38 = vcombine.high %v4672_v31, %v4680_v32 }
0x13b5   : > { %6325 = vmatpush1.bf16.msra.mxu1 %v8952_v29  ;;  %v9049_v12 = vcombine.high %v4660_v24, %v4668_v27  ;;  %v4764_v32 = vld [vmem:[%s10578_s1 + $0x760] sm:$0xff] }
0x13b6   : > { %6326 = vmatprep.subr.bf16.mxu1 %v8969_v34 }
0x13b7   : > { %6151 = vmatpush1.bf16.msra.mxu0 %v8928_v35  ;;  %v4684_v35 = vld [vmem:[%s10578_s1 + $0x4e0] sm:$0xff] }
0x13b8   : > { %6152 = vmatprep.subr.bf16.mxu0 %v8945_v37  ;;  %v9048_v37 = vcombine.low %v4660_v24, %v4668_v27  ;;  %v9065_v39 = vcombine.high %v4676_v33, %v4684_v35  ;;  %v9064_v40 = vcombine.low %v4676_v33, %v4684_v35 }
0x13b9   : > { %6327 = vmatpush1.bf16.msra.mxu1 %v8968_v45 }
0x13ba   : > { %6328 = vmatprep.subr.bf16.mxu1 %v8985_v5  ;;  %v4692_v5 = vld [vmem:[%s10578_s1 + $0x520] sm:$0xff] }
0x13bb   : > { %6153 = vmatpush1.bf16.msra.mxu0 %v8944_v42 }
0x13bc   : > { %6154 = vmatprep.subr.bf16.mxu0 %v8961_v56 }
0x13bf   : > { %6155 = vmatpush1.bf16.msra.mxu0 %v8960_v15 }
0x13c0   : > { %6156 = vmatprep.subr.bf16.mxu0 %v8977_v41  ;;  %v4696_v41 = vld [vmem:[%s10578_s1 + $0x540] sm:$0xff] }
0x1485   : > { %v4448_v8 = vpop.f32.mrb[44].mxu0 }
0x1486   : > { %v4449_v49 = vadd.f32 %v4448_v8, %v4247_v62  ;;  %v4450_v61 = vpop.f32.mrb[45].mxu0  ;;  %v4620_v8 = vld [vmem:[%s10578_s1 + $0x2e0] sm:$0xff] }
0x1487   : > { %v4451_v52 = vadd.f32 %v4450_v61, %v4251_v47  ;;  %v4452_v58 = vpop.f32.mrb[46].mxu0  ;;  %v8984_v61 = vcombine.low %v4596_v44, %v4604_v13 }
0x1488   : > { %v11179_v57 = vadd.f32 %v10389_v17, %v4449_v49  ;;  %v4453_v54 = vadd.f32 %v4452_v58, %v4247_v62  ;;  %v4454_v55 = vpop.f32.mrb[47].mxu0  ;;  %v4616_v62 = vld [vmem:[%s10578_s1 + $0x2c0] sm:$0xff]  ;;  %v8976_v49 = vcombine.low %v4592_v3, %v4600_v43 }
0x1489   : > { %v11181_v63 = vadd.f32 %v10390_v60, %v4451_v52  ;;  %v4455_v0 = vadd.f32 %v4454_v55, %v4251_v47  ;;  %v4612_v47 = vld [vmem:[%s10578_s1 + $0x2a0] sm:$0xff]  ;;  %v8993_v52 = vcombine.high %v4608_v46, %v4616_v62  ;;  %6329 = vmatpush1.bf16.msra.mxu1 %v8984_v61 }
0x148a   : > { %v11183_v1 = vadd.f32 %v10391_v7, %v4453_v54  ;;  %v9001_v58 = vcombine.high %v4612_v47, %v4620_v8  ;;  %v4624_v17 = vld [vmem:[%s10578_s1 + $0x300] sm:$0xff]  ;;  %6157 = vmatpush1.bf16.msra.mxu0 %v8976_v49  ;;  %v9000_v7 = vcombine.low %v4612_v47, %v4620_v8 }
0x148b   : > { %v11185_v11 = vadd.f32 %v10392_v6, %v4455_v0  ;;  %v4463_v19 = vadd.f32 %v11181_v63, %v11179_v57  ;;  %v4632_v54 = vld [vmem:[%s10578_s1 + $0x340] sm:$0xff]  ;;  %v8992_v0 = vcombine.low %v4608_v46, %v4616_v62  ;;  %6158 = vmatprep.subr.bf16.mxu0 %v8993_v52 }
0x148c   : > { %v4628_v55 = vld [vmem:[%s10578_s1 + $0x320] sm:$0xff]  ;;  %v9009_v6 = vcombine.high %v4624_v17, %v4632_v54  ;;  %6330 = vmatprep.subr.bf16.mxu1 %v9001_v58  ;;  %v9008_v20 = vcombine.low %v4624_v17, %v4632_v54 }
0x148d   : > { %4464 = vadd.xlane.f32.xlu1 %v4463_v19  ;;  %v4466_v4 = vadd.f32 %v11185_v11, %v11183_v1  ;;  %v4636_v60 = vld [vmem:[%s10578_s1 + $0x360] sm:$0xff]  ;;  %6331 = vmatpush1.bf16.msra.mxu1 %v9000_v7 }
0x148e   : > { %v9017_v19 = vcombine.high %v4628_v55, %v4636_v60  ;;  %6159 = vmatpush1.bf16.msra.mxu0 %v8992_v0  ;;  %v9016_v21 = vcombine.low %v4628_v55, %v4636_v60  ;;  %v4700_v62 = vld [vmem:[%s10578_s1 + $0x560] sm:$0xff] }
0x148f   : > { %4467 = vadd.xlane.f32.xlu0 %v4466_v4  ;;  %v4640_v4 = vld [vmem:[%s10578_s1 + $0x380] sm:$0xff]  ;;  %6160 = vmatprep.subr.bf16.mxu0 %v9009_v6  ;;  %v9080_v8 = vcombine.low %v4692_v5, %v4700_v62  ;;  %v9081_v49 = vcombine.high %v4692_v5, %v4700_v62 }
0x1490   : > { %v9025_v22 = vcombine.high %v4640_v4, %v4648_v2  ;;  %6332 = vmatprep.subr.bf16.mxu1 %v9017_v19  ;;  %v9024_v48 = vcombine.low %v4640_v4, %v4648_v2  ;;  %v4704_v61 = vld [vmem:[%s10578_s1 + $0x580] sm:$0xff] }
0x1491   : > { %6333 = vmatpush1.bf16.msra.mxu1 %v9016_v21  ;;  %v4712_v52 = vld [vmem:[%s10578_s1 + $0x5c0] sm:$0xff] }
0x1492   : > { %6161 = vmatpush1.bf16.msra.mxu0 %v9008_v20  ;;  %6334 = vmatprep.subr.bf16.mxu1 %v9033_v23  ;;  %v4708_v58 = vld [vmem:[%s10578_s1 + $0x5a0] sm:$0xff]  ;;  %v9089_v17 = vcombine.high %v4704_v61, %v4712_v52  ;;  %v9088_v55 = vcombine.low %v4704_v61, %v4712_v52 }
0x1493   : > { %6162 = vmatprep.subr.bf16.mxu0 %v9025_v22  ;;  %v4716_v54 = vld [vmem:[%s10578_s1 + $0x5e0] sm:$0xff] }
0x1494   : > { %v9096_v60 = vcombine.low %v4708_v58, %v4716_v54  ;;  %v9097_v0 = vcombine.high %v4708_v58, %v4716_v54  ;;  %v4720_v7 = vld [vmem:[%s10578_s1 + $0x600] sm:$0xff] }
0x1495   : > { %6335 = vmatpush1.bf16.msra.mxu1 %v9032_v28  ;;  %v4728_v6 = vld [vmem:[%s10578_s1 + $0x640] sm:$0xff] }
0x1496   : > { %6163 = vmatpush1.bf16.msra.mxu0 %v9024_v48  ;;  %6336 = vmatprep.subr.bf16.mxu1 %v9049_v12  ;;  %v4724_v19 = vld [vmem:[%s10578_s1 + $0x620] sm:$0xff]  ;;  %v9105_v4 = vcombine.high %v4720_v7, %v4728_v6  ;;  %v9104_v16 = vcombine.low %v4720_v7, %v4728_v6 }
0x1497   : > { %6164 = vmatprep.subr.bf16.mxu0 %v9041_v30  ;;  %v4732_v2 = vld [vmem:[%s10578_s1 + $0x660] sm:$0xff] }
0x1498   : > { %v9112_v18 = vcombine.low %v4724_v19, %v4732_v2  ;;  %v9113_v20 = vcombine.high %v4724_v19, %v4732_v2  ;;  %v4736_v21 = vld [vmem:[%s10578_s1 + $0x680] sm:$0xff] }
0x1499   : > { %6337 = vmatpush1.bf16.msra.mxu1 %v9048_v37  ;;  %v4744_v22 = vld [vmem:[%s10578_s1 + $0x6c0] sm:$0xff] }
0x149a   : > { %6165 = vmatpush1.bf16.msra.mxu0 %v9040_v36  ;;  %6338 = vmatprep.subr.bf16.mxu1 %v9065_v39  ;;  %v4740_v23 = vld [vmem:[%s10578_s1 + $0x6a0] sm:$0xff]  ;;  %v9121_v25 = vcombine.high %v4736_v21, %v4744_v22  ;;  %v9120_v24 = vcombine.low %v4736_v21, %v4744_v22  ;;  %v4545_v22 = vld [vmem:[%s10578_s1 + $0x88] sm:$0xff] }
0x149b   : > { %6166 = vmatprep.subr.bf16.mxu0 %v9057_v38  ;;  %v9128_v27 = vcombine.low %v4740_v23, %v4748_v26  ;;  %v9129_v48 = vcombine.high %v4740_v23, %v4748_v26  ;;  %v4752_v28 = vld [vmem:[%s10578_s1 + $0x700] sm:$0xff]  ;;  %v4553_v23 = vld [vmem:[%s10578_s1 + $0xc8] sm:$0xff]  ;;  %v4558_v26 = vld [vmem:[%s10578_s1 + $0xf0] sm:$0xff] }
0x149c   : > { %v4760_v30 = vld [vmem:[%s10578_s1 + $0x740] sm:$0xff] }
0x149d   : > { %6339 = vmatpush1.bf16.msra.mxu1 %v9064_v40  ;;  %v4756_v12 = vld [vmem:[%s10578_s1 + $0x720] sm:$0xff]  ;;  %v9137_v31 = vcombine.high %v4752_v28, %v4760_v30  ;;  %v9136_v33 = vcombine.low %v4752_v28, %v4760_v30  ;;  %v4569_v28 = vld [vmem:[%s10578_s1 + $0x148] sm:$0xff]  ;;  %v4566_v30 = vld [vmem:[%s10578_s1 + $0x130] sm:$0xff] }
0x149e   : > { %6167 = vmatpush1.bf16.msra.mxu0 %v9056_v59  ;;  %6340 = vmatprep.subr.bf16.mxu1 %v9081_v49  ;;  %v9144_v35 = vcombine.low %v4756_v12, %v4764_v32  ;;  %v9145_v36 = vcombine.high %v4756_v12, %v4764_v32  ;;  %v4768_v37 = vld [vmem:[%s10578_s1 + $0x780] sm:$0xff]  ;;  %v4574_v12 = vld [vmem:[%s10578_s1 + $0x170] sm:$0xff] }
0x149f   : > { %v4776_v38 = vld [vmem:[%s10578_s1 + $0x7c0] sm:$0xff] }
0x14a0   : > { %v4772_v39 = vld [vmem:[%s10578_s1 + $0x7a0] sm:$0xff]  ;;  %v9153_v59 = vcombine.high %v4768_v37, %v4776_v38 }
0x14a1   : > { %6341 = vmatpush1.bf16.msra.mxu1 %v9080_v8  ;;  %v4780_v40 = vld [vmem:[%s10578_s1 + $0x7e0] sm:$0xff] }
0x14a2   : > { %6342 = vmatprep.subr.bf16.mxu1 %v9097_v0  ;;  %v4461_v49 = vld [vmem:[%s11952_s4] sm:$0x3] }
0x14a3   : > { %v4462_v61 = vld [vmem:[%s11953_s23] sm:$0x3]  ;;  %v4500_v52 = vrot.slane %v4461_v49, %v10740_v51  ;;  %v4504_v58 = vrot.slane %v4461_v49, %v10748_v53 }
0x14a4   : > { %v4515_v0 = vrot.slane %v4462_v61, %v10740_v51  ;;  %v4519_v7 = vrot.slane %v4462_v61, %v10748_v53  ;;  %v4625_v61 = vld [vmem:[%s10578_s1 + $0x308] sm:$0xff] }
0x14a5   : > { %6343 = vmatpush1.bf16.msra.mxu1 %v9096_v60 }
0x14a6   : > { %6344 = vmatprep.subr.bf16.mxu1 %v9113_v20 }
0x14a9   : > { %6345 = vmatpush1.bf16.msra.mxu1 %v9112_v18 }
0x14aa   : > { %6346 = vmatprep.subr.bf16.mxu1 %v9129_v48 }
0x14ad   : > { %6347 = vmatpush1.bf16.msra.mxu1 %v9128_v27  ;;  %v8931_v27 = vcombine.high %v4545_v22, %v4553_v23 }
0x14ae   : > { %6348 = vmatprep.subr.bf16.mxu1 %v9145_v36  ;;  %v4577_v36 = vld [vmem:[%s10578_s1 + $0x188] sm:$0xff] }
0x14b1   : > { %6349 = vmatpush1.bf16.msra.mxu1 %v9144_v35  ;;  %v8957_v35 = vcombine.high %v4566_v30, %v4574_v12 }
0x151a   : > { %v4465_v14 = vpop.xlane.xlu1 %4464 }
0x151b   : > { %v4470_v42 = vmul.f32 0.00390625, %v4465_v14  ;;  %v9152_v14 = vcombine.low %v4768_v37, %v4776_v38  ;;  %v4585_v37 = vld [vmem:[%s10578_s1 + $0x1c8] sm:$0xff]  ;;  %v4582_v38 = vld [vmem:[%s10578_s1 + $0x1b0] sm:$0xff] }
0x151c   : > { %v4468_v29 = vpop.xlane.xlu0 %4467 }
0x151d   : > { %v11232_v56 = vsub.f32 %v11179_v57, %v4470_v42  ;;  %v11235_v34 = vsub.f32 %v11181_v63, %v4470_v42  ;;  %v4471_v3 = vmul.f32 0.00390625, %v4468_v29  ;;  %v9160_v42 = vcombine.low %v4772_v39, %v4780_v40 }
0x151e   : > { %v9161_v29 = vcombine.high %v4772_v39, %v4780_v40  ;;  %v4590_v39 = vld [vmem:[%s10578_s1 + $0x1f0] sm:$0xff]  ;;  %v8956_v40 = vcombine.low %v4566_v30, %v4574_v12  ;;  %v4673_v12 = vld [vmem:[%s10578_s1 + $0x488] sm:$0xff] }
0x151f   : > { %v11238_v43 = vsub.f32 %v11183_v1, %v4471_v3  ;;  %v11241_v44 = vsub.f32 %v11185_v11, %v4471_v3  ;;  %v4476_v13 = vmul.f32 %v11232_v56, %v11232_v56  ;;  %v4477_v15 = vmul.f32 %v11235_v34, %v11235_v34  ;;  %v4688_v11 = vld [vmem:[%s10578_s1 + $0x500] sm:$0xff]  ;;  %v4529_v3 = vld [vmem:[%s10578_s1 + $0x8] sm:$0xff] }
0x1520   : > { %v9073_v46 = vcombine.high %v4688_v11, %v4696_v41  ;;  %v9072_v47 = vcombine.low %v4688_v11, %v4696_v41  ;;  %6350 = vmatprep.subr.bf16.mxu1 %v9161_v29  ;;  %v4593_v29 = vld [vmem:[%s10578_s1 + $0x208] sm:$0xff] }
0x1521   : > { %v4480_v45 = vadd.f32 %v4477_v15, %v4476_v13  ;;  %v4478_v57 = vmul.f32 %v11238_v43, %v11238_v43  ;;  %v4479_v63 = vmul.f32 %v11241_v44, %v11241_v44  ;;  %v4537_v13 = vld [vmem:[%s10578_s1 + $0x48] sm:$0xff]  ;;  %v4534_v15 = vld [vmem:[%s10578_s1 + $0x30] sm:$0xff]  ;;  %6351 = vmatpush1.bf16.msra.mxu1 %v9160_v42  ;;  %v8973_v42 = vcombine.high %v4582_v38, %v4590_v39 }
0x1522   : > { %6168 = vmatprep.subr.bf16.mxu0 %v9073_v46 }
0x1523   : > { %4481 = vadd.xlane.f32.xlu0 %v4480_v45  ;;  %v4483_v1 = vadd.f32 %v4479_v63, %v4478_v57  ;;  %6169 = vmatpush1.bf16.msra.mxu0 %v9072_v47  ;;  %v8915_v45 = vcombine.high %v4529_v3, %v4537_v13  ;;  %v4542_v57 = vld [vmem:[%s10578_s1 + $0x70] sm:$0xff]  ;;  %v8914_v63 = vcombine.low %v4529_v3, %v4537_v13  ;;  %v4601_v3 = vld [vmem:[%s10578_s1 + $0x248] sm:$0xff] }
0x1524   : > { %6170 = vmatprep.subr.bf16.mxu0 %v9089_v17  ;;  %v8925_v11 = vcombine.high %v4534_v15, %v4542_v57  ;;  %v4598_v13 = vld [vmem:[%s10578_s1 + $0x230] sm:$0xff] }
0x1525   : > { %4484 = vadd.xlane.f32.xlu1 %v4483_v1  ;;  %v8924_v1 = vcombine.low %v4534_v15, %v4542_v57  ;;  %v4606_v15 = vld [vmem:[%s10578_s1 + $0x270] sm:$0xff]  ;;  %v8972_v57 = vcombine.low %v4582_v38, %v4590_v39  ;;  %v4689_v39 = vld [vmem:[%s10578_s1 + $0x508] sm:$0xff] }
0x1526   : > { %6406 = vmatprep.subr.bf16.mxu1 %v8925_v11  ;;  %v4609_v11 = vld [vmem:[%s10578_s1 + $0x288] sm:$0xff] }
0x1527   : > { %6171 = vmatpush1.bf16.msra.mxu0 %v9088_v55 }
0x1528   : > { %6172 = vmatprep.subr.bf16.mxu0 %v9105_v4 }
0x152b   : > { %6173 = vmatpush1.bf16.msra.mxu0 %v9104_v16 }
0x152c   : > { %6174 = vmatprep.subr.bf16.mxu0 %v9121_v25  ;;  %v4550_v25 = vld [vmem:[%s10578_s1 + $0xb0] sm:$0xff] }
0x152d   : > { %v8941_v48 = vcombine.high %v4550_v25, %v4558_v26  ;;  %v8940_v32 = vcombine.low %v4550_v25, %v4558_v26  ;;  %v4665_v25 = vld [vmem:[%s10578_s1 + $0x448] sm:$0xff]  ;;  %v4662_v26 = vld [vmem:[%s10578_s1 + $0x430] sm:$0xff] }
0x152f   : > { %6175 = vmatpush1.bf16.msra.mxu0 %v9120_v24  ;;  %v4561_v24 = vld [vmem:[%s10578_s1 + $0x108] sm:$0xff] }
0x1530   : > { %6176 = vmatprep.subr.bf16.mxu0 %v9137_v31  ;;  %v8930_v31 = vcombine.low %v4545_v22, %v4553_v23  ;;  %v4657_v23 = vld [vmem:[%s10578_s1 + $0x408] sm:$0xff] }
0x1533   : > { %6177 = vmatpush1.bf16.msra.mxu0 %v9136_v33  ;;  %v8947_v33 = vcombine.high %v4561_v24, %v4569_v28 }
0x1534   : > { %6178 = vmatprep.subr.bf16.mxu0 %v9153_v59  ;;  %v8946_v59 = vcombine.low %v4561_v24, %v4569_v28  ;;  %v4670_v24 = vld [vmem:[%s10578_s1 + $0x470] sm:$0xff]  ;;  %v9043_v28 = vcombine.high %v4657_v23, %v4665_v25 }
0x1535   : > { %v9053_v30 = vcombine.high %v4662_v26, %v4670_v24 }
0x1537   : > { %6179 = vmatpush1.bf16.msra.mxu0 %v9152_v14  ;;  %v8963_v14 = vcombine.high %v4577_v36, %v4585_v37 }
0x1538   : > { %6191 = vmatprep.subr.bf16.mxu0 %v8915_v45  ;;  %v8962_v45 = vcombine.low %v4577_v36, %v4585_v37  ;;  %v9052_v36 = vcombine.low %v4662_v26, %v4670_v24  ;;  %v4769_v24 = vld [vmem:[%s10578_s1 + $0x788] sm:$0xff] }
0x15b0   : > { %v4482_v41 = vpop.xlane.xlu0 %4481 }
0x15b1   : > { %v4486_v5 = vmul.f32 0.00390625, %v4482_v41  ;;  %v4617_v41 = vld [vmem:[%s10578_s1 + $0x2c8] sm:$0xff] }
0x15b2   : > { %v4485_v46 = vpop.xlane.xlu1 %4484 }
0x15b3   : > { %v4488_v62 = vadd.f32 1e-05, %v4486_v5  ;;  %v4487_v47 = vmul.f32 0.00390625, %v4485_v46  ;;  %v4614_v5 = vld [vmem:[%s10578_s1 + $0x2b0] sm:$0xff] }
0x15b4   : > { %v4622_v46 = vld [vmem:[%s10578_s1 + $0x2f0] sm:$0xff] }
0x15b5   : > { %10381 = vrsqrt.f32 %v4488_v62  ;;  %v4489_v8 = vadd.f32 1e-05, %v4487_v47  ;;  %v8978_v62 = vcombine.low %v4593_v29, %v4601_v3  ;;  %v8988_v47 = vcombine.low %v4598_v13, %v4606_v15 }
0x15b6   : > { %v9005_v49 = vcombine.high %v4614_v5, %v4622_v46 }
0x15b7   : > { %10383 = vrsqrt.f32 %v4489_v8  ;;  %v8995_v8 = vcombine.high %v4609_v11, %v4617_v41 }
0x15bf   : > { %v10382_v17 = vpop.eup %10381 }
0x15c0   : > { %v4492_v54 = vmul.f32 %v10382_v17, %v11232_v56  ;;  %v4493_v55 = vmul.f32 %v10382_v17, %v11235_v34  ;;  %v4638_v17 = vld [vmem:[%s10578_s1 + $0x370] sm:$0xff] }
0x15c1   : > { %v10384_v60 = vpop.eup %10383 }
0x15c2   : > { %v4507_v6 = vmul.f32 %v4500_v52, %v4492_v54  ;;  %v4508_v19 = vmul.f32 %v4504_v58, %v4493_v55  ;;  %v4494_v4 = vmul.f32 %v10384_v60, %v11238_v43  ;;  %v4495_v2 = vmul.f32 %v10384_v60, %v11241_v44 }
0x15c3   : > { %v8994_v54 = vcombine.low %v4609_v11, %v4617_v41  ;;  %v9004_v55 = vcombine.low %v4614_v5, %v4622_v46  ;;  %v4721_v46 = vld [vmem:[%s10578_s1 + $0x608] sm:$0xff] }
0x15c4   : > { %v4509_v16 = vmul.f32 %v4500_v52, %v4494_v4  ;;  %v4510_v18 = vmul.f32 %v4504_v58, %v4495_v2  ;;  %v11297_v56 = vadd.f32 %v4515_v0, %v4507_v6  ;;  %v11299_v34 = vadd.f32 %v4519_v7, %v4508_v19  ;;  %v4633_v52 = vld [vmem:[%s10578_s1 + $0x348] sm:$0xff]  ;;  %v4630_v58 = vld [vmem:[%s10578_s1 + $0x330] sm:$0xff] }
0x15c5   : > { %v9011_v60 = vcombine.high %v4625_v61, %v4633_v52  ;;  %v4649_v6 = vld [vmem:[%s10578_s1 + $0x3c8] sm:$0xff]  ;;  %v4646_v19 = vld [vmem:[%s10578_s1 + $0x3b0] sm:$0xff]  ;;  %v9010_v2 = vcombine.low %v4625_v61, %v4633_v52 }
0x15c6   : > { %v11301_v20 = vadd.f32 %v4515_v0, %v4509_v16  ;;  %v11303_v21 = vadd.f32 %v4519_v7, %v4510_v18  ;;  %v9021_v0 = vcombine.high %v4630_v58, %v4638_v17  ;;  %v4641_v7 = vld [vmem:[%s10578_s1 + $0x388] sm:$0xff]  ;;  %v4654_v4 = vld [vmem:[%s10578_s1 + $0x3f0] sm:$0xff]  ;;  %v9020_v16 = vcombine.low %v4630_v58, %v4638_v17 }
0x15c7   : > { %v9027_v18 = vcombine.high %v4641_v7, %v4649_v6  ;;  %v9037_v22 = vcombine.high %v4646_v19, %v4654_v4  ;;  %v4737_v17 = vld [vmem:[%s10578_s1 + $0x688] sm:$0xff] }
0x15c8   : > { %v11311_v43 = vpack.c.bf16 %v11301_v20, %v11297_v56  ;;  %v11315_v44 = vpack.c.bf16 %v11303_v21, %v11299_v34 }
0x15ca   : > { %6180 = vmatprep.mubr.bf16.mxu0 %v11315_v44  ;;  %6352 = vmatprep.mubr.bf16.mxu1 %v11315_v44 }
0x15cb   : > { %6181 = vmatmul.mubr.bf16.vlgmr.msra.gmra.mrb[48].mxu0 %v11311_v43  ;;  %6353 = vmatmul.mubr.bf16.vlgmr.msra.gmra.mrb[36].mxu1 %v11311_v43 }
0x15cc   : > { %6192 = vmatpush1.bf16.msra.mxu0 %v8914_v63  ;;  %6407 = vmatpush1.bf16.msra.mxu1 %v8924_v1  ;;  %v8979_v63 = vcombine.high %v4593_v29, %v4601_v3  ;;  %v8989_v1 = vcombine.high %v4598_v13, %v4606_v15  ;;  %v4705_v15 = vld [vmem:[%s10578_s1 + $0x588] sm:$0xff] }
0x15cd   : > { %6223 = vmatprep.mubr.bf16.mxu0 %v11315_v44  ;;  %6438 = vmatprep.mubr.bf16.mxu1 %v11315_v44 }
0x15ce   : > { %6193 = vmatprep.subr.bf16.mxu0 %v8931_v27  ;;  %6408 = vmatprep.subr.bf16.mxu1 %v8941_v48  ;;  %v9026_v27 = vcombine.low %v4641_v7, %v4649_v6  ;;  %v9036_v48 = vcombine.low %v4646_v19, %v4654_v4  ;;  %v4753_v4 = vld [vmem:[%s10578_s1 + $0x708] sm:$0xff] }
0x15d0   : > { %6194 = vmatpush1.bf16.msra.mxu0 %v8930_v31  ;;  %6409 = vmatpush1.bf16.msra.mxu1 %v8940_v32  ;;  %v4681_v31 = vld [vmem:[%s10578_s1 + $0x4c8] sm:$0xff]  ;;  %v4678_v32 = vld [vmem:[%s10578_s1 + $0x4b0] sm:$0xff] }
0x15d1   : > { %6195 = vmatprep.subr.bf16.mxu0 %v8947_v33  ;;  %6410 = vmatprep.subr.bf16.mxu1 %v8957_v35  ;;  %v4686_v33 = vld [vmem:[%s10578_s1 + $0x4f0] sm:$0xff]  ;;  %v9042_v35 = vcombine.low %v4657_v23, %v4665_v25  ;;  %v9059_v37 = vcombine.high %v4673_v12, %v4681_v31 }
0x15d2   : > { %v9069_v38 = vcombine.high %v4678_v32, %v4686_v33  ;;  %v9068_v29 = vcombine.low %v4678_v32, %v4686_v33  ;;  %v4530_v33 = vld [vmem:[%s10578_s1 + $0x10] sm:$0xff] }
0x15d4   : > { %6196 = vmatpush1.bf16.msra.mxu0 %v8946_v59  ;;  %6411 = vmatpush1.bf16.msra.mxu1 %v8956_v40  ;;  %v4697_v59 = vld [vmem:[%s10578_s1 + $0x548] sm:$0xff]  ;;  %v4694_v40 = vld [vmem:[%s10578_s1 + $0x530] sm:$0xff] }
0x15d5   : > { %6197 = vmatprep.subr.bf16.mxu0 %v8963_v14  ;;  %6412 = vmatprep.subr.bf16.mxu1 %v8973_v42  ;;  %v4702_v14 = vld [vmem:[%s10578_s1 + $0x570] sm:$0xff]  ;;  %v9058_v42 = vcombine.low %v4673_v12, %v4681_v31  ;;  %v9075_v3 = vcombine.high %v4689_v39, %v4697_v59 }
0x15d6   : > { %v9085_v13 = vcombine.high %v4694_v40, %v4702_v14  ;;  %v9084_v11 = vcombine.low %v4694_v40, %v4702_v14  ;;  %v4554_v40 = vld [vmem:[%s10578_s1 + $0xd0] sm:$0xff] }
0x15d8   : > { %6198 = vmatpush1.bf16.msra.mxu0 %v8962_v45  ;;  %6413 = vmatpush1.bf16.msra.mxu1 %v8972_v57  ;;  %v4713_v45 = vld [vmem:[%s10578_s1 + $0x5c8] sm:$0xff]  ;;  %v4710_v57 = vld [vmem:[%s10578_s1 + $0x5b0] sm:$0xff] }
0x15d9   : > { %6199 = vmatprep.subr.bf16.mxu0 %v8979_v63  ;;  %6414 = vmatprep.subr.bf16.mxu1 %v8989_v1  ;;  %v4718_v63 = vld [vmem:[%s10578_s1 + $0x5f0] sm:$0xff]  ;;  %v9074_v1 = vcombine.low %v4689_v39, %v4697_v59  ;;  %v9091_v41 = vcombine.high %v4705_v15, %v4713_v45  ;;  %v9935_v39 = vld [vmem:[%s10588_s3 + $0x4] ss:$8 sps:$4 sm:$0xff]  }
0x15da   : > { %v9101_v5 = vcombine.high %v4710_v57, %v4718_v63  ;;  %v9100_v61 = vcombine.low %v4710_v57, %v4718_v63  ;;  %v4546_v59 = vld [vmem:[%s10578_s1 + $0x90] sm:$0xff] }
0x15db   : > { %v9936_v63 = vld [vmem:[%s10588_s3 + $0x10] ss:$8 sps:$4 sm:$0xff]  }
0x15dc   : > { %6200 = vmatpush1.bf16.msra.mxu0 %v8978_v62  ;;  %6415 = vmatpush1.bf16.msra.mxu1 %v8988_v47  ;;  %v4729_v62 = vld [vmem:[%s10578_s1 + $0x648] sm:$0xff]  ;;  %v4726_v47 = vld [vmem:[%s10578_s1 + $0x630] sm:$0xff] }
0x15dd   : > { %6201 = vmatprep.subr.bf16.mxu0 %v8995_v8  ;;  %6416 = vmatprep.subr.bf16.mxu1 %v9005_v49  ;;  %v4734_v8 = vld [vmem:[%s10578_s1 + $0x670] sm:$0xff]  ;;  %v9090_v49 = vcombine.low %v4705_v15, %v4713_v45  ;;  %v9107_v52 = vcombine.high %v4721_v46, %v4729_v62  ;;  %v8932_v45 = vcombine.low %v4546_v59, %v4554_v40 }
0x15de   : > { %v9117_v58 = vcombine.high %v4726_v47, %v4734_v8  ;;  %v9116_v7 = vcombine.low %v4726_v47, %v4734_v8  ;;  %v9938_v15 = vld [vmem:[%s10588_s3 + $0x14] ss:$8 sps:$4 sm:$0xff]  }
0x15df   : > { %v4594_v47 = vld [vmem:[%s10578_s1 + $0x210] sm:$0xff] }
0x15e0   : > { %6202 = vmatpush1.bf16.msra.mxu0 %v8994_v54  ;;  %6417 = vmatpush1.bf16.msra.mxu1 %v9004_v55  ;;  %v4745_v54 = vld [vmem:[%s10578_s1 + $0x6c8] sm:$0xff]  ;;  %v4742_v55 = vld [vmem:[%s10578_s1 + $0x6b0] sm:$0xff] }
0x15e1   : > { %6203 = vmatprep.subr.bf16.mxu0 %v9011_v60  ;;  %6418 = vmatprep.subr.bf16.mxu1 %v9021_v0  ;;  %v4750_v60 = vld [vmem:[%s10578_s1 + $0x6f0] sm:$0xff]  ;;  %v9106_v0 = vcombine.low %v4721_v46, %v4729_v62  ;;  %v9123_v6 = vcombine.high %v4737_v17, %v4745_v54  ;;  %v9939_v62 = vld [vmem:[%s10588_s3 + $0x20] ss:$8 sps:$4 sm:$0xff]  }
0x15e2   : > { %v9133_v19 = vcombine.high %v4742_v55, %v4750_v60  ;;  %v9132_v23 = vcombine.low %v4742_v55, %v4750_v60  ;;  %v4602_v8 = vld [vmem:[%s10578_s1 + $0x250] sm:$0xff]  ;;  %v9947_v55 = vld [vmem:[%s10588_s3 + $0x44] ss:$8 sps:$4 sm:$0xff]  }
0x15e3   : > { %v8980_v60 = vcombine.low %v4594_v47, %v4602_v8 }
0x15e4   : > { %6204 = vmatpush1.bf16.msra.mxu0 %v9010_v2  ;;  %6419 = vmatpush1.bf16.msra.mxu1 %v9020_v16  ;;  %v4761_v2 = vld [vmem:[%s10578_s1 + $0x748] sm:$0xff]  ;;  %v4758_v16 = vld [vmem:[%s10578_s1 + $0x730] sm:$0xff] }
0x15e5   : > { %6205 = vmatprep.subr.bf16.mxu0 %v9027_v18  ;;  %6420 = vmatprep.subr.bf16.mxu1 %v9037_v22  ;;  %v4766_v18 = vld [vmem:[%s10578_s1 + $0x770] sm:$0xff]  ;;  %v9122_v22 = vcombine.low %v4737_v17, %v4745_v54  ;;  %v9139_v25 = vcombine.high %v4753_v4, %v4761_v2 }
0x15e6   : > { %v9149_v26 = vcombine.high %v4758_v16, %v4766_v18  ;;  %v9148_v12 = vcombine.low %v4758_v16, %v4766_v18  ;;  %v4610_v17 = vld [vmem:[%s10578_s1 + $0x290] sm:$0xff] }
0x15e7   : > { %v4618_v54 = vld [vmem:[%s10578_s1 + $0x2d0] sm:$0xff] }
0x15e8   : > { %6206 = vmatpush1.bf16.msra.mxu0 %v9026_v27  ;;  %6421 = vmatpush1.bf16.msra.mxu1 %v9036_v48  ;;  %v4777_v27 = vld [vmem:[%s10578_s1 + $0x7c8] sm:$0xff]  ;;  %v4774_v48 = vld [vmem:[%s10578_s1 + $0x7b0] sm:$0xff] }
0x15e9   : > { %6207 = vmatprep.subr.bf16.mxu0 %v9043_v28  ;;  %6422 = vmatprep.subr.bf16.mxu1 %v9053_v30  ;;  %v4782_v28 = vld [vmem:[%s10578_s1 + $0x7f0] sm:$0xff]  ;;  %v9138_v30 = vcombine.low %v4753_v4, %v4761_v2  ;;  %v9155_v31 = vcombine.high %v4769_v24, %v4777_v27  ;;  %v8996_v2 = vcombine.low %v4610_v17, %v4618_v54 }
0x15ea   : > { %v9165_v32 = vcombine.high %v4774_v48, %v4782_v28  ;;  %v9950_v4 = vld [vmem:[%s10588_s3 + $0x54] ss:$8 sps:$4 sm:$0xff]   ;;  %v9948_v18 = vld [vmem:[%s10588_s3 + $0x50] ss:$8 sps:$4 sm:$0xff]  }
0x15ec   : > { %6208 = vmatpush1.bf16.msra.mxu0 %v9042_v35  ;;  %6423 = vmatpush1.bf16.msra.mxu1 %v9052_v36  ;;  %v4538_v35 = vld [vmem:[%s10578_s1 + $0x50] sm:$0xff]  ;;  %v9154_v36 = vcombine.low %v4769_v24, %v4777_v27  ;;  %v9951_v27 = vld [vmem:[%s10588_s3 + $0x60] ss:$8 sps:$4 sm:$0xff]  }
0x15ed   : > { %6209 = vmatprep.subr.bf16.mxu0 %v9059_v37  ;;  %6424 = vmatprep.subr.bf16.mxu1 %v9069_v38  ;;  %v9164_v37 = vcombine.low %v4774_v48, %v4782_v28  ;;  %v8917_v38 = vcombine.high %v4530_v33, %v4538_v35  ;;  %v8916_v14 = vcombine.low %v4530_v33, %v4538_v35  ;;  %v4658_v48 = vld [vmem:[%s10578_s1 + $0x410] sm:$0xff] }
0x15ee   : > { %v4666_v28 = vld [vmem:[%s10578_s1 + $0x450] sm:$0xff] }
0x15ef   : > { %v4674_v33 = vld [vmem:[%s10578_s1 + $0x490] sm:$0xff] }
0x15f0   : > { %6210 = vmatpush1.bf16.msra.mxu0 %v9058_v42  ;;  %6425 = vmatpush1.bf16.msra.mxu1 %v9068_v29  ;;  %v8933_v42 = vcombine.high %v4546_v59, %v4554_v40  ;;  %v9933_v29 = vld [vmem:[%s10588_s3] ss:$8 sps:$4 sm:$0xff]   ;;  %v4682_v35 = vld [vmem:[%s10578_s1 + $0x4d0] sm:$0xff] }
0x15f1   : > { %6211 = vmatprep.subr.bf16.mxu0 %v9075_v3  ;;  %6426 = vmatprep.subr.bf16.mxu1 %v9085_v13  ;;  %v4562_v3 = vld [vmem:[%s10578_s1 + $0x110] sm:$0xff] }
0x15f2   : > { %v4570_v13 = vld [vmem:[%s10578_s1 + $0x150] sm:$0xff] }
0x15f3   : > { %v8949_v57 = vcombine.high %v4562_v3, %v4570_v13  ;;  %v4690_v59 = vld [vmem:[%s10578_s1 + $0x510] sm:$0xff] }
0x15f4   : > { %6212 = vmatpush1.bf16.msra.mxu0 %v9074_v1  ;;  %6427 = vmatpush1.bf16.msra.mxu1 %v9084_v11  ;;  %v4578_v1 = vld [vmem:[%s10578_s1 + $0x190] sm:$0xff] }
0x15f5   : > { %6213 = vmatprep.subr.bf16.mxu0 %v9091_v41  ;;  %6428 = vmatprep.subr.bf16.mxu1 %v9101_v5  ;;  %v4586_v11 = vld [vmem:[%s10578_s1 + $0x1d0] sm:$0xff]  ;;  %v9941_v41 = vld [vmem:[%s10588_s3 + $0x24] ss:$8 sps:$4 sm:$0xff]   ;;  %v8948_v5 = vcombine.low %v4562_v3, %v4570_v13 }
0x15f6   : > { %v8965_v46 = vcombine.high %v4578_v1, %v4586_v11  ;;  %v4698_v40 = vld [vmem:[%s10578_s1 + $0x550] sm:$0xff] }
0x15f7   : > { %v9960_v3 = vld [vmem:[%s10588_s3 + $0x90] ss:$8 sps:$4 sm:$0xff]  }
0x15f8   : > { %6214 = vmatpush1.bf16.msra.mxu0 %v9090_v49  ;;  %6429 = vmatpush1.bf16.msra.mxu1 %v9100_v61  ;;  %v9944_v49 = vld [vmem:[%s10588_s3 + $0x34] ss:$8 sps:$4 sm:$0xff]   ;;  %v8964_v61 = vcombine.low %v4578_v1, %v4586_v11  ;;  %v9963_v1 = vld [vmem:[%s10588_s3 + $0xa0] ss:$8 sps:$4 sm:$0xff]  }
0x15f9   : > { %6215 = vmatprep.subr.bf16.mxu0 %v9107_v52  ;;  %6430 = vmatprep.subr.bf16.mxu1 %v9117_v58  ;;  %v8981_v52 = vcombine.high %v4594_v47, %v4602_v8  ;;  %v9942_v58 = vld [vmem:[%s10588_s3 + $0x30] ss:$8 sps:$4 sm:$0xff]  }
0x15fa   : > { %v4706_v13 = vld [vmem:[%s10578_s1 + $0x590] sm:$0xff] }
0x15fb   : > { %v4722_v11 = vld [vmem:[%s10578_s1 + $0x610] sm:$0xff] }
0x15fc   : > { %6216 = vmatpush1.bf16.msra.mxu0 %v9106_v0  ;;  %6431 = vmatpush1.bf16.msra.mxu1 %v9116_v7  ;;  %v8997_v0 = vcombine.high %v4610_v17, %v4618_v54  ;;  %v9945_v7 = vld [vmem:[%s10588_s3 + $0x40] ss:$8 sps:$4 sm:$0xff]   ;;  %v9966_v47 = vld [vmem:[%s10588_s3 + $0xb0] ss:$8 sps:$4 sm:$0xff]  }
0x15fd   : > { %6217 = vmatprep.subr.bf16.mxu0 %v9123_v6  ;;  %6432 = vmatprep.subr.bf16.mxu1 %v9133_v19  ;;  %v4626_v6 = vld [vmem:[%s10578_s1 + $0x310] sm:$0xff]  ;;  %v9969_v17 = vld [vmem:[%s10588_s3 + $0xc0] ss:$8 sps:$4 sm:$0xff]  }
0x15fe   : > { %v4634_v19 = vld [vmem:[%s10578_s1 + $0x350] sm:$0xff] }
0x15ff   : > { %v9013_v16 = vcombine.high %v4626_v6, %v4634_v19  ;;  %v4738_v8 = vld [vmem:[%s10578_s1 + $0x690] sm:$0xff] }
0x1600   : > { %6218 = vmatpush1.bf16.msra.mxu0 %v9122_v22  ;;  %6433 = vmatpush1.bf16.msra.mxu1 %v9132_v23  ;;  %v4642_v22 = vld [vmem:[%s10578_s1 + $0x390] sm:$0xff] }
0x1601   : > { %6219 = vmatprep.subr.bf16.mxu0 %v9139_v25  ;;  %6434 = vmatprep.subr.bf16.mxu1 %v9149_v26  ;;  %v4650_v23 = vld [vmem:[%s10578_s1 + $0x3d0] sm:$0xff]  ;;  %v9953_v25 = vld [vmem:[%s10588_s3 + $0x64] ss:$8 sps:$4 sm:$0xff]   ;;  %v9012_v26 = vcombine.low %v4626_v6, %v4634_v19 }
0x1602   : > { %v9029_v24 = vcombine.high %v4642_v22, %v4650_v23  ;;  %v4754_v54 = vld [vmem:[%s10578_s1 + $0x710] sm:$0xff] }
0x1603   : > { %v9972_v6 = vld [vmem:[%s10588_s3 + $0xd0] ss:$8 sps:$4 sm:$0xff]  }
0x1604   : > { %6220 = vmatpush1.bf16.msra.mxu0 %v9138_v30  ;;  %6435 = vmatpush1.bf16.msra.mxu1 %v9148_v12  ;;  %v9956_v30 = vld [vmem:[%s10588_s3 + $0x74] ss:$8 sps:$4 sm:$0xff]   ;;  %v9028_v12 = vcombine.low %v4642_v22, %v4650_v23  ;;  %v9975_v22 = vld [vmem:[%s10588_s3 + $0xe0] ss:$8 sps:$4 sm:$0xff]  }
0x1605   : > { %6221 = vmatprep.subr.bf16.mxu0 %v9155_v31  ;;  %6436 = vmatprep.subr.bf16.mxu1 %v9165_v32  ;;  %v9045_v31 = vcombine.high %v4658_v48, %v4666_v28  ;;  %v9954_v32 = vld [vmem:[%s10588_s3 + $0x70] ss:$8 sps:$4 sm:$0xff]  }
0x1606   : > { %v4770_v19 = vld [vmem:[%s10578_s1 + $0x790] sm:$0xff]  ;;  %v4531_v23 = vld [vmem:[%s10578_s1 + $0x18] sm:$0xff] }
0x1608   : > { %6222 = vmatpush1.bf16.msra.mxu0 %v9154_v36  ;;  %6437 = vmatpush1.bf16.msra.mxu1 %v9164_v37  ;;  %v9959_v36 = vld [vmem:[%s10588_s3 + $0x84] ss:$8 sps:$4 sm:$0xff]   ;;  %v9044_v37 = vcombine.low %v4658_v48, %v4666_v28  ;;  %v9978_v48 = vld [vmem:[%s10588_s3 + $0xf0] ss:$8 sps:$4 sm:$0xff]  }
0x1609   : > { %6234 = vmatprep.subr.bf16.mxu0 %v8917_v38  ;;  %8088 = vmatprep.subr.bf16.mxu1 %v9935_v39  ;;  %v9061_v38 = vcombine.high %v4674_v33, %v4682_v35  ;;  %v9957_v39 = vld [vmem:[%s10588_s3 + $0x80] ss:$8 sps:$4 sm:$0xff]   ;;  %v4547_v28 = vld [vmem:[%s10578_s1 + $0x98] sm:$0xff] }
0x160b   : > { %6224 = vmatmul.mubr.bf16.vlgmr.msra.gmra.mrb[52].mxu0 %v11311_v43  ;;  %6439 = vmatmul.mubr.bf16.vlgmr.msra.gmra.mrb[40].mxu1 %v11311_v43 }
0x160c   : > { %6235 = vmatpush1.bf16.msra.mxu0 %v8916_v14  ;;  %6266 = vmatprep.mubr.bf16.mxu0 %v11315_v44  ;;  %v9962_v14 = vld [vmem:[%s10588_s3 + $0x94] ss:$8 sps:$4 sm:$0xff]  }
0x160d   : > { %6236 = vmatprep.subr.bf16.mxu0 %v8933_v42  ;;  %8089 = vmatpush1.bf16.msra.mxu1 %v9933_v29  ;;  %v9060_v42 = vcombine.low %v4674_v33, %v4682_v35  ;;  %v9077_v29 = vcombine.high %v4690_v59, %v4698_v40  ;;  %v4563_v33 = vld [vmem:[%s10578_s1 + $0x118] sm:$0xff] }
0x160e   : > { %8090 = vmatprep.subr.bf16.mxu1 %v9938_v15  ;;  %v4714_v15 = vld [vmem:[%s10578_s1 + $0x5d0] sm:$0xff]  ;;  %v4571_v35 = vld [vmem:[%s10578_s1 + $0x158] sm:$0xff] }
0x1610   : > { %6237 = vmatpush1.bf16.msra.mxu0 %v8932_v45  ;;  %v9965_v45 = vld [vmem:[%s10588_s3 + $0xa4] ss:$8 sps:$4 sm:$0xff]  }
0x1611   : > { %6238 = vmatprep.subr.bf16.mxu0 %v8949_v57  ;;  %8091 = vmatpush1.bf16.msra.mxu1 %v9936_v63  ;;  %v9076_v57 = vcombine.low %v4690_v59, %v4698_v40  ;;  %v9093_v63 = vcombine.high %v4706_v13, %v4714_v15  ;;  %v8950_v59 = vcombine.low %v4563_v33, %v4571_v35 }
0x1612   : > { %8092 = vmatprep.subr.bf16.mxu1 %v9941_v41  ;;  %v4730_v41 = vld [vmem:[%s10578_s1 + $0x650] sm:$0xff] }
0x1614   : > { %6239 = vmatpush1.bf16.msra.mxu0 %v8948_v5  ;;  %v9968_v5 = vld [vmem:[%s10588_s3 + $0xb4] ss:$8 sps:$4 sm:$0xff]  }
0x1615   : > { %6240 = vmatprep.subr.bf16.mxu0 %v8965_v46  ;;  %8093 = vmatpush1.bf16.msra.mxu1 %v9939_v62  ;;  %v9092_v46 = vcombine.low %v4706_v13, %v4714_v15  ;;  %v9109_v62 = vcombine.high %v4722_v11, %v4730_v41  ;;  %v4611_v13 = vld [vmem:[%s10578_s1 + $0x298] sm:$0xff] }
0x1616   : > { %8094 = vmatprep.subr.bf16.mxu1 %v9944_v49  ;;  %v4746_v49 = vld [vmem:[%s10578_s1 + $0x6d0] sm:$0xff]  ;;  %v4619_v15 = vld [vmem:[%s10578_s1 + $0x2d8] sm:$0xff] }
0x1618   : > { %6241 = vmatpush1.bf16.msra.mxu0 %v8964_v61  ;;  %v9971_v61 = vld [vmem:[%s10588_s3 + $0xc4] ss:$8 sps:$4 sm:$0xff]  }
0x1619   : > { %6242 = vmatprep.subr.bf16.mxu0 %v8981_v52  ;;  %8095 = vmatpush1.bf16.msra.mxu1 %v9942_v58  ;;  %v9108_v52 = vcombine.low %v4722_v11, %v4730_v41  ;;  %v9125_v58 = vcombine.high %v4738_v8, %v4746_v49  ;;  %v8998_v11 = vcombine.low %v4611_v13, %v4619_v15 }
0x161a   : > { %8096 = vmatprep.subr.bf16.mxu1 %v9947_v55  ;;  %v4762_v55 = vld [vmem:[%s10578_s1 + $0x750] sm:$0xff] }
0x161c   : > { %6243 = vmatpush1.bf16.msra.mxu0 %v8980_v60  ;;  %v9974_v60 = vld [vmem:[%s10588_s3 + $0xd4] ss:$8 sps:$4 sm:$0xff]  }
0x161d   : > { %6244 = vmatprep.subr.bf16.mxu0 %v8997_v0  ;;  %8097 = vmatpush1.bf16.msra.mxu1 %v9945_v7  ;;  %v9124_v0 = vcombine.low %v4738_v8, %v4746_v49  ;;  %v9141_v7 = vcombine.high %v4754_v54, %v4762_v55  ;;  %v4659_v8 = vld [vmem:[%s10578_s1 + $0x418] sm:$0xff] }
0x161e   : > { %8098 = vmatprep.subr.bf16.mxu1 %v9950_v4  ;;  %v4778_v4 = vld [vmem:[%s10578_s1 + $0x7d0] sm:$0xff]  ;;  %v4667_v49 = vld [vmem:[%s10578_s1 + $0x458] sm:$0xff] }
0x1620   : > { %6245 = vmatpush1.bf16.msra.mxu0 %v8996_v2  ;;  %v9977_v2 = vld [vmem:[%s10588_s3 + $0xe4] ss:$8 sps:$4 sm:$0xff]  }
0x1621   : > { %6246 = vmatprep.subr.bf16.mxu0 %v9013_v16  ;;  %8099 = vmatpush1.bf16.msra.mxu1 %v9948_v18  ;;  %v9140_v16 = vcombine.low %v4754_v54, %v4762_v55  ;;  %v9157_v18 = vcombine.high %v4770_v19, %v4778_v4  ;;  %v9046_v54 = vcombine.low %v4659_v8, %v4667_v49 }
0x1622   : > { %8100 = vmatprep.subr.bf16.mxu1 %v9953_v25  ;;  %v4539_v25 = vld [vmem:[%s10578_s1 + $0x58] sm:$0xff] }
0x1624   : > { %6247 = vmatpush1.bf16.msra.mxu0 %v9012_v26  ;;  %v9980_v26 = vld [vmem:[%s10588_s3 + $0xf4] ss:$8 sps:$4 sm:$0xff]  }
0x1625   : > { %6248 = vmatprep.subr.bf16.mxu0 %v9029_v24  ;;  %8101 = vmatpush1.bf16.msra.mxu1 %v9951_v27  ;;  %v9156_v24 = vcombine.low %v4770_v19, %v4778_v4  ;;  %v8919_v27 = vcombine.high %v4531_v23, %v4539_v25  ;;  %v4707_v19 = vld [vmem:[%s10578_s1 + $0x598] sm:$0xff] }
0x1626   : > { %8102 = vmatprep.subr.bf16.mxu1 %v9956_v30  ;;  %v4555_v30 = vld [vmem:[%s10578_s1 + $0xd8] sm:$0xff] }
0x1627   : > { %v4715_v4 = vld [vmem:[%s10578_s1 + $0x5d8] sm:$0xff] }
0x1628   : > { %6249 = vmatpush1.bf16.msra.mxu0 %v9028_v12  ;;  %v9983_v12 = vld [vmem:[%s10588_s3 + $0x104] ss:$8 sps:$4 sm:$0xff]  }
0x1629   : > { %6250 = vmatprep.subr.bf16.mxu0 %v9045_v31  ;;  %8103 = vmatpush1.bf16.msra.mxu1 %v9954_v32  ;;  %v8918_v31 = vcombine.low %v4531_v23, %v4539_v25  ;;  %v8935_v32 = vcombine.high %v4547_v28, %v4555_v30  ;;  %v9094_v23 = vcombine.low %v4707_v19, %v4715_v4 }
0x162a   : > { %8104 = vmatprep.subr.bf16.mxu1 %v9959_v36  ;;  %v8934_v36 = vcombine.low %v4547_v28, %v4555_v30  ;;  %v4755_v28 = vld [vmem:[%s10578_s1 + $0x718] sm:$0xff] }
0x162b   : > { %v4763_v30 = vld [vmem:[%s10578_s1 + $0x758] sm:$0xff] }
0x162c   : > { %6251 = vmatpush1.bf16.msra.mxu0 %v9044_v37  ;;  %v8951_v37 = vcombine.high %v4563_v33, %v4571_v35  ;;  %v4779_v33 = vld [vmem:[%s10578_s1 + $0x7d8] sm:$0xff]  ;;  %v9142_v35 = vcombine.low %v4755_v28, %v4763_v30 }
0x162d   : > { %6252 = vmatprep.subr.bf16.mxu0 %v9061_v38  ;;  %8105 = vmatpush1.bf16.msra.mxu1 %v9957_v39  ;;  %v4579_v38 = vld [vmem:[%s10578_s1 + $0x198] sm:$0xff] }
0x162e   : > { %8106 = vmatprep.subr.bf16.mxu1 %v9962_v14  ;;  %v4587_v39 = vld [vmem:[%s10578_s1 + $0x1d8] sm:$0xff] }
0x162f   : > { %v8967_v40 = vcombine.high %v4579_v38, %v4587_v39  ;;  %v4595_v14 = vld [vmem:[%s10578_s1 + $0x218] sm:$0xff] }
0x1630   : > { %6253 = vmatpush1.bf16.msra.mxu0 %v9060_v42  ;;  %v4603_v42 = vld [vmem:[%s10578_s1 + $0x258] sm:$0xff] }
0x1631   : > { %6254 = vmatprep.subr.bf16.mxu0 %v9077_v29  ;;  %8107 = vmatpush1.bf16.msra.mxu1 %v9960_v3  ;;  %v8966_v29 = vcombine.low %v4579_v38, %v4587_v39  ;;  %v8983_v3 = vcombine.high %v4595_v14, %v4603_v42  ;;  %v4541_v38 = vld [vmem:[%s10578_s1 + $0x68] sm:$0xff] }
0x1632   : > { %8108 = vmatprep.subr.bf16.mxu1 %v9965_v45  ;;  %v8982_v45 = vcombine.low %v4595_v14, %v4603_v42  ;;  %v4557_v14 = vld [vmem:[%s10578_s1 + $0xe8] sm:$0xff] }
0x1634   : > { %6255 = vmatpush1.bf16.msra.mxu0 %v9076_v57  ;;  %v8999_v57 = vcombine.high %v4611_v13, %v4619_v15  ;;  %v4573_v13 = vld [vmem:[%s10578_s1 + $0x168] sm:$0xff] }
0x1635   : > { %6256 = vmatprep.subr.bf16.mxu0 %v9093_v63  ;;  %8109 = vmatpush1.bf16.msra.mxu1 %v9963_v1  ;;  %v4627_v63 = vld [vmem:[%s10578_s1 + $0x318] sm:$0xff] }
0x1636   : > { %8110 = vmatprep.subr.bf16.mxu1 %v9968_v5  ;;  %v4635_v1 = vld [vmem:[%s10578_s1 + $0x358] sm:$0xff] }
0x1637   : > { %v9015_v41 = vcombine.high %v4627_v63, %v4635_v1  ;;  %v4643_v5 = vld [vmem:[%s10578_s1 + $0x398] sm:$0xff] }
0x1638   : > { %6257 = vmatpush1.bf16.msra.mxu0 %v9092_v46  ;;  %v4651_v46 = vld [vmem:[%s10578_s1 + $0x3d8] sm:$0xff] }
0x1639   : > { %6258 = vmatprep.subr.bf16.mxu0 %v9109_v62  ;;  %8111 = vmatpush1.bf16.msra.mxu1 %v9966_v47  ;;  %v9014_v62 = vcombine.low %v4627_v63, %v4635_v1  ;;  %v9031_v47 = vcombine.high %v4643_v5, %v4651_v46  ;;  %v4589_v63 = vld [vmem:[%s10578_s1 + $0x1e8] sm:$0xff] }
0x163a   : > { %8112 = vmatprep.subr.bf16.mxu1 %v9971_v61  ;;  %v9030_v61 = vcombine.low %v4643_v5, %v4651_v46  ;;  %v4605_v5 = vld [vmem:[%s10578_s1 + $0x268] sm:$0xff] }
0x163c   : > { %6259 = vmatpush1.bf16.msra.mxu0 %v9108_v52  ;;  %v9047_v52 = vcombine.high %v4659_v8, %v4667_v49  ;;  %v4621_v8 = vld [vmem:[%s10578_s1 + $0x2e8] sm:$0xff] }
0x163d   : > { %6260 = vmatprep.subr.bf16.mxu0 %v9125_v58  ;;  %8113 = vmatpush1.bf16.msra.mxu1 %v9969_v17  ;;  %v4675_v58 = vld [vmem:[%s10578_s1 + $0x498] sm:$0xff] }
0x163e   : > { %8114 = vmatprep.subr.bf16.mxu1 %v9974_v60  ;;  %v4683_v17 = vld [vmem:[%s10578_s1 + $0x4d8] sm:$0xff] }
0x163f   : > { %v9063_v55 = vcombine.high %v4675_v58, %v4683_v17  ;;  %v4691_v60 = vld [vmem:[%s10578_s1 + $0x518] sm:$0xff] }
0x1640   : > { %6261 = vmatpush1.bf16.msra.mxu0 %v9124_v0  ;;  %v4699_v0 = vld [vmem:[%s10578_s1 + $0x558] sm:$0xff] }
0x1641   : > { %6262 = vmatprep.subr.bf16.mxu0 %v9141_v7  ;;  %8115 = vmatpush1.bf16.msra.mxu1 %v9972_v6  ;;  %v9062_v7 = vcombine.low %v4675_v58, %v4683_v17  ;;  %v9079_v6 = vcombine.high %v4691_v60, %v4699_v0  ;;  %v4629_v17 = vld [vmem:[%s10578_s1 + $0x328] sm:$0xff] }
0x1642   : > { %8116 = vmatprep.subr.bf16.mxu1 %v9977_v2  ;;  %v9078_v2 = vcombine.low %v4691_v60, %v4699_v0 }
0x1644   : > { %6263 = vmatpush1.bf16.msra.mxu0 %v9140_v16  ;;  %v9095_v16 = vcombine.high %v4707_v19, %v4715_v4 }
0x1645   : > { %6264 = vmatprep.subr.bf16.mxu0 %v9157_v18  ;;  %8117 = vmatpush1.bf16.msra.mxu1 %v9975_v22  ;;  %v4723_v18 = vld [vmem:[%s10578_s1 + $0x618] sm:$0xff] }
0x1646   : > { %8118 = vmatprep.subr.bf16.mxu1 %v9980_v26  ;;  %v4731_v22 = vld [vmem:[%s10578_s1 + $0x658] sm:$0xff] }
0x1647   : > { %v9111_v25 = vcombine.high %v4723_v18, %v4731_v22  ;;  %v4739_v26 = vld [vmem:[%s10578_s1 + $0x698] sm:$0xff] }
0x1648   : > { %6265 = vmatpush1.bf16.msra.mxu0 %v9156_v24  ;;  %v4747_v24 = vld [vmem:[%s10578_s1 + $0x6d8] sm:$0xff] }
0x1649   : > { %6277 = vmatprep.subr.bf16.mxu0 %v8919_v27  ;;  %8119 = vmatpush1.bf16.msra.mxu1 %v9978_v48  ;;  %v9110_v27 = vcombine.low %v4723_v18, %v4731_v22  ;;  %v9127_v48 = vcombine.high %v4739_v26, %v4747_v24  ;;  %v4653_v18 = vld [vmem:[%s10578_s1 + $0x3e8] sm:$0xff] }
0x164a   : > { %8131 = vmatprep.subr.bf16.mxu1 %v9983_v12  ;;  %v9126_v12 = vcombine.low %v4739_v26, %v4747_v24 }
0x164b   : > { %6267 = vmatmul.mubr.bf16.vlgmr.msra.gmra.mrb[56].mxu0 %v11311_v43 }
0x164c   : > { %6278 = vmatpush1.bf16.msra.mxu0 %v8918_v31  ;;  %6309 = vmatprep.mubr.bf16.mxu0 %v11315_v44  ;;  %v9143_v31 = vcombine.high %v4755_v28, %v4763_v30 }
0x164d   : > { %6279 = vmatprep.subr.bf16.mxu0 %v8935_v32  ;;  %v4771_v32 = vld [vmem:[%s10578_s1 + $0x798] sm:$0xff] }
0x164e   : > { %v9158_v39 = vcombine.low %v4771_v32, %v4779_v33 }
0x1650   : > { %6280 = vmatpush1.bf16.msra.mxu0 %v8934_v36  ;;  %v9159_v36 = vcombine.high %v4771_v32, %v4779_v33 }
0x1651   : > { %6281 = vmatprep.subr.bf16.mxu0 %v8951_v37  ;;  %v4533_v37 = vld [vmem:[%s10578_s1 + $0x28] sm:$0xff] }
0x1652   : > { %v8922_v42 = vcombine.low %v4533_v37, %v4541_v38 }
0x1654   : > { %6282 = vmatpush1.bf16.msra.mxu0 %v8950_v59  ;;  %v8923_v59 = vcombine.high %v4533_v37, %v4541_v38 }
0x1655   : > { %6283 = vmatprep.subr.bf16.mxu0 %v8967_v40  ;;  %v4549_v40 = vld [vmem:[%s10578_s1 + $0xa8] sm:$0xff] }
0x1656   : > { %v8938_v15 = vcombine.low %v4549_v40, %v4557_v14 }
0x1658   : > { %6284 = vmatpush1.bf16.msra.mxu0 %v8966_v29  ;;  %v8939_v29 = vcombine.high %v4549_v40, %v4557_v14 }
0x1659   : > { %6285 = vmatprep.subr.bf16.mxu0 %v8983_v3  ;;  %v4565_v3 = vld [vmem:[%s10578_s1 + $0x128] sm:$0xff] }
0x165a   : > { %v8954_v1 = vcombine.low %v4565_v3, %v4573_v13 }
0x165c   : > { %6286 = vmatpush1.bf16.msra.mxu0 %v8982_v45  ;;  %v8955_v45 = vcombine.high %v4565_v3, %v4573_v13 }
0x165d   : > { %6287 = vmatprep.subr.bf16.mxu0 %v8999_v57  ;;  %v4581_v57 = vld [vmem:[%s10578_s1 + $0x1a8] sm:$0xff] }
0x165e   : > { %v8970_v46 = vcombine.low %v4581_v57, %v4589_v63 }
0x1660   : > { %6288 = vmatpush1.bf16.msra.mxu0 %v8998_v11  ;;  %v8971_v11 = vcombine.high %v4581_v57, %v4589_v63 }
0x1661   : > { %6289 = vmatprep.subr.bf16.mxu0 %v9015_v41  ;;  %v4597_v41 = vld [vmem:[%s10578_s1 + $0x228] sm:$0xff] }
0x1662   : > { %v8986_v49 = vcombine.low %v4597_v41, %v4605_v5 }
0x1664   : > { %6290 = vmatpush1.bf16.msra.mxu0 %v9014_v62  ;;  %v8987_v62 = vcombine.high %v4597_v41, %v4605_v5  ;;  %v9981_v5 = vld [vmem:[%s10588_s3 + $0x100] ss:$8 sps:$4 sm:$0xff]  }
0x1665   : > { %6291 = vmatprep.subr.bf16.mxu0 %v9031_v47  ;;  %v4613_v47 = vld [vmem:[%s10578_s1 + $0x2a8] sm:$0xff] }
0x1666   : > { %v9003_v58 = vcombine.high %v4613_v47, %v4621_v8  ;;  %v9002_v0 = vcombine.low %v4613_v47, %v4621_v8  ;;  %v9986_v47 = vld [vmem:[%s10588_s3 + $0x114] ss:$8 sps:$4 sm:$0xff]  }
0x1668   : > { %6292 = vmatpush1.bf16.msra.mxu0 %v9030_v61  ;;  %v11496_v61 = vld [vmem:[%s10583_s29] sm:$0xff] }
0x1669   : > { %6293 = vmatprep.subr.bf16.mxu0 %v9047_v52  ;;  %v11499_v52 = vld [vmem:[%s10583_s29 + $0x8] sm:$0xff] }
0x166a   : > { %v4823_v60 = vrot.slane %v11499_v52, %v10740_v51 }
0x166c   : > { %6294 = vmatpush1.bf16.msra.mxu0 %v9046_v54  ;;  %v4637_v54 = vld [vmem:[%s10578_s1 + $0x368] sm:$0xff] }
0x166d   : > { %6295 = vmatprep.subr.bf16.mxu0 %v9063_v55  ;;  %v4791_v55 = vrot.slane %v11496_v61, %v10740_v51  ;;  %v9019_v19 = vcombine.high %v4629_v17, %v4637_v54  ;;  %v9018_v30 = vcombine.low %v4629_v17, %v4637_v54  ;;  %v4693_v17 = vld [vmem:[%s10578_s1 + $0x528] sm:$0xff] }
0x166e   : > { %v4701_v54 = vld [vmem:[%s10578_s1 + $0x568] sm:$0xff] }
0x1670   : > { %6296 = vmatpush1.bf16.msra.mxu0 %v9062_v7  ;;  %v4795_v7 = vrot.slane %v11496_v61, %v10748_v53 }
0x1671   : > { %6297 = vmatprep.subr.bf16.mxu0 %v9079_v6  ;;  %v4827_v6 = vrot.slane %v11499_v52, %v10748_v53 }
0x1674   : > { %6298 = vmatpush1.bf16.msra.mxu0 %v9078_v2 }
0x1675   : > { %6299 = vmatprep.subr.bf16.mxu0 %v9095_v16  ;;  %v4645_v16 = vld [vmem:[%s10578_s1 + $0x3a8] sm:$0xff] }
0x1676   : > { %v9034_v38 = vcombine.low %v4645_v16, %v4653_v18 }
0x1678   : > { %6300 = vmatpush1.bf16.msra.mxu0 %v9094_v23 }
0x1679   : > { %6301 = vmatprep.subr.bf16.mxu0 %v9111_v25 }
0x167c   : > { %6302 = vmatpush1.bf16.msra.mxu0 %v9110_v27 }
0x167d   : > { %6303 = vmatprep.subr.bf16.mxu0 %v9127_v48 }
0x1680   : > { %6304 = vmatpush1.bf16.msra.mxu0 %v9126_v12 }
0x1681   : > { %6305 = vmatprep.subr.bf16.mxu0 %v9143_v31 }
0x1684   : > { %6306 = vmatpush1.bf16.msra.mxu0 %v9142_v35  ;;  %v9035_v35 = vcombine.high %v4645_v16, %v4653_v18  ;;  %v9990_v18 = vld [vmem:[%s10588_s3 + $0x130] ss:$8 sps:$4 sm:$0xff]  }
0x1685   : > { %6307 = vmatprep.subr.bf16.mxu0 %v9159_v36 }
0x1688   : > { %6308 = vmatpush1.bf16.msra.mxu0 %v9158_v39  ;;  %v4661_v39 = vld [vmem:[%s10578_s1 + $0x428] sm:$0xff] }
0x1689   : > { %6363 = vmatprep.subr.bf16.mxu0 %v8923_v59  ;;  %v4669_v59 = vld [vmem:[%s10578_s1 + $0x468] sm:$0xff] }
0x168a   : > { %v9050_v8 = vcombine.low %v4661_v39, %v4669_v59 }
0x168b   : > { %6310 = vmatmul.mubr.bf16.vlgmr.msra.gmra.mrb[60].mxu0 %v11311_v43 }
0x168c   : > { %6364 = vmatpush1.bf16.msra.mxu0 %v8922_v42  ;;  %6395 = vmatprep.mubr.bf16.mxu0 %v11315_v44 }
0x168d   : > { %6365 = vmatprep.subr.bf16.mxu0 %v8939_v29 }
0x1690   : > { %6366 = vmatpush1.bf16.msra.mxu0 %v8938_v15 }
0x1691   : > { %6367 = vmatprep.subr.bf16.mxu0 %v8955_v45 }
0x1694   : > { %6368 = vmatpush1.bf16.msra.mxu0 %v8954_v1  ;;  %v9051_v1 = vcombine.high %v4661_v39, %v4669_v59  ;;  %v9999_v39 = vld [vmem:[%s10588_s3 + $0x160] ss:$8 sps:$4 sm:$0xff]  }
0x1695   : > { %6369 = vmatprep.subr.bf16.mxu0 %v8971_v11  ;;  %v4773_v59 = vld [vmem:[%s10578_s1 + $0x7a8] sm:$0xff] }
0x1698   : > { %6370 = vmatpush1.bf16.msra.mxu0 %v8970_v46  ;;  %v4677_v46 = vld [vmem:[%s10578_s1 + $0x4a8] sm:$0xff] }
0x1699   : > { %6371 = vmatprep.subr.bf16.mxu0 %v8987_v62  ;;  %v4685_v62 = vld [vmem:[%s10578_s1 + $0x4e8] sm:$0xff] }
0x169c   : > { %6372 = vmatpush1.bf16.msra.mxu0 %v8986_v49  ;;  %v9067_v49 = vcombine.high %v4677_v46, %v4685_v62 }
0x169d   : > { %6373 = vmatprep.subr.bf16.mxu0 %v9003_v58  ;;  %v9984_v58 = vld [vmem:[%s10588_s3 + $0x110] ss:$8 sps:$4 sm:$0xff]  }
0x169e   : > { %v6182_v4 = vpop.f32.mrb[48].mxu0  ;;  %v6354_v2 = vpop.f32.mrb[36].mxu1 }
0x169f   : > { %v6183_v22 = vadd.f32 %v6182_v4, %v4791_v55  ;;  %v6355_v23 = vadd.f32 %v6354_v2, %v4823_v60  ;;  %v6184_v25 = vpop.f32.mrb[49].mxu0  ;;  %v6356_v26 = vpop.f32.mrb[37].mxu1  ;;  %v9992_v4 = vld [vmem:[%s10588_s3 + $0x134] ss:$8 sps:$4 sm:$0xff]   ;;  %v9082_v2 = vcombine.low %v4693_v17, %v4701_v54 }
0x16a0   : > { %v6185_v24 = vadd.f32 %v6184_v25, %v4795_v7  ;;  %v6357_v27 = vadd.f32 %v6356_v26, %v4827_v6  ;;  %6374 = vmatpush1.bf16.msra.mxu0 %v9002_v0  ;;  %v6186_v48 = vpop.f32.mrb[50].mxu0  ;;  %v6358_v28 = vpop.f32.mrb[38].mxu1  ;;  %v9083_v0 = vcombine.high %v4693_v17, %v4701_v54  ;;  %v9995_v25 = vld [vmem:[%s10588_s3 + $0x144] ss:$8 sps:$4 sm:$0xff]   ;;  %v4575_v17 = vld [vmem:[%s10578_s1 + $0x178] sm:$0xff] }
0x16a1   : > { %v6187_v12 = vadd.f32 %v6186_v48, %v4791_v55  ;;  %v6359_v31 = vadd.f32 %v6358_v28, %v4823_v60  ;;  %v6188_v32 = vpop.f32.mrb[51].mxu0  ;;  %v6360_v33 = vpop.f32.mrb[39].mxu1  ;;  %6375 = vmatprep.subr.bf16.mxu0 %v9019_v19  ;;  %v6492_v40 = vmax.f32 %v6183_v22, 0.0  ;;  %v6500_v14 = vmax.f32 %v6355_v23, 0.0  ;;  %v9989_v55 = vld [vmem:[%s10588_s3 + $0x124] ss:$8 sps:$4 sm:$0xff]  }
0x16a2   : > { %v6189_v36 = vadd.f32 %v6188_v32, %v4795_v7  ;;  %v6361_v37 = vadd.f32 %v6360_v33, %v4827_v6  ;;  %v6493_v3 = vmax.f32 %v6185_v24, 0.0  ;;  %v6501_v13 = vmax.f32 %v6357_v27, 0.0  ;;  %v9987_v7 = vld [vmem:[%s10588_s3 + $0x120] ss:$8 sps:$4 sm:$0xff]   ;;  %v9996_v32 = vld [vmem:[%s10588_s3 + $0x150] ss:$8 sps:$4 sm:$0xff]  }
0x16a3   : > { %v6508_v42 = vmax.f32 %v6187_v12, 0.0  ;;  %v6516_v29 = vmax.f32 %v6359_v31, 0.0  ;;  %v9066_v60 = vcombine.low %v4677_v46, %v4685_v62  ;;  %v4709_v6 = vld [vmem:[%s10578_s1 + $0x5a8] sm:$0xff]  ;;  %v4559_v46 = vld [vmem:[%s10578_s1 + $0xf8] sm:$0xff] }
0x16a4   : > { %v6509_v15 = vmax.f32 %v6189_v36, 0.0  ;;  %v6517_v45 = vmax.f32 %v6361_v37, 0.0  ;;  %6376 = vmatpush1.bf16.msra.mxu0 %v9018_v30  ;;  %v4717_v19 = vld [vmem:[%s10578_s1 + $0x5e8] sm:$0xff]  ;;  %v9998_v30 = vld [vmem:[%s10588_s3 + $0x154] ss:$8 sps:$4 sm:$0xff]  }
0x16a5   : > { %v6524_v57 = vpack.c.bf16 %v6508_v42, %v6492_v40  ;;  %v11515_v63 = vpack.c.bf16 %v6516_v29, %v6500_v14  ;;  %6377 = vmatprep.subr.bf16.mxu0 %v9035_v35  ;;  %v9099_v16 = vcombine.high %v4709_v6, %v4717_v19  ;;  %v4725_v22 = vld [vmem:[%s10578_s1 + $0x628] sm:$0xff]  ;;  %v9098_v26 = vcombine.low %v4709_v6, %v4717_v19  ;;  %v10004_v14 = vld [vmem:[%s10588_s3 + $0x174] ss:$8 sps:$4 sm:$0xff]  }
0x16a6   : > { %v6525_v11 = vpack.c.bf16 %v6509_v15, %v6493_v3  ;;  %v11517_v41 = vpack.c.bf16 %v6517_v45, %v6501_v13  ;;  %v4733_v23 = vld [vmem:[%s10578_s1 + $0x668] sm:$0xff]  ;;  %v10002_v3 = vld [vmem:[%s10588_s3 + $0x170] ss:$8 sps:$4 sm:$0xff]   ;;  %v10010_v62 = vld [vmem:[%s10588_s3 + $0x194] ss:$8 sps:$4 sm:$0xff]  }
0x16a7   : > { %v9115_v24 = vcombine.high %v4725_v22, %v4733_v23  ;;  %v9993_v27 = vld [vmem:[%s10588_s3 + $0x140] ss:$8 sps:$4 sm:$0xff]   ;;  %v9114_v12 = vcombine.low %v4725_v22, %v4733_v23  ;;  %v10001_v36 = vld [vmem:[%s10588_s3 + $0x164] ss:$8 sps:$4 sm:$0xff]   ;;  %v4535_v13 = vld [vmem:[%s10578_s1 + $0x38] sm:$0xff] }
0x16a8   : > { %6378 = vmatpush1.bf16.msra.mxu0 %v9034_v38  ;;  %8120 = vmatprep.mubr.bf16.mxu1 %v6525_v11  ;;  %v4741_v48 = vld [vmem:[%s10578_s1 + $0x6a8] sm:$0xff]  ;;  %v4543_v15 = vld [vmem:[%s10578_s1 + $0x78] sm:$0xff] }
0x16a9   : > { %8121 = vmatmul.mubr.bf16.vlgmr.msra.gmra.mrb[44].mxu1 %v6524_v57  ;;  %6379 = vmatprep.subr.bf16.mxu0 %v9051_v1  ;;  %v4749_v28 = vld [vmem:[%s10578_s1 + $0x6e8] sm:$0xff]  ;;  %v8927_v1 = vcombine.high %v4535_v13, %v4543_v15  ;;  %v4591_v6 = vld [vmem:[%s10578_s1 + $0x1f8] sm:$0xff] }
0x16aa   : > { %8132 = vmatpush1.bf16.msra.mxu1 %v9981_v5  ;;  %v9131_v31 = vcombine.high %v4741_v48, %v4749_v28  ;;  %v4757_v33 = vld [vmem:[%s10578_s1 + $0x728] sm:$0xff]  ;;  %v9130_v37 = vcombine.low %v4741_v48, %v4749_v28  ;;  %v4551_v5 = vld [vmem:[%s10578_s1 + $0xb8] sm:$0xff]  ;;  %v4806_v28 = vsub.s32 4, %v10737_v50 }
0x16ab   : > { %8133 = vmatprep.subr.bf16.mxu1 %v9986_v47  ;;  %v4765_v35 = vld [vmem:[%s10578_s1 + $0x768] sm:$0xff]  ;;  %v8926_v47 = vcombine.low %v4535_v13, %v4543_v15  ;;  %v10016_v19 = vld [vmem:[%s10588_s3 + $0x1b4] ss:$8 sps:$4 sm:$0xff]  }
0x16ac   : > { %6380 = vmatpush1.bf16.msra.mxu0 %v9050_v8  ;;  %v9147_v38 = vcombine.high %v4757_v33, %v4765_v35  ;;  %v4781_v40 = vld [vmem:[%s10578_s1 + $0x7e8] sm:$0xff]  ;;  %v9146_v42 = vcombine.low %v4757_v33, %v4765_v35  ;;  %v8943_v8 = vcombine.high %v4551_v5, %v4559_v46  ;;  %v10022_v48 = vld [vmem:[%s10588_s3 + $0x1d4] ss:$8 sps:$4 sm:$0xff]  }
0x16ad   : > { %6381 = vmatprep.subr.bf16.mxu0 %v9067_v49  ;;  %v9163_v29 = vcombine.high %v4773_v59, %v4781_v40  ;;  %v10007_v45 = vld [vmem:[%s10588_s3 + $0x184] ss:$8 sps:$4 sm:$0xff]   ;;  %v9162_v57 = vcombine.low %v4773_v59, %v4781_v40  ;;  %v10005_v11 = vld [vmem:[%s10588_s3 + $0x180] ss:$8 sps:$4 sm:$0xff]   ;;  %v10008_v49 = vld [vmem:[%s10588_s3 + $0x190] ss:$8 sps:$4 sm:$0xff]  }
0x16ae   : > { %8134 = vmatpush1.bf16.msra.mxu1 %v9984_v58  ;;  %v4567_v58 = vld [vmem:[%s10578_s1 + $0x138] sm:$0xff]  ;;  %v10013_v54 = vld [vmem:[%s10588_s3 + $0x1a4] ss:$8 sps:$4 sm:$0xff]  }
0x16af   : > { %8135 = vmatprep.subr.bf16.mxu1 %v9989_v55  ;;  %v8942_v55 = vcombine.low %v4551_v5, %v4559_v46  ;;  %v10019_v22 = vld [vmem:[%s10588_s3 + $0x1c4] ss:$8 sps:$4 sm:$0xff]   ;;  %v4631_v33 = vld [vmem:[%s10578_s1 + $0x338] sm:$0xff] }
0x16b0   : > { %6382 = vmatpush1.bf16.msra.mxu0 %v9066_v60  ;;  %v8959_v60 = vcombine.high %v4567_v58, %v4575_v17  ;;  %v4639_v35 = vld [vmem:[%s10578_s1 + $0x378] sm:$0xff] }
0x16b1   : > { %6383 = vmatprep.subr.bf16.mxu0 %v9083_v0  ;;  %v10011_v0 = vld [vmem:[%s10588_s3 + $0x1a0] ss:$8 sps:$4 sm:$0xff]   ;;  %v4647_v13 = vld [vmem:[%s10578_s1 + $0x3b8] sm:$0xff] }
0x16b2   : > { %8136 = vmatpush1.bf16.msra.mxu1 %v9987_v7  ;;  %v4583_v7 = vld [vmem:[%s10578_s1 + $0x1b8] sm:$0xff] }
0x16b3   : > { %8137 = vmatprep.subr.bf16.mxu1 %v9992_v4  ;;  %v8958_v4 = vcombine.low %v4567_v58, %v4575_v17  ;;  %v8974_v23 = vcombine.low %v4583_v7, %v4591_v6  ;;  %v4655_v15 = vld [vmem:[%s10578_s1 + $0x3f8] sm:$0xff] }
0x16b4   : > { %6384 = vmatpush1.bf16.msra.mxu0 %v9082_v2  ;;  %v8975_v2 = vcombine.high %v4583_v7, %v4591_v6  ;;  %v10028_v5 = vld [vmem:[%s10588_s3 + $0x1f4] ss:$8 sps:$4 sm:$0xff]   ;;  %v10026_v7 = vld [vmem:[%s10588_s3 + $0x1f0] ss:$8 sps:$4 sm:$0xff]   ;;  %v9038_v6 = vcombine.low %v4647_v13, %v4655_v15 }
0x16b5   : > { %6385 = vmatprep.subr.bf16.mxu0 %v9099_v16  ;;  %v4599_v16 = vld [vmem:[%s10578_s1 + $0x238] sm:$0xff] }
0x16b6   : > { %8138 = vmatpush1.bf16.msra.mxu1 %v9990_v18  ;;  %v4607_v18 = vld [vmem:[%s10578_s1 + $0x278] sm:$0xff] }
0x16b7   : > { %8139 = vmatprep.subr.bf16.mxu1 %v9995_v25  ;;  %v8991_v25 = vcombine.high %v4599_v16, %v4607_v18 }
0x16b8   : > { %6386 = vmatpush1.bf16.msra.mxu0 %v9098_v26  ;;  %v10017_v26 = vld [vmem:[%s10588_s3 + $0x1c0] ss:$8 sps:$4 sm:$0xff]  }
0x16b9   : > { %6387 = vmatprep.subr.bf16.mxu0 %v9115_v24  ;;  %v4615_v24 = vld [vmem:[%s10578_s1 + $0x2b8] sm:$0xff] }
0x16ba   : > { %8140 = vmatpush1.bf16.msra.mxu1 %v9993_v27  ;;  %v4623_v27 = vld [vmem:[%s10578_s1 + $0x2f8] sm:$0xff] }
0x16bb   : > { %8141 = vmatprep.subr.bf16.mxu1 %v9998_v30  ;;  %v8990_v30 = vcombine.low %v4599_v16, %v4607_v18  ;;  %v9006_v40 = vcombine.low %v4615_v24, %v4623_v27 }
0x16bc   : > { %6388 = vmatpush1.bf16.msra.mxu0 %v9114_v12  ;;  %v4810_v12 = vsub.s32 5, %v10737_v50 }
0x16bd   : > { %6389 = vmatprep.subr.bf16.mxu0 %v9131_v31  ;;  %v9007_v31 = vcombine.high %v4615_v24, %v4623_v27 }
0x16be   : > { %8142 = vmatpush1.bf16.msra.mxu1 %v9996_v32  ;;  %v10020_v32 = vld [vmem:[%s10588_s3 + $0x1d0] ss:$8 sps:$4 sm:$0xff]   ;;  %v4843_v59 = vrot.slane %v11499_v52, %v4810_v12 }
0x16bf   : > { %8143 = vmatprep.subr.bf16.mxu1 %v10001_v36  ;;  %v4799_v36 = vrot.slane %v11496_v61, %v10789_v9 }
0x16c0   : > { %6390 = vmatpush1.bf16.msra.mxu0 %v9130_v37  ;;  %v4839_v37 = vrot.slane %v11499_v52, %v4806_v28 }
0x16c1   : > { %6391 = vmatprep.subr.bf16.mxu0 %v9147_v38  ;;  %v10025_v38 = vld [vmem:[%s10588_s3 + $0x1e4] ss:$8 sps:$4 sm:$0xff]  }
0x16c2   : > { %8144 = vmatpush1.bf16.msra.mxu1 %v9999_v39  ;;  %v4803_v39 = vrot.slane %v11496_v61, %v10792_v10 }
0x16c3   : > { %8145 = vmatprep.subr.bf16.mxu1 %v10004_v14  ;;  %v9023_v14 = vcombine.high %v4631_v33, %v4639_v35 }
0x16c4   : > { %6392 = vmatpush1.bf16.msra.mxu0 %v9146_v42 }
0x16c5   : > { %6393 = vmatprep.subr.bf16.mxu0 %v9163_v29 }
0x16c6   : > { %8146 = vmatpush1.bf16.msra.mxu1 %v10002_v3  ;;  %v10023_v3 = vld [vmem:[%s10588_s3 + $0x1e0] ss:$8 sps:$4 sm:$0xff]  }
0x16c7   : > { %8147 = vmatprep.subr.bf16.mxu1 %v10007_v45 }
0x16c8   : > { %6394 = vmatpush1.bf16.msra.mxu0 %v9162_v57 }
0x16c9   : > { %6449 = vmatprep.subr.bf16.mxu0 %v8927_v1 }
0x16ca   : > { %8148 = vmatpush1.bf16.msra.mxu1 %v10005_v11 }
0x16cb   : > { %6396 = vmatmul.mubr.bf16.vlgmr.msra.gmra.mrb[64].mxu0 %v11311_v43  ;;  %8149 = vmatprep.subr.bf16.mxu1 %v10010_v62 }
0x16cc   : > { %6450 = vmatpush1.bf16.msra.mxu0 %v8926_v47  ;;  %6481 = vmatprep.mubr.bf16.mxu0 %v11315_v44  ;;  %v10014_v44 = vld [vmem:[%s10588_s3 + $0x1b0] ss:$8 sps:$4 sm:$0xff]  }
0x16cd   : > { %6451 = vmatprep.subr.bf16.mxu0 %v8943_v8  ;;  %v9022_v8 = vcombine.low %v4631_v33, %v4639_v35  ;;  %v10029_v33 = vld [vmem:[%s10588_s3 + $0x200] ss:$8 sps:$4 sm:$0xff]   ;;  %v4679_v35 = vld [vmem:[%s10578_s1 + $0x4b8] sm:$0xff] }
0x16ce   : > { %8150 = vmatpush1.bf16.msra.mxu1 %v10008_v49 }
0x16cf   : > { %8151 = vmatprep.subr.bf16.mxu1 %v10013_v54 }
0x16d0   : > { %6452 = vmatpush1.bf16.msra.mxu0 %v8942_v55  ;;  %v9039_v55 = vcombine.high %v4647_v13, %v4655_v15  ;;  %v10035_v13 = vld [vmem:[%s10588_s3 + $0x220] ss:$8 sps:$4 sm:$0xff]   ;;  %v4711_v15 = vld [vmem:[%s10578_s1 + $0x5b8] sm:$0xff] }
0x16d1   : > { %6453 = vmatprep.subr.bf16.mxu0 %v8959_v60 }
0x16d2   : > { %8152 = vmatpush1.bf16.msra.mxu1 %v10011_v0 }
0x16d3   : > { %8153 = vmatprep.subr.bf16.mxu1 %v10016_v19  ;;  %v4663_v19 = vld [vmem:[%s10578_s1 + $0x438] sm:$0xff] }
0x16d4   : > { %6454 = vmatpush1.bf16.msra.mxu0 %v8958_v4  ;;  %v4671_v4 = vld [vmem:[%s10578_s1 + $0x478] sm:$0xff] }
0x16d5   : > { %6455 = vmatprep.subr.bf16.mxu0 %v8975_v2 }
0x16d6   : > { %8154 = vmatpush1.bf16.msra.mxu1 %v10014_v44 }
0x16d7   : > { %8155 = vmatprep.subr.bf16.mxu1 %v10019_v22  ;;  %v10031_v22 = vld [vmem:[%s10588_s3 + $0x204] ss:$8 sps:$4 sm:$0xff]  }
0x16d8   : > { %6456 = vmatpush1.bf16.msra.mxu0 %v8974_v23 }
0x16d9   : > { %6457 = vmatprep.subr.bf16.mxu0 %v8991_v25 }
0x16da   : > { %8156 = vmatpush1.bf16.msra.mxu1 %v10017_v26 }
0x16db   : > { %8157 = vmatprep.subr.bf16.mxu1 %v10022_v48 }
0x16dc   : > { %6458 = vmatpush1.bf16.msra.mxu0 %v8990_v30  ;;  %v9055_v30 = vcombine.high %v4663_v19, %v4671_v4 }
0x16dd   : > { %6459 = vmatprep.subr.bf16.mxu0 %v9007_v31 }
0x16de   : > { %v6225_v42 = vpop.f32.mrb[52].mxu0  ;;  %v6440_v29 = vpop.f32.mrb[40].mxu1  ;;  %8158 = vmatpush1.bf16.msra.mxu1 %v10020_v32 }
0x16df   : > { %v6226_v45 = vadd.f32 %v6225_v42, %v4799_v36  ;;  %v6441_v57 = vadd.f32 %v6440_v29, %v4839_v37  ;;  %v6227_v1 = vpop.f32.mrb[53].mxu0  ;;  %v6442_v11 = vpop.f32.mrb[41].mxu1  ;;  %8159 = vmatprep.subr.bf16.mxu1 %v10025_v38  ;;  %v9054_v38 = vcombine.low %v4663_v19, %v4671_v4  ;;  %v10037_v42 = vld [vmem:[%s10588_s3 + $0x224] ss:$8 sps:$4 sm:$0xff]  }
0x16e0   : > { %v6228_v46 = vadd.f32 %v6227_v1, %v4803_v39  ;;  %v6443_v62 = vadd.f32 %v6442_v11, %v4843_v59  ;;  %v6229_v52 = vpop.f32.mrb[54].mxu0  ;;  %v6444_v47 = vpop.f32.mrb[42].mxu1  ;;  %6460 = vmatpush1.bf16.msra.mxu0 %v9006_v40  ;;  %v4695_v40 = vld [vmem:[%s10578_s1 + $0x538] sm:$0xff]  ;;  %v10049_v19 = vld [vmem:[%s10588_s3 + $0x264] ss:$8 sps:$4 sm:$0xff]  }
0x16e1   : > { %v6230_v49 = vadd.f32 %v6229_v52, %v4799_v36  ;;  %v6445_v58 = vadd.f32 %v6444_v47, %v4839_v37  ;;  %v6231_v17 = vpop.f32.mrb[55].mxu0  ;;  %v6446_v54 = vpop.f32.mrb[43].mxu1  ;;  %6461 = vmatprep.subr.bf16.mxu0 %v9023_v14  ;;  %v6494_v2 = vmax.f32 %v6226_v45, 0.0  ;;  %v6504_v44 = vmax.f32 %v6441_v57, 0.0  ;;  %v4687_v36 = vld [vmem:[%s10578_s1 + $0x4f8] sm:$0xff] }
0x16e2   : > { %v6232_v60 = vadd.f32 %v6231_v17, %v4803_v39  ;;  %v6447_v0 = vadd.f32 %v6446_v54, %v4843_v59  ;;  %8160 = vmatpush1.bf16.msra.mxu1 %v10023_v3  ;;  %v6495_v23 = vmax.f32 %v6228_v46, 0.0  ;;  %v6505_v25 = vmax.f32 %v6443_v62, 0.0  ;;  %v10034_v37 = vld [vmem:[%s10588_s3 + $0x214] ss:$8 sps:$4 sm:$0xff]   ;;  %v10032_v59 = vld [vmem:[%s10588_s3 + $0x210] ss:$8 sps:$4 sm:$0xff]  }
0x16e3   : > { %v6510_v16 = vmax.f32 %v6230_v49, 0.0  ;;  %v6520_v18 = vmax.f32 %v6445_v58, 0.0  ;;  %8161 = vmatprep.subr.bf16.mxu1 %v10028_v5  ;;  %v9071_v39 = vcombine.high %v4679_v35, %v4687_v36  ;;  %v4703_v14 = vld [vmem:[%s10578_s1 + $0x578] sm:$0xff]  ;;  %v9070_v29 = vcombine.low %v4679_v35, %v4687_v36  ;;  %v10043_v52 = vld [vmem:[%s10588_s3 + $0x244] ss:$8 sps:$4 sm:$0xff]  }
0x16e4   : > { %v6511_v26 = vmax.f32 %v6232_v60, 0.0  ;;  %v6521_v24 = vmax.f32 %v6447_v0, 0.0  ;;  %6462 = vmatpush1.bf16.msra.mxu0 %v9022_v8  ;;  %v9087_v3 = vcombine.high %v4695_v40, %v4703_v14  ;;  %v4719_v45 = vld [vmem:[%s10578_s1 + $0x5f8] sm:$0xff]  ;;  %v9086_v1 = vcombine.low %v4695_v40, %v4703_v14  ;;  %v10041_v49 = vld [vmem:[%s10588_s3 + $0x240] ss:$8 sps:$4 sm:$0xff]  }
0x16e5   : > { %v6526_v27 = vpack.c.bf16 %v6510_v16, %v6494_v2  ;;  %v11597_v48 = vpack.c.bf16 %v6520_v18, %v6504_v44  ;;  %6463 = vmatprep.subr.bf16.mxu0 %v9039_v55  ;;  %v10040_v57 = vld [vmem:[%s10588_s3 + $0x234] ss:$8 sps:$4 sm:$0xff]   ;;  %v9103_v11 = vcombine.high %v4711_v15, %v4719_v45  ;;  %v10038_v5 = vld [vmem:[%s10588_s3 + $0x230] ss:$8 sps:$4 sm:$0xff]   ;;  %v9102_v47 = vcombine.low %v4711_v15, %v4719_v45  ;;  %v10047_v44 = vld [vmem:[%s10588_s3 + $0x260] ss:$8 sps:$4 sm:$0xff]  }
0x16e6   : > { %v6527_v31 = vpack.c.bf16 %v6511_v26, %v6495_v23  ;;  %v11599_v32 = vpack.c.bf16 %v6521_v24, %v6505_v25  ;;  %8162 = vmatpush1.bf16.msra.mxu1 %v10026_v7  ;;  %v4727_v46 = vld [vmem:[%s10578_s1 + $0x638] sm:$0xff]  ;;  %v10055_v24 = vld [vmem:[%s10588_s3 + $0x284] ss:$8 sps:$4 sm:$0xff]   ;;  %v10059_v36 = vld [vmem:[%s10588_s3 + $0x2a0] ss:$8 sps:$4 sm:$0xff]   ;;  %v4807_v14 = vrot.slane %v11496_v61, %v4806_v28 }
0x16e7   : > { %8174 = vmatprep.subr.bf16.mxu1 %v10031_v22  ;;  %v4735_v62 = vld [vmem:[%s10578_s1 + $0x678] sm:$0xff]  ;;  %v10061_v35 = vld [vmem:[%s10588_s3 + $0x2a4] ss:$8 sps:$4 sm:$0xff]  }
0x16e8   : > { %6464 = vmatpush1.bf16.msra.mxu0 %v9038_v6  ;;  %8163 = vmatprep.mubr.bf16.mxu1 %v6527_v31  ;;  %v9119_v8 = vcombine.high %v4727_v46, %v4735_v62  ;;  %v4743_v58 = vld [vmem:[%s10578_s1 + $0x6b8] sm:$0xff]  ;;  %v9118_v55 = vcombine.low %v4727_v46, %v4735_v62 }
0x16e9   : > { %8164 = vmatmul.mubr.bf16.vlgmr.msra.gmra.mrb[44].mxu1 %v6526_v27  ;;  %6465 = vmatprep.subr.bf16.mxu0 %v9055_v30  ;;  %v4751_v17 = vld [vmem:[%s10578_s1 + $0x6f8] sm:$0xff]  ;;  %v10053_v30 = vld [vmem:[%s10588_s3 + $0x280] ss:$8 sps:$4 sm:$0xff]  }
0x16ea   : > { %8175 = vmatpush1.bf16.msra.mxu1 %v10029_v33  ;;  %v10046_v54 = vld [vmem:[%s10588_s3 + $0x254] ss:$8 sps:$4 sm:$0xff]   ;;  %v9135_v60 = vcombine.high %v4743_v58, %v4751_v17  ;;  %v10044_v0 = vld [vmem:[%s10588_s3 + $0x250] ss:$8 sps:$4 sm:$0xff]   ;;  %v9134_v4 = vcombine.low %v4743_v58, %v4751_v17 }
0x16eb   : > { %8176 = vmatprep.subr.bf16.mxu1 %v10034_v37  ;;  %v4759_v7 = vld [vmem:[%s10578_s1 + $0x738] sm:$0xff] }
0x16ec   : > { %6466 = vmatpush1.bf16.msra.mxu0 %v9054_v38  ;;  %v4767_v6 = vld [vmem:[%s10578_s1 + $0x778] sm:$0xff] }
0x16ed   : > { %6467 = vmatprep.subr.bf16.mxu0 %v9071_v39  ;;  %v9151_v2 = vcombine.high %v4759_v7, %v4767_v6  ;;  %v4775_v16 = vld [vmem:[%s10578_s1 + $0x7b8] sm:$0xff]  ;;  %v9150_v23 = vcombine.low %v4759_v7, %v4767_v6  ;;  %v10067_v39 = vld [vmem:[%s10588_s3 + $0x2c4] ss:$8 sps:$4 sm:$0xff]   ;;  %v10083_v7 = vld [vmem:[%s10588_s3 + $0x320] ss:$8 sps:$4 sm:$0xff]  }
0x16ee   : > { %8177 = vmatpush1.bf16.msra.mxu1 %v10032_v59  ;;  %v4783_v18 = vld [vmem:[%s10578_s1 + $0x7f8] sm:$0xff]  ;;  %v10065_v59 = vld [vmem:[%s10588_s3 + $0x2c0] ss:$8 sps:$4 sm:$0xff]  }
0x16ef   : > { %8178 = vmatprep.subr.bf16.mxu1 %v10037_v42  ;;  %v10052_v22 = vld [vmem:[%s10588_s3 + $0x274] ss:$8 sps:$4 sm:$0xff]   ;;  %v9167_v25 = vcombine.high %v4775_v16, %v4783_v18  ;;  %v10050_v26 = vld [vmem:[%s10588_s3 + $0x270] ss:$8 sps:$4 sm:$0xff]   ;;  %v9166_v27 = vcombine.low %v4775_v16, %v4783_v18  ;;  %v10073_v42 = vld [vmem:[%s10588_s3 + $0x2e4] ss:$8 sps:$4 sm:$0xff]  }
0x16f0   : > { %6468 = vmatpush1.bf16.msra.mxu0 %v9070_v29  ;;  %v10058_v31 = vld [vmem:[%s10588_s3 + $0x294] ss:$8 sps:$4 sm:$0xff]   ;;  %v10056_v33 = vld [vmem:[%s10588_s3 + $0x290] ss:$8 sps:$4 sm:$0xff]   ;;  %v4811_v29 = vrot.slane %v11496_v61, %v4810_v12  ;;  %v10097_v18 = vld [vmem:[%s10588_s3 + $0x364] ss:$8 sps:$4 sm:$0xff]  }
0x16f1   : > { %6469 = vmatprep.subr.bf16.mxu0 %v9087_v3  ;;  %v10064_v37 = vld [vmem:[%s10588_s3 + $0x2b4] ss:$8 sps:$4 sm:$0xff]   ;;  %v10062_v38 = vld [vmem:[%s10588_s3 + $0x2b0] ss:$8 sps:$4 sm:$0xff]  }
0x16f2   : > { %8179 = vmatpush1.bf16.msra.mxu1 %v10035_v13  ;;  %v10070_v40 = vld [vmem:[%s10588_s3 + $0x2d4] ss:$8 sps:$4 sm:$0xff]   ;;  %v10071_v13 = vld [vmem:[%s10588_s3 + $0x2e0] ss:$8 sps:$4 sm:$0xff]   ;;  %v10074_v62 = vld [vmem:[%s10588_s3 + $0x2f0] ss:$8 sps:$4 sm:$0xff]  }
0x16f3   : > { %8180 = vmatprep.subr.bf16.mxu1 %v10040_v57  ;;  %v10076_v57 = vld [vmem:[%s10588_s3 + $0x2f4] ss:$8 sps:$4 sm:$0xff]   ;;  %v10092_v16 = vld [vmem:[%s10588_s3 + $0x350] ss:$8 sps:$4 sm:$0xff]  }
0x16f4   : > { %6470 = vmatpush1.bf16.msra.mxu0 %v9086_v1  ;;  %v10088_v6 = vld [vmem:[%s10588_s3 + $0x334] ss:$8 sps:$4 sm:$0xff]  }
0x16f5   : > { %6471 = vmatprep.subr.bf16.mxu0 %v9103_v11 }
0x16f6   : > { %8181 = vmatpush1.bf16.msra.mxu1 %v10038_v5 }
0x16f7   : > { %8182 = vmatprep.subr.bf16.mxu1 %v10043_v52 }
0x16f8   : > { %6472 = vmatpush1.bf16.msra.mxu0 %v9102_v47  ;;  %v10079_v47 = vld [vmem:[%s10588_s3 + $0x304] ss:$8 sps:$4 sm:$0xff]  }
0x16f9   : > { %6473 = vmatprep.subr.bf16.mxu0 %v9119_v8 }
0x16fa   : > { %8183 = vmatpush1.bf16.msra.mxu1 %v10041_v49 }
0x16fb   : > { %8184 = vmatprep.subr.bf16.mxu1 %v10046_v54  ;;  %v10077_v54 = vld [vmem:[%s10588_s3 + $0x300] ss:$8 sps:$4 sm:$0xff]  }
0x16fc   : > { %6474 = vmatpush1.bf16.msra.mxu0 %v9118_v55  ;;  %v10082_v55 = vld [vmem:[%s10588_s3 + $0x314] ss:$8 sps:$4 sm:$0xff]  }
0x16fd   : > { %6475 = vmatprep.subr.bf16.mxu0 %v9135_v60  ;;  %v10080_v60 = vld [vmem:[%s10588_s3 + $0x310] ss:$8 sps:$4 sm:$0xff]  }
0x16fe   : > { %8185 = vmatpush1.bf16.msra.mxu1 %v10044_v0  ;;  %v10085_v0 = vld [vmem:[%s10588_s3 + $0x324] ss:$8 sps:$4 sm:$0xff]  }
0x16ff   : > { %8186 = vmatprep.subr.bf16.mxu1 %v10049_v19  ;;  %v10086_v19 = vld [vmem:[%s10588_s3 + $0x330] ss:$8 sps:$4 sm:$0xff]  }
0x1700   : > { %6476 = vmatpush1.bf16.msra.mxu0 %v9134_v4  ;;  %v10091_v4 = vld [vmem:[%s10588_s3 + $0x344] ss:$8 sps:$4 sm:$0xff]  }
0x1701   : > { %6477 = vmatprep.subr.bf16.mxu0 %v9151_v2  ;;  %v10089_v2 = vld [vmem:[%s10588_s3 + $0x340] ss:$8 sps:$4 sm:$0xff]  }
0x1702   : > { %8187 = vmatpush1.bf16.msra.mxu1 %v10047_v44  ;;  %v10094_v44 = vld [vmem:[%s10588_s3 + $0x354] ss:$8 sps:$4 sm:$0xff]  }
0x1703   : > { %8188 = vmatprep.subr.bf16.mxu1 %v10052_v22  ;;  %v10095_v22 = vld [vmem:[%s10588_s3 + $0x360] ss:$8 sps:$4 sm:$0xff]  }
0x1704   : > { %6478 = vmatpush1.bf16.msra.mxu0 %v9150_v23  ;;  %v10100_v23 = vld [vmem:[%s10588_s3 + $0x374] ss:$8 sps:$4 sm:$0xff]  }
0x1705   : > { %6479 = vmatprep.subr.bf16.mxu0 %v9167_v25  ;;  %v10098_v25 = vld [vmem:[%s10588_s3 + $0x370] ss:$8 sps:$4 sm:$0xff]  }
0x1706   : > { %8189 = vmatpush1.bf16.msra.mxu1 %v10050_v26  ;;  %v10103_v26 = vld [vmem:[%s10588_s3 + $0x384] ss:$8 sps:$4 sm:$0xff]  }
0x1707   : > { %8190 = vmatprep.subr.bf16.mxu1 %v10055_v24  ;;  %v10101_v24 = vld [vmem:[%s10588_s3 + $0x380] ss:$8 sps:$4 sm:$0xff]  }
0x1708   : > { %6480 = vmatpush1.bf16.msra.mxu0 %v9166_v27  ;;  %v10106_v27 = vld [vmem:[%s10588_s3 + $0x394] ss:$8 sps:$4 sm:$0xff]  }
0x170a   : > { %8191 = vmatpush1.bf16.msra.mxu1 %v10053_v30  ;;  %v10104_v30 = vld [vmem:[%s10588_s3 + $0x390] ss:$8 sps:$4 sm:$0xff]  }
0x170b   : > { %6482 = vmatmul.mubr.bf16.vlgmr.msra.gmra.mrb[68].mxu0 %v11311_v43  ;;  %8192 = vmatprep.subr.bf16.mxu1 %v10058_v31  ;;  %v10068_v43 = vld [vmem:[%s10588_s3 + $0x2d0] ss:$8 sps:$4 sm:$0xff]   ;;  %v10109_v31 = vld [vmem:[%s10588_s3 + $0x3a4] ss:$8 sps:$4 sm:$0xff]  }
0x170e   : > { %8193 = vmatpush1.bf16.msra.mxu1 %v10056_v33  ;;  %v10107_v33 = vld [vmem:[%s10588_s3 + $0x3a0] ss:$8 sps:$4 sm:$0xff]  }
0x170f   : > { %8194 = vmatprep.subr.bf16.mxu1 %v10061_v35  ;;  %v10112_v35 = vld [vmem:[%s10588_s3 + $0x3b4] ss:$8 sps:$4 sm:$0xff]  }
0x1712   : > { %8195 = vmatpush1.bf16.msra.mxu1 %v10059_v36  ;;  %v10110_v36 = vld [vmem:[%s10588_s3 + $0x3b0] ss:$8 sps:$4 sm:$0xff]  }
0x1713   : > { %8196 = vmatprep.subr.bf16.mxu1 %v10064_v37  ;;  %v10115_v37 = vld [vmem:[%s10588_s3 + $0x3c4] ss:$8 sps:$4 sm:$0xff]  }
0x1716   : > { %8197 = vmatpush1.bf16.msra.mxu1 %v10062_v38  ;;  %v10113_v38 = vld [vmem:[%s10588_s3 + $0x3c0] ss:$8 sps:$4 sm:$0xff]  }
0x1717   : > { %8198 = vmatprep.subr.bf16.mxu1 %v10067_v39  ;;  %v10118_v39 = vld [vmem:[%s10588_s3 + $0x3d4] ss:$8 sps:$4 sm:$0xff]  }
0x171a   : > { %8199 = vmatpush1.bf16.msra.mxu1 %v10065_v59  ;;  %v4814_v59 = vsub.s32 6, %v10737_v50 }
0x171b   : > { %8200 = vmatprep.subr.bf16.mxu1 %v10070_v40  ;;  %v4818_v40 = vsub.s32 7, %v10737_v50 }
0x171e   : > { %v6268_v3 = vpop.f32.mrb[56].mxu0  ;;  %8201 = vmatpush1.bf16.msra.mxu1 %v10068_v43  ;;  %v10116_v43 = vld [vmem:[%s10588_s3 + $0x3d0] ss:$8 sps:$4 sm:$0xff]  }
0x171f   : > { %v6269_v15 = vadd.f32 %v6268_v3, %v4807_v14  ;;  %v6270_v45 = vpop.f32.mrb[57].mxu0  ;;  %8202 = vmatprep.subr.bf16.mxu1 %v10073_v42  ;;  %v10121_v42 = vld [vmem:[%s10588_s3 + $0x3e4] ss:$8 sps:$4 sm:$0xff]  }
0x1720   : > { %v6271_v1 = vadd.f32 %v6270_v45, %v4811_v29  ;;  %v6272_v11 = vpop.f32.mrb[58].mxu0 }
0x1721   : > { %v6273_v5 = vadd.f32 %v6272_v11, %v4807_v14  ;;  %v6274_v28 = vpop.f32.mrb[59].mxu0  ;;  %v6496_v52 = vmax.f32 %v6269_v15, 0.0  ;;  %v4815_v14 = vrot.slane %v11496_v61, %v4814_v59 }
0x1722   : > { %v6275_v46 = vadd.f32 %v6274_v28, %v4811_v29  ;;  %8203 = vmatpush1.bf16.msra.mxu1 %v10071_v13  ;;  %v6497_v8 = vmax.f32 %v6271_v1, 0.0  ;;  %v4819_v29 = vrot.slane %v11496_v61, %v4818_v40  ;;  %v10119_v13 = vld [vmem:[%s10588_s3 + $0x3e0] ss:$8 sps:$4 sm:$0xff]  }
0x1723   : > { %v6512_v12 = vmax.f32 %v6273_v5, 0.0  ;;  %8204 = vmatprep.subr.bf16.mxu1 %v10076_v57  ;;  %v10124_v57 = vld [vmem:[%s10588_s3 + $0x3f4] ss:$8 sps:$4 sm:$0xff]  }
0x1724   : > { %v6513_v49 = vmax.f32 %v6275_v46, 0.0 }
0x1725   : > { %v6528_v58 = vpack.c.bf16 %v6512_v12, %v6496_v52  ;;  %v10127_v12 = vld [vmem:[%s10588_s3 + $0x404] ss:$8 sps:$4 sm:$0xff]  }
0x1726   : > { %v6529_v17 = vpack.c.bf16 %v6513_v49, %v6497_v8  ;;  %8205 = vmatpush1.bf16.msra.mxu1 %v10074_v62  ;;  %v10122_v62 = vld [vmem:[%s10588_s3 + $0x3f0] ss:$8 sps:$4 sm:$0xff]  }
0x1727   : > { %8217 = vmatprep.subr.bf16.mxu1 %v10079_v47 }
0x1728   : > { %8206 = vmatprep.mubr.bf16.mxu1 %v6529_v17  ;;  %v10125_v17 = vld [vmem:[%s10588_s3 + $0x400] ss:$8 sps:$4 sm:$0xff]  }
0x1729   : > { %8207 = vmatmul.mubr.bf16.vlgmr.msra.gmra.mrb[44].mxu1 %v6528_v58 }
0x172a   : > { %8218 = vmatpush1.bf16.msra.mxu1 %v10077_v54  ;;  %v10130_v54 = vld [vmem:[%s10588_s3 + $0x414] ss:$8 sps:$4 sm:$0xff]  }
0x172b   : > { %8219 = vmatprep.subr.bf16.mxu1 %v10082_v55  ;;  %v10128_v55 = vld [vmem:[%s10588_s3 + $0x410] ss:$8 sps:$4 sm:$0xff]  }
0x172e   : > { %8220 = vmatpush1.bf16.msra.mxu1 %v10080_v60  ;;  %v10133_v60 = vld [vmem:[%s10588_s3 + $0x424] ss:$8 sps:$4 sm:$0xff]  }
0x172f   : > { %8221 = vmatprep.subr.bf16.mxu1 %v10085_v0  ;;  %v10131_v0 = vld [vmem:[%s10588_s3 + $0x420] ss:$8 sps:$4 sm:$0xff]  }
0x1732   : > { %8222 = vmatpush1.bf16.msra.mxu1 %v10083_v7  ;;  %v10136_v7 = vld [vmem:[%s10588_s3 + $0x434] ss:$8 sps:$4 sm:$0xff]  }
0x1733   : > { %8223 = vmatprep.subr.bf16.mxu1 %v10088_v6  ;;  %v10134_v6 = vld [vmem:[%s10588_s3 + $0x430] ss:$8 sps:$4 sm:$0xff]  }
0x1736   : > { %8224 = vmatpush1.bf16.msra.mxu1 %v10086_v19  ;;  %v10139_v19 = vld [vmem:[%s10588_s3 + $0x444] ss:$8 sps:$4 sm:$0xff]  }
0x1737   : > { %8225 = vmatprep.subr.bf16.mxu1 %v10091_v4  ;;  %v10137_v4 = vld [vmem:[%s10588_s3 + $0x440] ss:$8 sps:$4 sm:$0xff]  }
0x173a   : > { %8226 = vmatpush1.bf16.msra.mxu1 %v10089_v2  ;;  %v10140_v2 = vld [vmem:[%s10588_s3 + $0x450] ss:$8 sps:$4 sm:$0xff]  }
0x173b   : > { %8227 = vmatprep.subr.bf16.mxu1 %v10094_v44  ;;  %v10145_v44 = vld [vmem:[%s10588_s3 + $0x464] ss:$8 sps:$4 sm:$0xff]  }
0x173e   : > { %8228 = vmatpush1.bf16.msra.mxu1 %v10092_v16  ;;  %v10143_v16 = vld [vmem:[%s10588_s3 + $0x460] ss:$8 sps:$4 sm:$0xff]  }
0x173f   : > { %8229 = vmatprep.subr.bf16.mxu1 %v10097_v18  ;;  %v10148_v18 = vld [vmem:[%s10588_s3 + $0x474] ss:$8 sps:$4 sm:$0xff]  }
0x1742   : > { %8230 = vmatpush1.bf16.msra.mxu1 %v10095_v22  ;;  %v10146_v22 = vld [vmem:[%s10588_s3 + $0x470] ss:$8 sps:$4 sm:$0xff]  }
0x1743   : > { %8231 = vmatprep.subr.bf16.mxu1 %v10100_v23  ;;  %v10151_v23 = vld [vmem:[%s10588_s3 + $0x484] ss:$8 sps:$4 sm:$0xff]  }
0x1746   : > { %8232 = vmatpush1.bf16.msra.mxu1 %v10098_v25  ;;  %v10149_v25 = vld [vmem:[%s10588_s3 + $0x480] ss:$8 sps:$4 sm:$0xff]  }
0x1747   : > { %8233 = vmatprep.subr.bf16.mxu1 %v10103_v26  ;;  %v10154_v26 = vld [vmem:[%s10588_s3 + $0x494] ss:$8 sps:$4 sm:$0xff]  }
0x174a   : > { %8234 = vmatpush1.bf16.msra.mxu1 %v10101_v24  ;;  %v10152_v24 = vld [vmem:[%s10588_s3 + $0x490] ss:$8 sps:$4 sm:$0xff]  }
0x174b   : > { %8235 = vmatprep.subr.bf16.mxu1 %v10106_v27  ;;  %v10157_v27 = vld [vmem:[%s10588_s3 + $0x4a4] ss:$8 sps:$4 sm:$0xff]  }
0x174e   : > { %8236 = vmatpush1.bf16.msra.mxu1 %v10104_v30  ;;  %v10155_v30 = vld [vmem:[%s10588_s3 + $0x4a0] ss:$8 sps:$4 sm:$0xff]  }
0x174f   : > { %8237 = vmatprep.subr.bf16.mxu1 %v10109_v31  ;;  %v10160_v31 = vld [vmem:[%s10588_s3 + $0x4b4] ss:$8 sps:$4 sm:$0xff]  }
0x1752   : > { %8238 = vmatpush1.bf16.msra.mxu1 %v10107_v33  ;;  %v10158_v33 = vld [vmem:[%s10588_s3 + $0x4b0] ss:$8 sps:$4 sm:$0xff]  }
0x1753   : > { %8239 = vmatprep.subr.bf16.mxu1 %v10112_v35  ;;  %v10163_v35 = vld [vmem:[%s10588_s3 + $0x4c4] ss:$8 sps:$4 sm:$0xff]  }
0x1756   : > { %8240 = vmatpush1.bf16.msra.mxu1 %v10110_v36  ;;  %v10161_v36 = vld [vmem:[%s10588_s3 + $0x4c0] ss:$8 sps:$4 sm:$0xff]  }
0x1757   : > { %8241 = vmatprep.subr.bf16.mxu1 %v10115_v37  ;;  %v10166_v37 = vld [vmem:[%s10588_s3 + $0x4d4] ss:$8 sps:$4 sm:$0xff]  }
0x175a   : > { %8242 = vmatpush1.bf16.msra.mxu1 %v10113_v38  ;;  %v10164_v38 = vld [vmem:[%s10588_s3 + $0x4d0] ss:$8 sps:$4 sm:$0xff]  }
0x175b   : > { %8243 = vmatprep.subr.bf16.mxu1 %v10118_v39  ;;  %v11723_v39 = vld [vmem:[%s10583_s29 + $0x8] sm:$0xff] }
0x175e   : > { %v6311_v3 = vpop.f32.mrb[60].mxu0  ;;  %8244 = vmatpush1.bf16.msra.mxu1 %v10116_v43  ;;  %v4831_v43 = vrot.slane %v11723_v39, %v10789_v9 }
0x175f   : > { %v6312_v15 = vadd.f32 %v6311_v3, %v4815_v14  ;;  %v6313_v45 = vpop.f32.mrb[61].mxu0  ;;  %8245 = vmatprep.subr.bf16.mxu1 %v10121_v42  ;;  %v4835_v42 = vrot.slane %v11723_v39, %v10792_v10  ;;  %v10167_v3 = vld [vmem:[%s10588_s3 + $0x4e0] ss:$8 sps:$4 sm:$0xff]  }
0x1760   : > { %v6314_v1 = vadd.f32 %v6313_v45, %v4819_v29  ;;  %v6315_v11 = vpop.f32.mrb[62].mxu0  ;;  %v10172_v45 = vld [vmem:[%s10588_s3 + $0x4f4] ss:$8 sps:$4 sm:$0xff]  }
0x1761   : > { %v6316_v5 = vadd.f32 %v6315_v11, %v4815_v14  ;;  %v6317_v28 = vpop.f32.mrb[63].mxu0  ;;  %v6498_v52 = vmax.f32 %v6312_v15, 0.0  ;;  %v10169_v14 = vld [vmem:[%s10588_s3 + $0x4e4] ss:$8 sps:$4 sm:$0xff]  }
0x1762   : > { %v6318_v46 = vadd.f32 %v6317_v28, %v4819_v29  ;;  %8246 = vmatpush1.bf16.msra.mxu1 %v10119_v13  ;;  %v6499_v47 = vmax.f32 %v6314_v1, 0.0  ;;  %v10170_v28 = vld [vmem:[%s10588_s3 + $0x4f0] ss:$8 sps:$4 sm:$0xff]  }
0x1763   : > { %v6514_v61 = vmax.f32 %v6316_v5, 0.0  ;;  %8247 = vmatprep.subr.bf16.mxu1 %v10124_v57 }
0x1764   : > { %v6515_v8 = vmax.f32 %v6318_v46, 0.0 }
0x1765   : > { %v6530_v49 = vpack.c.bf16 %v6514_v61, %v6498_v52 }
0x1766   : > { %v6531_v58 = vpack.c.bf16 %v6515_v8, %v6499_v47  ;;  %8248 = vmatpush1.bf16.msra.mxu1 %v10122_v62  ;;  %v10175_v62 = vld [vmem:[%s10588_s3 + $0x504] ss:$8 sps:$4 sm:$0xff]   ;;  %v10173_v8 = vld [vmem:[%s10588_s3 + $0x500] ss:$8 sps:$4 sm:$0xff]  }
0x1767   : > { %8260 = vmatprep.subr.bf16.mxu1 %v10127_v12 }
0x1768   : > { %8249 = vmatprep.mubr.bf16.mxu1 %v6531_v58  ;;  %v10176_v58 = vld [vmem:[%s10588_s3 + $0x510] ss:$8 sps:$4 sm:$0xff]  }
0x1769   : > { %8250 = vmatmul.mubr.bf16.vlgmr.msra.gmra.mrb[44].mxu1 %v6530_v49  ;;  %v10178_v49 = vld [vmem:[%s10588_s3 + $0x514] ss:$8 sps:$4 sm:$0xff]  }
0x176a   : > { %8261 = vmatpush1.bf16.msra.mxu1 %v10125_v17  ;;  %8292 = vmatprep.mubr.bf16.mxu1 %v11517_v41  ;;  %v10142_v41 = vld [vmem:[%s10588_s3 + $0x454] ss:$8 sps:$4 sm:$0xff]   ;;  %v10181_v17 = vld [vmem:[%s10588_s3 + $0x524] ss:$8 sps:$4 sm:$0xff]  }
0x176b   : > { %8262 = vmatprep.subr.bf16.mxu1 %v10130_v54  ;;  %v10179_v54 = vld [vmem:[%s10588_s3 + $0x520] ss:$8 sps:$4 sm:$0xff]  }
0x176e   : > { %8263 = vmatpush1.bf16.msra.mxu1 %v10128_v55  ;;  %v10184_v55 = vld [vmem:[%s10588_s3 + $0x534] ss:$8 sps:$4 sm:$0xff]  }
0x176f   : > { %8264 = vmatprep.subr.bf16.mxu1 %v10133_v60  ;;  %v10182_v60 = vld [vmem:[%s10588_s3 + $0x530] ss:$8 sps:$4 sm:$0xff]  }
0x1772   : > { %8265 = vmatpush1.bf16.msra.mxu1 %v10131_v0  ;;  %v10187_v0 = vld [vmem:[%s10588_s3 + $0x544] ss:$8 sps:$4 sm:$0xff]  }
0x1773   : > { %8266 = vmatprep.subr.bf16.mxu1 %v10136_v7  ;;  %v10190_v7 = vld [vmem:[%s10588_s3 + $0x554] ss:$8 sps:$4 sm:$0xff]  }
0x1776   : > { %8267 = vmatpush1.bf16.msra.mxu1 %v10134_v6  ;;  %v10188_v6 = vld [vmem:[%s10588_s3 + $0x550] ss:$8 sps:$4 sm:$0xff]  }
0x1777   : > { %8268 = vmatprep.subr.bf16.mxu1 %v10139_v19  ;;  %v10193_v19 = vld [vmem:[%s10588_s3 + $0x564] ss:$8 sps:$4 sm:$0xff]  }
0x177a   : > { %8269 = vmatpush1.bf16.msra.mxu1 %v10137_v4  ;;  %v10191_v4 = vld [vmem:[%s10588_s3 + $0x560] ss:$8 sps:$4 sm:$0xff]  }
0x177b   : > { %8270 = vmatprep.subr.bf16.mxu1 %v10142_v41  ;;  %v10196_v41 = vld [vmem:[%s10588_s3 + $0x574] ss:$8 sps:$4 sm:$0xff]  }
0x177e   : > { %8271 = vmatpush1.bf16.msra.mxu1 %v10140_v2  ;;  %v10194_v2 = vld [vmem:[%s10588_s3 + $0x570] ss:$8 sps:$4 sm:$0xff]  }
0x177f   : > { %8272 = vmatprep.subr.bf16.mxu1 %v10145_v44  ;;  %v10199_v44 = vld [vmem:[%s10588_s3 + $0x584] ss:$8 sps:$4 sm:$0xff]  }
0x1782   : > { %8273 = vmatpush1.bf16.msra.mxu1 %v10143_v16  ;;  %v10197_v16 = vld [vmem:[%s10588_s3 + $0x580] ss:$8 sps:$4 sm:$0xff]  }
0x1783   : > { %8274 = vmatprep.subr.bf16.mxu1 %v10148_v18  ;;  %v10202_v18 = vld [vmem:[%s10588_s3 + $0x594] ss:$8 sps:$4 sm:$0xff]  }
0x1786   : > { %8275 = vmatpush1.bf16.msra.mxu1 %v10146_v22  ;;  %v10200_v22 = vld [vmem:[%s10588_s3 + $0x590] ss:$8 sps:$4 sm:$0xff]  }
0x1787   : > { %8276 = vmatprep.subr.bf16.mxu1 %v10151_v23  ;;  %v10205_v23 = vld [vmem:[%s10588_s3 + $0x5a4] ss:$8 sps:$4 sm:$0xff]  }
0x178a   : > { %8277 = vmatpush1.bf16.msra.mxu1 %v10149_v25  ;;  %v10203_v25 = vld [vmem:[%s10588_s3 + $0x5a0] ss:$8 sps:$4 sm:$0xff]  }
0x178b   : > { %8278 = vmatprep.subr.bf16.mxu1 %v10154_v26  ;;  %v10208_v26 = vld [vmem:[%s10588_s3 + $0x5b4] ss:$8 sps:$4 sm:$0xff]  }
0x178e   : > { %8279 = vmatpush1.bf16.msra.mxu1 %v10152_v24  ;;  %v10206_v24 = vld [vmem:[%s10588_s3 + $0x5b0] ss:$8 sps:$4 sm:$0xff]  }
0x178f   : > { %8280 = vmatprep.subr.bf16.mxu1 %v10157_v27  ;;  %v10211_v27 = vld [vmem:[%s10588_s3 + $0x5c4] ss:$8 sps:$4 sm:$0xff]  }
0x1792   : > { %8281 = vmatpush1.bf16.msra.mxu1 %v10155_v30  ;;  %v10209_v30 = vld [vmem:[%s10588_s3 + $0x5c0] ss:$8 sps:$4 sm:$0xff]  }
0x1793   : > { %8282 = vmatprep.subr.bf16.mxu1 %v10160_v31  ;;  %v10214_v31 = vld [vmem:[%s10588_s3 + $0x5d4] ss:$8 sps:$4 sm:$0xff]  }
0x1796   : > { %8283 = vmatpush1.bf16.msra.mxu1 %v10158_v33  ;;  %v10212_v33 = vld [vmem:[%s10588_s3 + $0x5d0] ss:$8 sps:$4 sm:$0xff]  }
0x1797   : > { %8284 = vmatprep.subr.bf16.mxu1 %v10163_v35  ;;  %v4847_v35 = vrot.slane %v11723_v39, %v4814_v59 }
0x179a   : > { %8285 = vmatpush1.bf16.msra.mxu1 %v10161_v36  ;;  %v10217_v36 = vld [vmem:[%s10588_s3 + $0x5e4] ss:$8 sps:$4 sm:$0xff]  }
0x179b   : > { %8286 = vmatprep.subr.bf16.mxu1 %v10166_v37  ;;  %v4851_v37 = vrot.slane %v11723_v39, %v4818_v40  ;;  %v10223_v39 = vld [vmem:[%s10588_s3 + $0x604] ss:$8 sps:$4 sm:$0xff]  }
0x179e   : > { %v6397_v29 = vpop.f32.mrb[64].mxu0  ;;  %8287 = vmatpush1.bf16.msra.mxu1 %v10164_v38 }
0x179f   : > { %v6398_v13 = vadd.f32 %v6397_v29, %v4831_v43  ;;  %v6399_v15 = vpop.f32.mrb[65].mxu0  ;;  %8288 = vmatprep.subr.bf16.mxu1 %v10169_v14  ;;  %v10220_v29 = vld [vmem:[%s10588_s3 + $0x5f4] ss:$8 sps:$4 sm:$0xff]  }
0x17a0   : > { %v6400_v57 = vadd.f32 %v6399_v15, %v4835_v42  ;;  %v6401_v1 = vpop.f32.mrb[66].mxu0 }
0x17a1   : > { %v6402_v11 = vadd.f32 %v6401_v1, %v4831_v43  ;;  %v6403_v5 = vpop.f32.mrb[67].mxu0  ;;  %v6502_v46 = vmax.f32 %v6398_v13, 0.0  ;;  %v10215_v43 = vld [vmem:[%s10588_s3 + $0x5e0] ss:$8 sps:$4 sm:$0xff]  }
0x17a2   : > { %v6404_v9 = vadd.f32 %v6403_v5, %v4835_v42  ;;  %8289 = vmatpush1.bf16.msra.mxu1 %v10167_v3  ;;  %v6503_v52 = vmax.f32 %v6400_v57, 0.0  ;;  %v10218_v57 = vld [vmem:[%s10588_s3 + $0x5f0] ss:$8 sps:$4 sm:$0xff]  }
0x17a3   : > { %v6518_v10 = vmax.f32 %v6402_v11, 0.0  ;;  %8290 = vmatprep.subr.bf16.mxu1 %v10172_v45 }
0x17a4   : > { %v6519_v61 = vmax.f32 %v6404_v9, 0.0 }
0x17a5   : > { %v11734_v12 = vpack.c.bf16 %v6518_v10, %v6502_v46  ;;  %v10226_v46 = vld [vmem:[%s10588_s3 + $0x614] ss:$8 sps:$4 sm:$0xff]   ;;  %v10224_v10 = vld [vmem:[%s10588_s3 + $0x610] ss:$8 sps:$4 sm:$0xff]  }
0x17a6   : > { %v6535_v47 = vpack.c.bf16 %v6519_v61, %v6503_v52  ;;  %8291 = vmatpush1.bf16.msra.mxu1 %v10170_v28  ;;  %v10221_v28 = vld [vmem:[%s10588_s3 + $0x600] ss:$8 sps:$4 sm:$0xff]   ;;  %v10232_v61 = vld [vmem:[%s10588_s3 + $0x634] ss:$8 sps:$4 sm:$0xff]  }
0x17a7   : > { %8303 = vmatprep.subr.bf16.mxu1 %v10175_v62  ;;  %v10229_v62 = vld [vmem:[%s10588_s3 + $0x624] ss:$8 sps:$4 sm:$0xff]   ;;  %v10227_v52 = vld [vmem:[%s10588_s3 + $0x620] ss:$8 sps:$4 sm:$0xff]  }
0x17a9   : > { %8293 = vmatmul.mubr.bf16.vlgmr.msra.gmra.mrb[44].mxu1 %v11515_v63  ;;  %v10185_v63 = vld [vmem:[%s10588_s3 + $0x540] ss:$8 sps:$4 sm:$0xff]  }
0x17aa   : > { %8304 = vmatpush1.bf16.msra.mxu1 %v10173_v8  ;;  %8335 = vmatprep.mubr.bf16.mxu1 %v6535_v47  ;;  %v10230_v47 = vld [vmem:[%s10588_s3 + $0x630] ss:$8 sps:$4 sm:$0xff]   ;;  %v10233_v8 = vld [vmem:[%s10588_s3 + $0x640] ss:$8 sps:$4 sm:$0xff]  }
0x17ab   : > { %8305 = vmatprep.subr.bf16.mxu1 %v10178_v49  ;;  %v10236_v49 = vld [vmem:[%s10588_s3 + $0x650] ss:$8 sps:$4 sm:$0xff]  }
0x17ae   : > { %8306 = vmatpush1.bf16.msra.mxu1 %v10176_v58  ;;  %v10241_v58 = vld [vmem:[%s10588_s3 + $0x664] ss:$8 sps:$4 sm:$0xff]  }
0x17af   : > { %8307 = vmatprep.subr.bf16.mxu1 %v10181_v17  ;;  %v10239_v17 = vld [vmem:[%s10588_s3 + $0x660] ss:$8 sps:$4 sm:$0xff]  }
0x17b2   : > { %8308 = vmatpush1.bf16.msra.mxu1 %v10179_v54  ;;  %v10244_v54 = vld [vmem:[%s10588_s3 + $0x674] ss:$8 sps:$4 sm:$0xff]  }
0x17b3   : > { %8309 = vmatprep.subr.bf16.mxu1 %v10184_v55  ;;  %v10242_v55 = vld [vmem:[%s10588_s3 + $0x670] ss:$8 sps:$4 sm:$0xff]  }
0x17b6   : > { %8310 = vmatpush1.bf16.msra.mxu1 %v10182_v60  ;;  %v10247_v60 = vld [vmem:[%s10588_s3 + $0x684] ss:$8 sps:$4 sm:$0xff]  }
0x17b7   : > { %8311 = vmatprep.subr.bf16.mxu1 %v10187_v0  ;;  %v10245_v0 = vld [vmem:[%s10588_s3 + $0x680] ss:$8 sps:$4 sm:$0xff]  }
0x17ba   : > { %8312 = vmatpush1.bf16.msra.mxu1 %v10185_v63  ;;  %v10250_v63 = vld [vmem:[%s10588_s3 + $0x694] ss:$8 sps:$4 sm:$0xff]  }
0x17bb   : > { %8313 = vmatprep.subr.bf16.mxu1 %v10190_v7  ;;  %v10248_v7 = vld [vmem:[%s10588_s3 + $0x690] ss:$8 sps:$4 sm:$0xff]  }
0x17be   : > { %8314 = vmatpush1.bf16.msra.mxu1 %v10188_v6  ;;  %v10253_v6 = vld [vmem:[%s10588_s3 + $0x6a4] ss:$8 sps:$4 sm:$0xff]  }
0x17bf   : > { %8315 = vmatprep.subr.bf16.mxu1 %v10193_v19  ;;  %v10251_v19 = vld [vmem:[%s10588_s3 + $0x6a0] ss:$8 sps:$4 sm:$0xff]  }
0x17c2   : > { %8316 = vmatpush1.bf16.msra.mxu1 %v10191_v4  ;;  %v10256_v4 = vld [vmem:[%s10588_s3 + $0x6b4] ss:$8 sps:$4 sm:$0xff]  }
0x17c3   : > { %8317 = vmatprep.subr.bf16.mxu1 %v10196_v41  ;;  %v10254_v41 = vld [vmem:[%s10588_s3 + $0x6b0] ss:$8 sps:$4 sm:$0xff]  }
0x17c6   : > { %8318 = vmatpush1.bf16.msra.mxu1 %v10194_v2  ;;  %v10259_v2 = vld [vmem:[%s10588_s3 + $0x6c4] ss:$8 sps:$4 sm:$0xff]  }
0x17c7   : > { %8319 = vmatprep.subr.bf16.mxu1 %v10199_v44  ;;  %v10257_v44 = vld [vmem:[%s10588_s3 + $0x6c0] ss:$8 sps:$4 sm:$0xff]  }
0x17ca   : > { %8320 = vmatpush1.bf16.msra.mxu1 %v10197_v16  ;;  %v10262_v16 = vld [vmem:[%s10588_s3 + $0x6d4] ss:$8 sps:$4 sm:$0xff]  }
0x17cb   : > { %8321 = vmatprep.subr.bf16.mxu1 %v10202_v18  ;;  %v10260_v18 = vld [vmem:[%s10588_s3 + $0x6d0] ss:$8 sps:$4 sm:$0xff]  }
0x17ce   : > { %8322 = vmatpush1.bf16.msra.mxu1 %v10200_v22  ;;  %v10265_v22 = vld [vmem:[%s10588_s3 + $0x6e4] ss:$8 sps:$4 sm:$0xff]  }
0x17cf   : > { %8323 = vmatprep.subr.bf16.mxu1 %v10205_v23  ;;  %v10263_v23 = vld [vmem:[%s10588_s3 + $0x6e0] ss:$8 sps:$4 sm:$0xff]  }
0x17d2   : > { %8324 = vmatpush1.bf16.msra.mxu1 %v10203_v25  ;;  %v10268_v25 = vld [vmem:[%s10588_s3 + $0x6f4] ss:$8 sps:$4 sm:$0xff]  }
0x17d3   : > { %8325 = vmatprep.subr.bf16.mxu1 %v10208_v26  ;;  %v10266_v26 = vld [vmem:[%s10588_s3 + $0x6f0] ss:$8 sps:$4 sm:$0xff]  }
0x17d6   : > { %8326 = vmatpush1.bf16.msra.mxu1 %v10206_v24  ;;  %v10271_v24 = vld [vmem:[%s10588_s3 + $0x704] ss:$8 sps:$4 sm:$0xff]  }
0x17d7   : > { %8327 = vmatprep.subr.bf16.mxu1 %v10211_v27  ;;  %v10269_v27 = vld [vmem:[%s10588_s3 + $0x700] ss:$8 sps:$4 sm:$0xff]  }
0x17da   : > { %8328 = vmatpush1.bf16.msra.mxu1 %v10209_v30  ;;  %v10274_v30 = vld [vmem:[%s10588_s3 + $0x714] ss:$8 sps:$4 sm:$0xff]  }
0x17db   : > { %8329 = vmatprep.subr.bf16.mxu1 %v10214_v31  ;;  %v10272_v31 = vld [vmem:[%s10588_s3 + $0x710] ss:$8 sps:$4 sm:$0xff]  }
0x17de   : > { %v6483_v38 = vpop.f32.mrb[68].mxu0  ;;  %8330 = vmatpush1.bf16.msra.mxu1 %v10212_v33  ;;  %v10277_v33 = vld [vmem:[%s10588_s3 + $0x724] ss:$8 sps:$4 sm:$0xff]  }
0x17df   : > { %v6484_v14 = vadd.f32 %v6483_v38, %v4847_v35  ;;  %v6485_v42 = vpop.f32.mrb[69].mxu0  ;;  %8331 = vmatprep.subr.bf16.mxu1 %v10217_v36  ;;  %v10280_v36 = vld [vmem:[%s10588_s3 + $0x734] ss:$8 sps:$4 sm:$0xff]   ;;  %v10281_v38 = vld [vmem:[%s10588_s3 + $0x740] ss:$8 sps:$4 sm:$0xff]  }
0x17e0   : > { %v6486_v3 = vadd.f32 %v6485_v42, %v4851_v37  ;;  %v6487_v13 = vpop.f32.mrb[70].mxu0  ;;  %v10289_v42 = vld [vmem:[%s10588_s3 + $0x764] ss:$8 sps:$4 sm:$0xff]  }
0x17e1   : > { %v6488_v15 = vadd.f32 %v6487_v13, %v4847_v35  ;;  %v6489_v59 = vpop.f32.mrb[71].mxu0  ;;  %v6506_v50 = vmax.f32 %v6484_v14, 0.0  ;;  %v10275_v35 = vld [vmem:[%s10588_s3 + $0x720] ss:$8 sps:$4 sm:$0xff]   ;;  %v10284_v14 = vld [vmem:[%s10588_s3 + $0x750] ss:$8 sps:$4 sm:$0xff]  }
0x17e2   : > { %v6490_v45 = vadd.f32 %v6489_v59, %v4851_v37  ;;  %8332 = vmatpush1.bf16.msra.mxu1 %v10215_v43  ;;  %v6507_v1 = vmax.f32 %v6486_v3, 0.0  ;;  %v10278_v37 = vld [vmem:[%s10588_s3 + $0x730] ss:$8 sps:$4 sm:$0xff]   ;;  %v10286_v43 = vld [vmem:[%s10588_s3 + $0x754] ss:$8 sps:$4 sm:$0xff]  }
0x17e3   : > { %v6522_v40 = vmax.f32 %v6488_v15, 0.0  ;;  %8333 = vmatprep.subr.bf16.mxu1 %v10220_v29  ;;  %v10287_v29 = vld [vmem:[%s10588_s3 + $0x760] ss:$8 sps:$4 sm:$0xff]   ;;  %v10292_v3 = vld [vmem:[%s10588_s3 + $0x774] ss:$8 sps:$4 sm:$0xff]  }
0x17e4   : > { %v6523_v11 = vmax.f32 %v6490_v45, 0.0  ;;  %v10290_v13 = vld [vmem:[%s10588_s3 + $0x770] ss:$8 sps:$4 sm:$0xff]   ;;  %v10295_v15 = vld [vmem:[%s10588_s3 + $0x784] ss:$8 sps:$4 sm:$0xff]  }
0x17e5   : > { %v11775_v5 = vpack.c.bf16 %v6522_v40, %v6506_v50  ;;  %v10293_v59 = vld [vmem:[%s10588_s3 + $0x780] ss:$8 sps:$4 sm:$0xff]   ;;  %v10298_v45 = vld [vmem:[%s10588_s3 + $0x794] ss:$8 sps:$4 sm:$0xff]   ;;  %v10301_v50 = vld [vmem:[%s10588_s3 + $0x7a4] ss:$8 sps:$4 sm:$0xff]  }
0x17e6   : > { %v11777_v9 = vpack.c.bf16 %v6523_v11, %v6507_v1  ;;  %8334 = vmatpush1.bf16.msra.mxu1 %v10218_v57  ;;  %v10296_v57 = vld [vmem:[%s10588_s3 + $0x790] ss:$8 sps:$4 sm:$0xff]   ;;  %v10299_v40 = vld [vmem:[%s10588_s3 + $0x7a0] ss:$8 sps:$4 sm:$0xff]   ;;  %v10307_v11 = vld [vmem:[%s10588_s3 + $0x7c4] ss:$8 sps:$4 sm:$0xff]  }
0x17e7   : > { %8346 = vmatprep.subr.bf16.mxu1 %v10223_v39  ;;  %v10304_v39 = vld [vmem:[%s10588_s3 + $0x7b4] ss:$8 sps:$4 sm:$0xff]   ;;  %v10302_v1 = vld [vmem:[%s10588_s3 + $0x7b0] ss:$8 sps:$4 sm:$0xff]  }
0x17e9   : > { %8336 = vmatmul.mubr.bf16.vlgmr.msra.gmra.mrb[44].mxu1 %v11734_v12  ;;  %v10235_v12 = vld [vmem:[%s10588_s3 + $0x644] ss:$8 sps:$4 sm:$0xff]  }
0x17ea   : > { %8347 = vmatpush1.bf16.msra.mxu1 %v10221_v28  ;;  %8378 = vmatprep.mubr.bf16.mxu1 %v11599_v32  ;;  %v10238_v32 = vld [vmem:[%s10588_s3 + $0x654] ss:$8 sps:$4 sm:$0xff]  }
0x17eb   : > { %8348 = vmatprep.subr.bf16.mxu1 %v10226_v46  ;;  %v10310_v28 = vld [vmem:[%s10588_s3 + $0x7d4] ss:$8 sps:$4 sm:$0xff]   ;;  %v10308_v46 = vld [vmem:[%s10588_s3 + $0x7d0] ss:$8 sps:$4 sm:$0xff]  }
0x17ee   : > { %8349 = vmatpush1.bf16.msra.mxu1 %v10224_v10  ;;  %v10313_v10 = vld [vmem:[%s10588_s3 + $0x7e4] ss:$8 sps:$4 sm:$0xff]  }
0x17ef   : > { %8350 = vmatprep.subr.bf16.mxu1 %v10229_v62  ;;  %v10311_v62 = vld [vmem:[%s10588_s3 + $0x7e0] ss:$8 sps:$4 sm:$0xff]  }
0x17f2   : > { %8351 = vmatpush1.bf16.msra.mxu1 %v10227_v52  ;;  %v10316_v52 = vld [vmem:[%s10588_s3 + $0x7f4] ss:$8 sps:$4 sm:$0xff]  }
0x17f3   : > { %8352 = vmatprep.subr.bf16.mxu1 %v10232_v61  ;;  %v10314_v61 = vld [vmem:[%s10588_s3 + $0x7f0] ss:$8 sps:$4 sm:$0xff]  }
0x17f6   : > { %8353 = vmatpush1.bf16.msra.mxu1 %v10230_v47  ;;  %v6796_v47 = vld [vmem:[%s732_s20] sm:$0x3] }
0x17f7   : > { %8354 = vmatprep.subr.bf16.mxu1 %v10235_v12  ;;  %v6801_v12 = vrot.slane %v6796_v47, %v10740_v51 }
0x17fa   : > { %8355 = vmatpush1.bf16.msra.mxu1 %v10233_v8  ;;  %v6805_v8 = vrot.slane %v6796_v47, %v10748_v53 }
0x17fb   : > { %8356 = vmatprep.subr.bf16.mxu1 %v10238_v32 }
0x17fe   : > { %8357 = vmatpush1.bf16.msra.mxu1 %v10236_v49 }
0x17ff   : > { %8358 = vmatprep.subr.bf16.mxu1 %v10241_v58 }
0x1802   : > { %8359 = vmatpush1.bf16.msra.mxu1 %v10239_v17 }
0x1803   : > { %8360 = vmatprep.subr.bf16.mxu1 %v10244_v54 }
0x1806   : > { %8361 = vmatpush1.bf16.msra.mxu1 %v10242_v55 }
0x1807   : > { %8362 = vmatprep.subr.bf16.mxu1 %v10247_v60 }
0x180a   : > { %8363 = vmatpush1.bf16.msra.mxu1 %v10245_v0 }
0x180b   : > { %8364 = vmatprep.subr.bf16.mxu1 %v10250_v63 }
0x180e   : > { %8365 = vmatpush1.bf16.msra.mxu1 %v10248_v7 }
0x180f   : > { %8366 = vmatprep.subr.bf16.mxu1 %v10253_v6 }
0x1812   : > { %8367 = vmatpush1.bf16.msra.mxu1 %v10251_v19 }
0x1813   : > { %8368 = vmatprep.subr.bf16.mxu1 %v10256_v4 }
0x1816   : > { %8369 = vmatpush1.bf16.msra.mxu1 %v10254_v41 }
0x1817   : > { %8370 = vmatprep.subr.bf16.mxu1 %v10259_v2 }
0x181a   : > { %8371 = vmatpush1.bf16.msra.mxu1 %v10257_v44 }
0x181b   : > { %8372 = vmatprep.subr.bf16.mxu1 %v10262_v16 }
0x181e   : > { %8373 = vmatpush1.bf16.msra.mxu1 %v10260_v18 }
0x181f   : > { %8374 = vmatprep.subr.bf16.mxu1 %v10265_v22 }
0x1822   : > { %8375 = vmatpush1.bf16.msra.mxu1 %v10263_v23 }
0x1823   : > { %8376 = vmatprep.subr.bf16.mxu1 %v10268_v25 }
0x1826   : > { %8377 = vmatpush1.bf16.msra.mxu1 %v10266_v26 }
0x1827   : > { %8389 = vmatprep.subr.bf16.mxu1 %v10271_v24 }
0x1829   : > { %8379 = vmatmul.mubr.bf16.vlgmr.msra.gmra.mrb[44].mxu1 %v11597_v48  ;;  %v10283_v48 = vld [vmem:[%s10588_s3 + $0x744] ss:$8 sps:$4 sm:$0xff]  }
0x182a   : > { %8390 = vmatpush1.bf16.msra.mxu1 %v10269_v27  ;;  %8421 = vmatprep.mubr.bf16.mxu1 %v11777_v9  ;;  %v10305_v9 = vld [vmem:[%s10588_s3 + $0x7c0] ss:$8 sps:$4 sm:$0xff]  }
0x182b   : > { %8391 = vmatprep.subr.bf16.mxu1 %v10274_v30 }
0x182e   : > { %8392 = vmatpush1.bf16.msra.mxu1 %v10272_v31 }
0x182f   : > { %8393 = vmatprep.subr.bf16.mxu1 %v10277_v33 }
0x1832   : > { %8394 = vmatpush1.bf16.msra.mxu1 %v10275_v35 }
0x1833   : > { %8395 = vmatprep.subr.bf16.mxu1 %v10280_v36 }
0x1836   : > { %8396 = vmatpush1.bf16.msra.mxu1 %v10278_v37  ;;  %v8436_v37 = vld [vmem:[%s736_s5] sm:$0x3]  ;;  %s10437_s5 = smov [#allocation3]  }
0x1837   : > { %8397 = vmatprep.subr.bf16.mxu1 %v10283_v48  ;;  %v8437_v48 = vld [vmem:[%s740_s6] sm:$0x3]  ;;  %s8514_s25 = sshll.u32 %s10437_s5, 4  ;;  %s11873_s25 = int_to_ptr.vmem [resolvable:$true] %s8514_s25 }
0x1838   : > { %s10394_s6 = scalar_lea.vmem %s11873_s25, 512  ;;  %p10401_p9 = scmp.lt.s32.totalorder %s11873_s25, %s11873_s25 }
0x1839   : > { %p10395_p6 = scmp.ne.s32.totalorder %s11873_s25, %s10394_s6  ;;  %p10402_p10 = scmp.lt.s32.totalorder %s10394_s6, %s10394_s6 }
0x183a   : > { %8398 = vmatpush1.bf16.msra.mxu1 %v10281_v38  ;;  %v8474_v38 = vrot.slane %v8436_v37, %v10740_v51 }
0x183b   : > { %8399 = vmatprep.subr.bf16.mxu1 %v10286_v43  ;;  %v8478_v43 = vrot.slane %v8436_v37, %v10748_v53  ;;  %p10396_p7 = pnand %p10395_p6, %p9693_p5  ;;  %p10403_p11 = por %p10402_p10, %p10401_p9 }
0x183d   : > { %p10397_p8 = pneg %p10396_p7 }
0x183e   : > { %8400 = vmatpush1.bf16.msra.mxu1 %v10284_v14 }
0x183f   : > { %8401 = vmatprep.subr.bf16.mxu1 %v10289_v42  ;;  %v8489_v42 = vrot.slane %v8437_v48, %v10740_v51  ;;  %p10404_p12 = pnand %p10403_p11, %p10397_p8 }
0x1842   : > { %8402 = vmatpush1.bf16.msra.mxu1 %v10287_v29  ;;  %v8493_v29 = vrot.slane %v8437_v48, %v10748_v53 }
0x1843   : > { %8403 = vmatprep.subr.bf16.mxu1 %v10292_v3 }
0x1846   : > { %8404 = vmatpush1.bf16.msra.mxu1 %v10290_v13 }
0x1847   : > { %8405 = vmatprep.subr.bf16.mxu1 %v10295_v15 }
0x184a   : > { %8406 = vmatpush1.bf16.msra.mxu1 %v10293_v59 }
0x184b   : > { %8407 = vmatprep.subr.bf16.mxu1 %v10298_v45 }
0x184e   : > { %8408 = vmatpush1.bf16.msra.mxu1 %v10296_v57 }
0x184f   : > { %8409 = vmatprep.subr.bf16.mxu1 %v10301_v50 }
0x1852   : > { %8410 = vmatpush1.bf16.msra.mxu1 %v10299_v40 }
0x1853   : > { %8411 = vmatprep.subr.bf16.mxu1 %v10304_v39 }
0x1856   : > { %8412 = vmatpush1.bf16.msra.mxu1 %v10302_v1 }
0x1857   : > { %8413 = vmatprep.subr.bf16.mxu1 %v10307_v11 }
0x185a   : > { %8414 = vmatpush1.bf16.msra.mxu1 %v10305_v9 }
0x185b   : > { %8415 = vmatprep.subr.bf16.mxu1 %v10310_v28 }
0x185e   : > { %8416 = vmatpush1.bf16.msra.mxu1 %v10308_v46 }
0x185f   : > { %8417 = vmatprep.subr.bf16.mxu1 %v10313_v10 }
0x1862   : > { %8418 = vmatpush1.bf16.msra.mxu1 %v10311_v62 }
0x1863   : > { %8419 = vmatprep.subr.bf16.mxu1 %v10316_v52 }
0x1866   : > { %8420 = vmatpush1.bf16.msra.mxu1 %v10314_v61 }
0x1869   : > { %8422 = vmatmul.mubr.bf16.vlgmr.msra.gmra.mrb[44].mxu1 %v11775_v5 }
0x193c   : > { %v8423_v32 = vpop.f32.mrb[44].mxu1 }
0x193d   : > { %v9657_v49 = vadd.f32 %v8423_v32, %v6801_v12  ;;  %v8425_v58 = vpop.f32.mrb[45].mxu1 }
0x193e   : > { %v9658_v17 = vadd.f32 %v8425_v58, %v6805_v8  ;;  %v8427_v54 = vpop.f32.mrb[46].mxu1 }
0x193f   : > { %v8432_v55 = vadd.f32 %v9657_v49, %v11297_v56  ;;  %v9659_v60 = vadd.f32 %v8427_v54, %v6801_v12  ;;  %v8429_v0 = vpop.f32.mrb[47].mxu1 }
0x1940   : > { %v8433_v5 = vadd.f32 %v9658_v17, %v11299_v34  ;;  %v9660_v63 = vadd.f32 %v8429_v0, %v6805_v8 }
0x1941   : > { %v8434_v7 = vadd.f32 %v9659_v60, %v11301_v20 }
0x1942   : > { %v8435_v6 = vadd.f32 %v9660_v63, %v11303_v21  ;;  %v8438_v19 = vadd.f32 %v8433_v5, %v8432_v55 }
0x1944   : > { %8439 = vadd.xlane.f32.xlu0 %v8438_v19  ;;  %v8441_v4 = vadd.f32 %v8435_v6, %v8434_v7 }
0x1946   : > { %8442 = vadd.xlane.f32.xlu1 %v8441_v4 }
0x19d1   : > { %v8440_v41 = vpop.xlane.xlu0 %8439 }
0x19d2   : > { %v8444_v2 = vmul.f32 0.00390625, %v8440_v41 }
0x19d3   : > { %v8443_v44 = vpop.xlane.xlu1 %8442 }
0x19d4   : > { %v8446_v16 = vsub.f32 %v8432_v55, %v8444_v2  ;;  %v8447_v18 = vsub.f32 %v8433_v5, %v8444_v2  ;;  %v8445_v22 = vmul.f32 0.00390625, %v8443_v44 }
0x19d6   : > { %v8448_v56 = vsub.f32 %v8434_v7, %v8445_v22  ;;  %v8449_v23 = vsub.f32 %v8435_v6, %v8445_v22  ;;  %v8450_v25 = vmul.f32 %v8446_v16, %v8446_v16  ;;  %v8451_v34 = vmul.f32 %v8447_v18, %v8447_v18 }
0x19d8   : > { %v8454_v26 = vadd.f32 %v8451_v34, %v8450_v25  ;;  %v8452_v20 = vmul.f32 %v8448_v56, %v8448_v56  ;;  %v8453_v24 = vmul.f32 %v8449_v23, %v8449_v23 }
0x19da   : > { %8455 = vadd.xlane.f32.xlu0 %v8454_v26  ;;  %v8457_v21 = vadd.f32 %v8453_v24, %v8452_v20 }
0x19dc   : > { %8458 = vadd.xlane.f32.xlu1 %v8457_v21 }
0x1a67   : > { %v8456_v27 = vpop.xlane.xlu0 %8455 }
0x1a68   : > { %v8460_v30 = vmul.f32 0.00390625, %v8456_v27 }
0x1a69   : > { %v8459_v31 = vpop.xlane.xlu1 %8458 }
0x1a6a   : > { %v8462_v33 = vadd.f32 1e-05, %v8460_v30  ;;  %v8461_v35 = vmul.f32 0.00390625, %v8459_v31 }
0x1a6c   : > { %10385 = vrsqrt.f32 %v8462_v33  ;;  %v8463_v36 = vadd.f32 1e-05, %v8461_v35 }
0x1a6e   : > { %10387 = vrsqrt.f32 %v8463_v36 }
0x1a76   : > { %v10386_v14 = vpop.eup %10385 }
0x1a77   : > { %v8466_v3 = vmul.f32 %v10386_v14, %v8446_v16  ;;  %v8467_v13 = vmul.f32 %v10386_v14, %v8447_v18 }
0x1a78   : > { %v10388_v15 = vpop.eup %10387 }
0x1a79   : > { %v8481_v59 = vmul.f32 %v8474_v38, %v8466_v3  ;;  %v8482_v45 = vmul.f32 %v8478_v43, %v8467_v13  ;;  %v8468_v57 = vmul.f32 %v10388_v15, %v8448_v56  ;;  %v8469_v50 = vmul.f32 %v10388_v15, %v8449_v23 }
0x1a7b   : > { %v8496_v40 = vadd.f32 %v8489_v42, %v8481_v59  ;;  %v8497_v39 = vadd.f32 %v8493_v29, %v8482_v45  ;;  %v8483_v1 = vmul.f32 %v8474_v38, %v8468_v57  ;;  %v8484_v11 = vmul.f32 %v8478_v43, %v8469_v50 }
0x1a7d   : > { %8500 = vst [vmem:[#allocation2] sm:$0xff] %v8496_v40  ;;  %8501 = vst [vmem:[#allocation2 + $0x8] sm:$0xff] %v8497_v39  ;;  %v8498_v51 = vadd.f32 %v8489_v42, %v8483_v1  ;;  %v8499_v53 = vadd.f32 %v8493_v29, %v8484_v11 }
0x1a7e   : > { %8504 = vst [vmem:[#allocation3] sm:$0xff] %v8496_v40  ;;  %8505 = vst [vmem:[#allocation3 + $0x8] sm:$0xff] %v8497_v39 }
0x1a7f   : > { %8502 = vst [vmem:[#allocation2 + $0x10] sm:$0xff] %v8498_v51  ;;  %8503 = vst [vmem:[#allocation2 + $0x18] sm:$0xff] %v8499_v53 }
0x1a80   : > { %8506 = vst [vmem:[#allocation3 + $0x10] sm:$0xff] %v8498_v51  ;;  %8507 = vst [vmem:[#allocation3 + $0x18] sm:$0xff] %v8499_v53 }
0x1a81   : > { %10407 = shalt.err (!%p10404_p12)
}
0x1a82   : > { %s11955_s26 = sld [smem:[#allocation16_spill]] }
0x1a88   : > { %s10408_s30 = scalar_lea.hbm %s11955_s26, 512 }
0x1a89   : > { %p10409_p13 = scmp.ne.s32.totalorder %s11955_s26, %s10408_s30  ;;  %p10414_p2 = scmp.lt.u32.totalorder %s10408_s30, %s11955_s26 }
0x1a8b   : > { %p10410_p0 = pnand %p10409_p13, %p9693_p5 }
0x1a8d   : > { %p10411_p1 = pneg %p10410_p0 }
0x1a8f   : > { %p10416_p3 = pnand %p10414_p2, %p10411_p1 }
0x1a91   : > { %10419 = shalt.err (!%p10416_p3)
}
0x1a92   : > { %s10438_s19 = smov 256   ;;  %s10439_s23 = smov 16  }
0x1a93   : > { %9690 = dma.vmem_to_hbm [thread:$0]  (%p9693_p5), %s11873_s25, 512, %s11955_s26, [#allocation4], %s10438_s19, %s10438_s19, %s10439_s23  }
0x1a94   : > { %10425 = dma.done.wait (%p9693_p5), [#allocation4], 512  }
0x1a95   : > { %10427 = vsyncadd (%p9693_p5), [#allocation4], 4294966784 }
0x1a96 PF: > { %s11956_s3 = sld [smem:[#allocation6_spill]] }
0x1a9c   : > { %s27_s21 = sadd.s32 1, %s11956_s3  }
0x1a9d   : > { %p24_p4 = scmp.ge.s32.totalorder %s27_s21, 4  }
0x1a9f   :  { %26 = sbr.rel (!%p24_p4) target bundleno = 10 (0xa), region = 154 }
0x1aa6   :  { %8530 = vsyncpa [#allocation4], 1 }
0x1aa7   :  { %8532 = vsyncpa [#allocation4 + $0x1], 1 }

</bundles_post_ra>
